<compile_context>
chip_gen: v7x
topology: tpu7x:2x2x1
jax: 0.10.0
libtpu: 0.0.40
codegen_flags: <defaults>
</compile_context>

<pallas_src>
import functools

import jax
import jax.numpy as jnp
import numpy as np
from jax.experimental import pallas as pl
from jax.experimental.pallas import tpu as pltpu


# ----------------------------------------------------------------------------
# Bilinear-upsample interpolation matrix (matches F.interpolate,
# mode='bilinear', align_corners=False, integer scale factor).
# ----------------------------------------------------------------------------
def bilinear_upsample_matrix(size: int, scale: int) -> np.ndarray:
    out = np.zeros((scale * size, size), dtype=np.float32)
    for i in range(scale * size):
        src = (i + 0.5) / scale - 0.5
        src = max(src, 0.0)                       # PyTorch clamps negative coords
        i0 = int(np.floor(src))
        i1 = min(i0 + 1, size - 1)
        lam = src - i0
        out[i, i0] += 1.0 - lam
        out[i, i1] += lam
    return out


# ----------------------------------------------------------------------------
# Pallas kernel: 3x3 conv (9 shifted matmuls on the MXU, C_in on lanes)
# + separable bilinear upsample (sW on lanes) + rsqrt channel L2 normalize
# + lane-dense per-channel NCHW plane stores.
# ----------------------------------------------------------------------------
def _incidence_kernel(xp_ref, w_ref, b_ref, uh_ref, uwt_ref, o_ref,
                      *, H, W, C_in, C_out):
    xp = xp_ref[0]                                   # (H+2, W+2, C_in)

    # --- 3x3 "same" convolution: sum of 9 shifted (H,W,Cin)x(Cin,Cout) matmuls
    acc = jnp.zeros((H, W, C_out), dtype=jnp.float32)
    for dy in range(3):
        for dx in range(3):
            k = dy * 3 + dx
            patch = xp[dy:dy + H, dx:dx + W, :]      # (H, W, C_in) static slice
            acc = acc + jax.lax.dot_general(
                patch, w_ref[k],
                dimension_numbers=(((2,), (0,)), ((), ())),
                preferred_element_type=jnp.float32)
    acc = acc + b_ref[...][None]                     # bias (1,1,C_out) broadcast

    # --- separable bilinear upsample x4 per channel:
    #     W direction first (keeps the wide sW dim on lanes), then H direction.
    uh = uh_ref[...]                                 # (sH, H)
    uwt = uwt_ref[...]                               # (W, sW)
    ys = []
    for c in range(C_out):
        t = jnp.dot(acc[:, :, c], uwt, preferred_element_type=jnp.float32)  # (H, sW)
        ys.append(jnp.dot(uh, t, preferred_element_type=jnp.float32))       # (sH, sW)

    # --- L2 normalize over channels (torch F.normalize, eps=1e-12):
    #     x / max(||x||, 1e-12) == x * rsqrt(max(||x||^2, 1e-24))
    inv = jax.lax.rsqrt(jnp.maximum(sum(y * y for y in ys), 1e-24))

    # --- lane-dense per-channel plane stores straight into the NCHW output
    for c in range(C_out):
        o_ref[0, c] = (ys[c] * inv).astype(o_ref.dtype)


@functools.partial(jax.jit, static_argnames=("scale",))
def incidence_head_pallas(x_nchw, weight_oihw, bias, scale=4):
    """IncidenceHead forward. x_nchw: (B, C_in, H, W) f32 -> (B, 3, sH, sW)."""
    B, C_in, H, W = x_nchw.shape
    C_out = weight_oihw.shape[0]
    sH, sW = scale * H, scale * W

    # ---- glue: layout & parameter massaging (fused by the surrounding jit) ----
    x_nhwc = jnp.transpose(x_nchw, (0, 2, 3, 1))                     # NHWC
    x_pad = jnp.pad(x_nhwc, ((0, 0), (1, 1), (1, 1), (0, 0)))        # (B,H+2,W+2,Cin)
    # (C_out, C_in, 3, 3) -> (9, C_in, C_out), tap index k = dy*3 + dx
    w9 = jnp.transpose(weight_oihw, (2, 3, 1, 0)).reshape(9, C_in, C_out)
    b2 = bias.reshape(1, C_out)
    uh = jnp.asarray(bilinear_upsample_matrix(H, scale))             # (sH, H)
    uwt = jnp.asarray(bilinear_upsample_matrix(W, scale).T)          # (W, sW)

    kernel = functools.partial(_incidence_kernel, H=H, W=W,
                               C_in=C_in, C_out=C_out)

    # Output is produced directly in NCHW: no post-kernel transpose needed.
    out_nchw = pl.pallas_call(
        kernel,
        out_shape=jax.ShapeDtypeStruct((B, C_out, sH, sW), jnp.float32),
        grid_spec=pltpu.PrefetchScalarGridSpec(
            num_scalar_prefetch=0,
            grid=(B,),                 # B>=2 keeps both v7x TensorCores busy
            in_specs=[
                pl.BlockSpec((1, H + 2, W + 2, C_in), lambda b: (b, 0, 0, 0)),
                pl.BlockSpec((9, C_in, C_out), lambda b: (0, 0, 0)),
                pl.BlockSpec((1, C_out), lambda b: (0, 0)),
                pl.BlockSpec((sH, H), lambda b: (0, 0)),
                pl.BlockSpec((W, sW), lambda b: (0, 0)),
            ],
            out_specs=pl.BlockSpec((1, C_out, sH, sW), lambda b: (b, 0, 0, 0)),
        ),
        compiler_params=pltpu.CompilerParams(
            dimension_semantics=("parallel",)),
    )(x_pad, w9, b2, uh, uwt)

    return out_nchw


# ----------------------------------------------------------------------------
# Pure-JAX reference for verification.
# ----------------------------------------------------------------------------
def incidence_head_ref(x_nchw, weight_oihw, bias, scale=4):
    y = jax.lax.conv_general_dilated(
        x_nchw, weight_oihw, window_strides=(1, 1), padding="SAME",
        dimension_numbers=("NCHW", "OIHW", "NCHW"))
    y = y + bias[None, :, None, None]
    H, W = y.shape[2], y.shape[3]
    uh = jnp.asarray(bilinear_upsample_matrix(H, scale))
    uw = jnp.asarray(bilinear_upsample_matrix(W, scale))
    y = jnp.einsum("ph,bchw->bcpw", uh, y)
    y = jnp.einsum("bcpw,qw->bcpq", y, uw)
    nrm = jnp.sqrt(jnp.sum(y * y, axis=1, keepdims=True))
    return y / jnp.maximum(nrm, 1e-12)


if __name__ == "__main__":
    # Small shapes consistent with the module: the IncidenceHead input is the
    # crf0 output (crf_dims[0] = 128 channels); forward calls it with scale=4.
    B, C_in, H, W = 2, 128, 16, 16
    C_out, scale = 3, 4

    key = jax.random.PRNGKey(0)
    kx, kw, kb = jax.random.split(key, 3)
    x = jax.random.normal(kx, (B, C_in, H, W), dtype=jnp.float32)
    # deterministic synthetic Conv2d(128 -> 3, k=3) parameters
    weight = jax.random.normal(kw, (C_out, C_in, 3, 3), dtype=jnp.float32) * 0.05
    bias = jax.random.normal(kb, (C_out,), dtype=jnp.float32) * 0.05

    out = incidence_head_pallas(x, weight, bias, scale=scale)
    out = jax.block_until_ready(out)

    ref = jax.block_until_ready(incidence_head_ref(x, weight, bias, scale=scale))
    assert out.shape == (B, C_out, scale * H, scale * W)
    np.testing.assert_allclose(np.asarray(out), np.asarray(ref), atol=2e-5, rtol=2e-5)

    print("KERNEL_OK")
</pallas_src>

<mosaic_0001>
module attributes {stable_mosaic.version = 11 : i64} {
  func.func @_incidence_kernel(%arg0: i32, %arg1: memref<1x18x18x128xf32, #tpu.memory_space<vmem>>, %arg2: memref<9x128x3xf32, #tpu.memory_space<vmem>>, %arg3: memref<1x3xf32, #tpu.memory_space<vmem>>, %arg4: memref<64x16xf32, #tpu.memory_space<vmem>>, %arg5: memref<16x64xf32, #tpu.memory_space<vmem>>, %arg6: memref<1x3x64x64xf32, #tpu.memory_space<vmem>>) attributes {dimension_semantics = [#tpu.dimension_semantics<parallel>], iteration_bounds = array<i64: 2>, scalar_prefetch = 0 : i64, scratch_operands = 0 : i64, tpu.core_type = #tpu.core_type<tc>, window_params = [{transform_indices = @transform_0, window_bounds = array<i64: 1, 18, 18, 128>}, {pipeline_mode = #tpu.pipeline_mode<synchronous>, transform_indices = @transform_1, window_bounds = array<i64: 9, 128, 3>}, {pipeline_mode = #tpu.pipeline_mode<synchronous>, transform_indices = @transform_2, window_bounds = array<i64: 1, 3>}, {pipeline_mode = #tpu.pipeline_mode<synchronous>, transform_indices = @transform_3, window_bounds = array<i64: 64, 16>}, {pipeline_mode = #tpu.pipeline_mode<synchronous>, transform_indices = @transform_4, window_bounds = array<i64: 16, 64>}, {transform_indices = @transform_5, window_bounds = array<i64: 1, 3, 64, 64>}]} {
    %c0 = arith.constant 0 : index
    %c0_0 = arith.constant 0 : index
    %c0_1 = arith.constant 0 : index
    %c0_2 = arith.constant 0 : index
    %0 = vector.load %arg1[%c0, %c0_0, %c0_1, %c0_2] : memref<1x18x18x128xf32, #tpu.memory_space<vmem>>, vector<1x18x18x128xf32>
    %1 = vector.shape_cast %0 : vector<1x18x18x128xf32> to vector<18x18x128xf32>
    %cst = arith.constant 0.000000e+00 : f32
    %2 = vector.broadcast %cst : f32 to vector<16x16x3xf32>
    %3 = vector.extract_strided_slice %1 {offsets = [0, 0, 0], sizes = [16, 16, 128], strides = [1, 1, 1]} : vector<18x18x128xf32> to vector<16x16x128xf32>
    %c0_3 = arith.constant 0 : index
    %c0_4 = arith.constant 0 : index
    %c0_5 = arith.constant 0 : index
    %4 = vector.load %arg2[%c0_3, %c0_4, %c0_5] : memref<9x128x3xf32, #tpu.memory_space<vmem>>, vector<1x128x3xf32>
    %5 = vector.shape_cast %4 : vector<1x128x3xf32> to vector<128x3xf32>
    %cst_6 = arith.constant dense<0.000000e+00> : vector<16x16x3xf32>
    %6 = tpu.matmul %3, %5, %cst_6 {dimension_numbers = #tpu.dot_dimension_numbers<[2], [0], [0, 1], [1], [0, 0, 0, 1, 1, 1], [], []>} : vector<16x16x128xf32>, vector<128x3xf32>, vector<16x16x3xf32> -> vector<16x16x3xf32>
    %7 = arith.addf %2, %6 : vector<16x16x3xf32>
    %8 = vector.extract_strided_slice %1 {offsets = [0, 1, 0], sizes = [16, 16, 128], strides = [1, 1, 1]} : vector<18x18x128xf32> to vector<16x16x128xf32>
    %c1 = arith.constant 1 : index
    %c0_7 = arith.constant 0 : index
    %c0_8 = arith.constant 0 : index
    %9 = vector.load %arg2[%c1, %c0_7, %c0_8] : memref<9x128x3xf32, #tpu.memory_space<vmem>>, vector<1x128x3xf32>
    %10 = vector.shape_cast %9 : vector<1x128x3xf32> to vector<128x3xf32>
    %cst_9 = arith.constant dense<0.000000e+00> : vector<16x16x3xf32>
    %11 = tpu.matmul %8, %10, %cst_9 {dimension_numbers = #tpu.dot_dimension_numbers<[2], [0], [0, 1], [1], [0, 0, 0, 1, 1, 1], [], []>} : vector<16x16x128xf32>, vector<128x3xf32>, vector<16x16x3xf32> -> vector<16x16x3xf32>
    %12 = arith.addf %7, %11 : vector<16x16x3xf32>
    %13 = vector.extract_strided_slice %1 {offsets = [0, 2, 0], sizes = [16, 16, 128], strides = [1, 1, 1]} : vector<18x18x128xf32> to vector<16x16x128xf32>
    %c2 = arith.constant 2 : index
    %c0_10 = arith.constant 0 : index
    %c0_11 = arith.constant 0 : index
    %14 = vector.load %arg2[%c2, %c0_10, %c0_11] : memref<9x128x3xf32, #tpu.memory_space<vmem>>, vector<1x128x3xf32>
    %15 = vector.shape_cast %14 : vector<1x128x3xf32> to vector<128x3xf32>
    %cst_12 = arith.constant dense<0.000000e+00> : vector<16x16x3xf32>
    %16 = tpu.matmul %13, %15, %cst_12 {dimension_numbers = #tpu.dot_dimension_numbers<[2], [0], [0, 1], [1], [0, 0, 0, 1, 1, 1], [], []>} : vector<16x16x128xf32>, vector<128x3xf32>, vector<16x16x3xf32> -> vector<16x16x3xf32>
    %17 = arith.addf %12, %16 : vector<16x16x3xf32>
    %18 = vector.extract_strided_slice %1 {offsets = [1, 0, 0], sizes = [16, 16, 128], strides = [1, 1, 1]} : vector<18x18x128xf32> to vector<16x16x128xf32>
    %c3 = arith.constant 3 : index
    %c0_13 = arith.constant 0 : index
    %c0_14 = arith.constant 0 : index
    %19 = vector.load %arg2[%c3, %c0_13, %c0_14] : memref<9x128x3xf32, #tpu.memory_space<vmem>>, vector<1x128x3xf32>
    %20 = vector.shape_cast %19 : vector<1x128x3xf32> to vector<128x3xf32>
    %cst_15 = arith.constant dense<0.000000e+00> : vector<16x16x3xf32>
    %21 = tpu.matmul %18, %20, %cst_15 {dimension_numbers = #tpu.dot_dimension_numbers<[2], [0], [0, 1], [1], [0, 0, 0, 1, 1, 1], [], []>} : vector<16x16x128xf32>, vector<128x3xf32>, vector<16x16x3xf32> -> vector<16x16x3xf32>
    %22 = arith.addf %17, %21 : vector<16x16x3xf32>
    %23 = vector.extract_strided_slice %1 {offsets = [1, 1, 0], sizes = [16, 16, 128], strides = [1, 1, 1]} : vector<18x18x128xf32> to vector<16x16x128xf32>
    %c4 = arith.constant 4 : index
    %c0_16 = arith.constant 0 : index
    %c0_17 = arith.constant 0 : index
    %24 = vector.load %arg2[%c4, %c0_16, %c0_17] : memref<9x128x3xf32, #tpu.memory_space<vmem>>, vector<1x128x3xf32>
    %25 = vector.shape_cast %24 : vector<1x128x3xf32> to vector<128x3xf32>
    %cst_18 = arith.constant dense<0.000000e+00> : vector<16x16x3xf32>
    %26 = tpu.matmul %23, %25, %cst_18 {dimension_numbers = #tpu.dot_dimension_numbers<[2], [0], [0, 1], [1], [0, 0, 0, 1, 1, 1], [], []>} : vector<16x16x128xf32>, vector<128x3xf32>, vector<16x16x3xf32> -> vector<16x16x3xf32>
    %27 = arith.addf %22, %26 : vector<16x16x3xf32>
    %28 = vector.extract_strided_slice %1 {offsets = [1, 2, 0], sizes = [16, 16, 128], strides = [1, 1, 1]} : vector<18x18x128xf32> to vector<16x16x128xf32>
    %c5 = arith.constant 5 : index
    %c0_19 = arith.constant 0 : index
    %c0_20 = arith.constant 0 : index
    %29 = vector.load %arg2[%c5, %c0_19, %c0_20] : memref<9x128x3xf32, #tpu.memory_space<vmem>>, vector<1x128x3xf32>
    %30 = vector.shape_cast %29 : vector<1x128x3xf32> to vector<128x3xf32>
    %cst_21 = arith.constant dense<0.000000e+00> : vector<16x16x3xf32>
    %31 = tpu.matmul %28, %30, %cst_21 {dimension_numbers = #tpu.dot_dimension_numbers<[2], [0], [0, 1], [1], [0, 0, 0, 1, 1, 1], [], []>} : vector<16x16x128xf32>, vector<128x3xf32>, vector<16x16x3xf32> -> vector<16x16x3xf32>
    %32 = arith.addf %27, %31 : vector<16x16x3xf32>
    %33 = vector.extract_strided_slice %1 {offsets = [2, 0, 0], sizes = [16, 16, 128], strides = [1, 1, 1]} : vector<18x18x128xf32> to vector<16x16x128xf32>
    %c6 = arith.constant 6 : index
    %c0_22 = arith.constant 0 : index
    %c0_23 = arith.constant 0 : index
    %34 = vector.load %arg2[%c6, %c0_22, %c0_23] : memref<9x128x3xf32, #tpu.memory_space<vmem>>, vector<1x128x3xf32>
    %35 = vector.shape_cast %34 : vector<1x128x3xf32> to vector<128x3xf32>
    %cst_24 = arith.constant dense<0.000000e+00> : vector<16x16x3xf32>
    %36 = tpu.matmul %33, %35, %cst_24 {dimension_numbers = #tpu.dot_dimension_numbers<[2], [0], [0, 1], [1], [0, 0, 0, 1, 1, 1], [], []>} : vector<16x16x128xf32>, vector<128x3xf32>, vector<16x16x3xf32> -> vector<16x16x3xf32>
    %37 = arith.addf %32, %36 : vector<16x16x3xf32>
    %38 = vector.extract_strided_slice %1 {offsets = [2, 1, 0], sizes = [16, 16, 128], strides = [1, 1, 1]} : vector<18x18x128xf32> to vector<16x16x128xf32>
    %c7 = arith.constant 7 : index
    %c0_25 = arith.constant 0 : index
    %c0_26 = arith.constant 0 : index
    %39 = vector.load %arg2[%c7, %c0_25, %c0_26] : memref<9x128x3xf32, #tpu.memory_space<vmem>>, vector<1x128x3xf32>
    %40 = vector.shape_cast %39 : vector<1x128x3xf32> to vector<128x3xf32>
    %cst_27 = arith.constant dense<0.000000e+00> : vector<16x16x3xf32>
    %41 = tpu.matmul %38, %40, %cst_27 {dimension_numbers = #tpu.dot_dimension_numbers<[2], [0], [0, 1], [1], [0, 0, 0, 1, 1, 1], [], []>} : vector<16x16x128xf32>, vector<128x3xf32>, vector<16x16x3xf32> -> vector<16x16x3xf32>
    %42 = arith.addf %37, %41 : vector<16x16x3xf32>
    %43 = vector.extract_strided_slice %1 {offsets = [2, 2, 0], sizes = [16, 16, 128], strides = [1, 1, 1]} : vector<18x18x128xf32> to vector<16x16x128xf32>
    %c8 = arith.constant 8 : index
    %c0_28 = arith.constant 0 : index
    %c0_29 = arith.constant 0 : index
    %44 = vector.load %arg2[%c8, %c0_28, %c0_29] : memref<9x128x3xf32, #tpu.memory_space<vmem>>, vector<1x128x3xf32>
    %45 = vector.shape_cast %44 : vector<1x128x3xf32> to vector<128x3xf32>
    %cst_30 = arith.constant dense<0.000000e+00> : vector<16x16x3xf32>
    %46 = tpu.matmul %43, %45, %cst_30 {dimension_numbers = #tpu.dot_dimension_numbers<[2], [0], [0, 1], [1], [0, 0, 0, 1, 1, 1], [], []>} : vector<16x16x128xf32>, vector<128x3xf32>, vector<16x16x3xf32> -> vector<16x16x3xf32>
    %47 = arith.addf %42, %46 : vector<16x16x3xf32>
    %c0_31 = arith.constant 0 : index
    %c0_32 = arith.constant 0 : index
    %48 = vector.load %arg3[%c0_31, %c0_32] : memref<1x3xf32, #tpu.memory_space<vmem>>, vector<1x3xf32>
    %49 = vector.shape_cast %48 : vector<1x3xf32> to vector<1x1x3xf32>
    %50 = vector.broadcast %49 : vector<1x1x3xf32> to vector<16x16x3xf32>
    %51 = arith.addf %47, %50 : vector<16x16x3xf32>
    %c0_33 = arith.constant 0 : index
    %c0_34 = arith.constant 0 : index
    %52 = vector.load %arg4[%c0_33, %c0_34] : memref<64x16xf32, #tpu.memory_space<vmem>>, vector<64x16xf32>
    %c0_35 = arith.constant 0 : index
    %c0_36 = arith.constant 0 : index
    %53 = vector.load %arg5[%c0_35, %c0_36] : memref<16x64xf32, #tpu.memory_space<vmem>>, vector<16x64xf32>
    %54 = vector.extract_strided_slice %51 {offsets = [0, 0, 0], sizes = [16, 16, 1], strides = [1, 1, 1]} : vector<16x16x3xf32> to vector<16x16x1xf32>
    %55 = vector.shape_cast %54 : vector<16x16x1xf32> to vector<16x16xf32>
    %cst_37 = arith.constant dense<0.000000e+00> : vector<16x64xf32>
    %56 = tpu.matmul %55, %53, %cst_37 {dimension_numbers = #tpu.dot_dimension_numbers<[1], [0], [0], [1], [0, 0, 1, 1], [], []>} : vector<16x16xf32>, vector<16x64xf32>, vector<16x64xf32> -> vector<16x64xf32>
    %cst_38 = arith.constant dense<0.000000e+00> : vector<64x64xf32>
    %57 = tpu.matmul %52, %56, %cst_38 {dimension_numbers = #tpu.dot_dimension_numbers<[1], [0], [0], [1], [0, 0, 1, 1], [], []>} : vector<64x16xf32>, vector<16x64xf32>, vector<64x64xf32> -> vector<64x64xf32>
    %58 = vector.extract_strided_slice %51 {offsets = [0, 0, 1], sizes = [16, 16, 1], strides = [1, 1, 1]} : vector<16x16x3xf32> to vector<16x16x1xf32>
    %59 = vector.shape_cast %58 : vector<16x16x1xf32> to vector<16x16xf32>
    %cst_39 = arith.constant dense<0.000000e+00> : vector<16x64xf32>
    %60 = tpu.matmul %59, %53, %cst_39 {dimension_numbers = #tpu.dot_dimension_numbers<[1], [0], [0], [1], [0, 0, 1, 1], [], []>} : vector<16x16xf32>, vector<16x64xf32>, vector<16x64xf32> -> vector<16x64xf32>
    %cst_40 = arith.constant dense<0.000000e+00> : vector<64x64xf32>
    %61 = tpu.matmul %52, %60, %cst_40 {dimension_numbers = #tpu.dot_dimension_numbers<[1], [0], [0], [1], [0, 0, 1, 1], [], []>} : vector<64x16xf32>, vector<16x64xf32>, vector<64x64xf32> -> vector<64x64xf32>
    %62 = vector.extract_strided_slice %51 {offsets = [0, 0, 2], sizes = [16, 16, 1], strides = [1, 1, 1]} : vector<16x16x3xf32> to vector<16x16x1xf32>
    %63 = vector.shape_cast %62 : vector<16x16x1xf32> to vector<16x16xf32>
    %cst_41 = arith.constant dense<0.000000e+00> : vector<16x64xf32>
    %64 = tpu.matmul %63, %53, %cst_41 {dimension_numbers = #tpu.dot_dimension_numbers<[1], [0], [0], [1], [0, 0, 1, 1], [], []>} : vector<16x16xf32>, vector<16x64xf32>, vector<16x64xf32> -> vector<16x64xf32>
    %cst_42 = arith.constant dense<0.000000e+00> : vector<64x64xf32>
    %65 = tpu.matmul %52, %64, %cst_42 {dimension_numbers = #tpu.dot_dimension_numbers<[1], [0], [0], [1], [0, 0, 1, 1], [], []>} : vector<64x16xf32>, vector<16x64xf32>, vector<64x64xf32> -> vector<64x64xf32>
    %66 = arith.mulf %57, %57 : vector<64x64xf32>
    %cst_43 = arith.constant 0.000000e+00 : f32
    %67 = vector.broadcast %cst_43 : f32 to vector<64x64xf32>
    %68 = arith.addf %67, %66 : vector<64x64xf32>
    %69 = arith.mulf %61, %61 : vector<64x64xf32>
    %70 = arith.addf %68, %69 : vector<64x64xf32>
    %71 = arith.mulf %65, %65 : vector<64x64xf32>
    %72 = arith.addf %70, %71 : vector<64x64xf32>
    %cst_44 = arith.constant 1.000000e-24 : f32
    %73 = vector.broadcast %cst_44 : f32 to vector<64x64xf32>
    %74 = arith.maximumf %72, %73 : vector<64x64xf32>
    %75 = math.rsqrt %74 : vector<64x64xf32>
    %76 = arith.mulf %57, %75 : vector<64x64xf32>
    %c0_45 = arith.constant 0 : index
    %c0_46 = arith.constant 0 : index
    %c0_47 = arith.constant 0 : index
    %c0_48 = arith.constant 0 : index
    %77 = vector.load %arg6[%c0_45, %c0_46, %c0_47, %c0_48] : memref<1x3x64x64xf32, #tpu.memory_space<vmem>>, vector<1x1x64x64xf32>
    %78 = vector.shape_cast %77 : vector<1x1x64x64xf32> to vector<64x64xf32>
    %79 = vector.shape_cast %76 : vector<64x64xf32> to vector<1x1x64x64xf32>
    tpu.vector_store %arg6[%c0_45, %c0_46, %c0_47, %c0_48], %79 {strides = array<i32>} : memref<1x3x64x64xf32, #tpu.memory_space<vmem>>, vector<1x1x64x64xf32>,
    %80 = arith.mulf %61, %75 : vector<64x64xf32>
    %c0_49 = arith.constant 0 : index
    %c1_50 = arith.constant 1 : index
    %c0_51 = arith.constant 0 : index
    %c0_52 = arith.constant 0 : index
    %81 = vector.load %arg6[%c0_49, %c1_50, %c0_51, %c0_52] : memref<1x3x64x64xf32, #tpu.memory_space<vmem>>, vector<1x1x64x64xf32>
    %82 = vector.shape_cast %81 : vector<1x1x64x64xf32> to vector<64x64xf32>
    %83 = vector.shape_cast %80 : vector<64x64xf32> to vector<1x1x64x64xf32>
    tpu.vector_store %arg6[%c0_49, %c1_50, %c0_51, %c0_52], %83 {strides = array<i32>} : memref<1x3x64x64xf32, #tpu.memory_space<vmem>>, vector<1x1x64x64xf32>,
    %84 = arith.mulf %65, %75 : vector<64x64xf32>
    %c0_53 = arith.constant 0 : index
    %c2_54 = arith.constant 2 : index
    %c0_55 = arith.constant 0 : index
    %c0_56 = arith.constant 0 : index
    %85 = vector.load %arg6[%c0_53, %c2_54, %c0_55, %c0_56] : memref<1x3x64x64xf32, #tpu.memory_space<vmem>>, vector<1x1x64x64xf32>
    %86 = vector.shape_cast %85 : vector<1x1x64x64xf32> to vector<64x64xf32>
    %87 = vector.shape_cast %84 : vector<64x64xf32> to vector<1x1x64x64xf32>
    tpu.vector_store %arg6[%c0_53, %c2_54, %c0_55, %c0_56], %87 {strides = array<i32>} : memref<1x3x64x64xf32, #tpu.memory_space<vmem>>, vector<1x1x64x64xf32>,
    return
  }
  func.func @transform_0(%arg0: i32) -> (i32, i32, i32, i32) {
    %c0_i32 = arith.constant 0 : i32
    %c0_i32_0 = arith.constant 0 : i32
    %c0_i32_1 = arith.constant 0 : i32
    %c0_i32_2 = arith.constant 0 : i32
    return %arg0, %c0_i32, %c0_i32_0, %c0_i32_1 : i32, i32, i32, i32
  }
  func.func @transform_1(%arg0: i32) -> (i32, i32, i32) {
    %c0_i32 = arith.constant 0 : i32
    %c0_i32_0 = arith.constant 0 : i32
    %c0_i32_1 = arith.constant 0 : i32
    %c0_i32_2 = arith.constant 0 : i32
    return %c0_i32, %c0_i32_0, %c0_i32_1 : i32, i32, i32
  }
  func.func @transform_2(%arg0: i32) -> (i32, i32) {
    %c0_i32 = arith.constant 0 : i32
    %c0_i32_0 = arith.constant 0 : i32
    %c0_i32_1 = arith.constant 0 : i32
    return %c0_i32, %c0_i32_0 : i32, i32
  }
  func.func @transform_3(%arg0: i32) -> (i32, i32) {
    %c0_i32 = arith.constant 0 : i32
    %c0_i32_0 = arith.constant 0 : i32
    %c0_i32_1 = arith.constant 0 : i32
    return %c0_i32, %c0_i32_0 : i32, i32
  }
  func.func @transform_4(%arg0: i32) -> (i32, i32) {
    %c0_i32 = arith.constant 0 : i32
    %c0_i32_0 = arith.constant 0 : i32
    %c0_i32_1 = arith.constant 0 : i32
    return %c0_i32, %c0_i32_0 : i32, i32
  }
  func.func @transform_5(%arg0: i32) -> (i32, i32, i32, i32) {
    %c0_i32 = arith.constant 0 : i32
    %c0_i32_0 = arith.constant 0 : i32
    %c0_i32_1 = arith.constant 0 : i32
    %c0_i32_2 = arith.constant 0 : i32
    return %arg0, %c0_i32, %c0_i32_0, %c0_i32_1 : i32, i32, i32, i32
  }
}

</mosaic_0001>

<bundles_post_ra>
// kernel: incidence_head_pallas.1
= control target key start
LH: loop header
LB: loop body
LE: loop exit
PB: predicated region body
PF: predicated region fallthrough
CT: control target
= control target key end

     0   :  { %10 = vsyncpa [#allocation3], 0  ;;  %s8934_s0 = inlined_call_operand.vmem [shape: f32[2,18,18,128], index: 0, kind: input, shape index: {}]   ;;  %s8935_s1 = inlined_call_operand.vmem [shape: f32[9,128,3], index: 1, kind: input, shape index: {}]   ;;  %s8936_s2 = inlined_call_operand.vmem [shape: f32[1,3], index: 2, kind: input, shape index: {}]   ;;  %s8937_s3 = inlined_call_operand.vmem [shape: f32[64,16], index: 3, kind: input, shape index: {}]   ;;  %s8938_s4 = inlined_call_operand.vmem [shape: f32[16,64], index: 4, kind: input, shape index: {}]   ;;  %s8939_s5 = inlined_call_operand.hbm [shape: f32[2,3,64,64], index: 5, kind: output, shape index: {}]  }
   0x1   :  { %12 = vsyncpa [#allocation3 + $0x1], 0  ;;  %s6820_s18 = smov 0   ;;  %s6822_s19 = smov 0  }
   0x2   :  { %s6824_s20 = smov 0   ;;  %s6826_s21 = smov 0  }
   0x3 LB: > { %s6841_s22 = sadd.s32 4294967295, %s6782_s21   ;;  %s4608_s23 = sadd.s32 4294967294, %s6782_s21   ;;  %s6782_s21 = sphi %s6826_s21, %s9074_s21   ;;  %s6778_s20 = sphi %s6824_s20, %s9073_s20   ;;  %s6774_s19 = sphi %s6822_s19, %s9072_s19   ;;  %s6770_s18 = sphi %s6820_s18, %s9071_s18  }
   0x4   : > { %s6845_s24 = sadd.s32 1, %s6782_s21   ;;  %s135_s25 = sadd.s32 1, %s6778_s20 }
   0x5   : > { %s132_s26 = ssub.s32 %s6782_s21, %s6845_s24  ;;  %p145_p0 = scmp.ne.s32.totalorder %s6778_s20, %s6774_s19 }
   0x6   : > { %p133_p1 = scmp.eq.s32.totalorder %s132_s26, 0  ;;  %p146_p2 = scmp.eq.s32.totalorder %s6841_s22, 1 }
   0x7   : > { %p151_p3 = scmp.ne.s32.totalorder %s6774_s19, %s6770_s18  ;;  %p152_p4 = scmp.eq.s32.totalorder %s4608_s23, 1 }
   0x8   : > { %s6856_s27 = scalar_select %p133_p1, %s6778_s20, %s135_s25  }
   0x9   : > { %p6858_p5 = por %p146_p2, %p145_p0  ;;  %p6862_p6 = por %p152_p4, %p151_p3 }
   0xa   : > { %p4611_p7 = scmp.ge.s32.totalorder %s6782_s21, 1  ;;  %p190_p8 = scmp.lt.s32.totalorder %s6782_s21, 3 }
   0xc   : > { %p191_p9 = pnand %p4611_p7, %p190_p8 }
   0xe   : > { %194 = sbr.rel (%p191_p9) target bundleno = 1674 (0x68a), region = 40 }
  0x15   : > { %v4613_v0 = vld [vmem:[%s8935_s1 + $0x80] sm:$0xff]  ;;  %v4614_v1 = vld [vmem:[%s8935_s1 + $0x88] sm:$0xff]  ;;  %p218_p10 = scmp.lt.s32.totalorder %s6841_s22, 1  ;;  %v4615_v5 = vld [vmem:[%s8935_s1 + $0x90] sm:$0xff]  ;;  %vm358_vm0 = vcmask 1046528   ;;  %vm938_vm1 = vcmask 1045504  }
  0x16   : > { %v4661_v2 = vld [vmem:[%s8935_s1 + $0x200] sm:$0xff]  ;;  %v6054_v3 = vpack.c.bf16 %v4614_v1, %v4613_v0  ;;  %v4662_v4 = vld [vmem:[%s8935_s1 + $0x208] sm:$0xff]  ;;  %v4616_v6 = vld [vmem:[%s8935_s1 + $0x98] sm:$0xff]  ;;  %vm3174_vm2 = vcmask 130112   ;;  %vm3311_vm3 = vcmask 1041409   ;;  %vm3313_vm4 = vcmask 1042434  }
  0x17   : > { %v6182_v7 = vpack.c.bf16 %v4662_v4, %v4661_v2  ;;  %v6058_v8 = vpack.c.bf16 %v4616_v6, %v4615_v5  ;;  %v4663_v9 = vld [vmem:[%s8935_s1 + $0x210] sm:$0xff]  ;;  %v4664_v10 = vld [vmem:[%s8935_s1 + $0x218] sm:$0xff]  ;;  %v4617_v11 = vld [vmem:[%s8935_s1 + $0xa0] sm:$0xff]  ;;  %s219_s7 = scalar_select %p218_p10, %s6841_s22, 1  ;;  %vm3315_vm5 = vcmask 1043459   ;;  %vm3317_vm6 = vcmask 1044484  }
  0x18   : > { %6055 = vmatprep.subr.bf16.mxu1 %v6054_v3  ;;  %v6186_v12 = vpack.c.bf16 %v4664_v10, %v4663_v9  ;;  %v4618_v13 = vld [vmem:[%s8935_s1 + $0xa8] sm:$0xff]  ;;  %v4665_v14 = vld [vmem:[%s8935_s1 + $0x220] sm:$0xff]  ;;  %v4619_v18 = vld [vmem:[%s8935_s1 + $0xb0] sm:$0xff]  ;;  %vm3319_vm7 = vcmask 1045509   ;;  %vm3321_vm8 = vcmask 1046534   ;;  %vm3323_vm9 = vcmask 1047559  }
  0x19   : > { %v4666_v15 = vld [vmem:[%s8935_s1 + $0x228] sm:$0xff]  ;;  %6183 = vmatprep.subr.bf16.mxu0 %v6182_v7  ;;  %6057 = vmatpush3.bf16.msra.mxu1 %v6054_v3  ;;  %s6623_s14 = smul.u32 432, %s219_s7  ;;  %v6062_v16 = vpack.c.bf16 %v4618_v13, %v4617_v11  ;;  %v4620_v19 = vld [vmem:[%s8935_s1 + $0xb8] sm:$0xff]  ;;  %v4667_v20 = vld [vmem:[%s8935_s1 + $0x230] sm:$0xff]  ;;  %vm3332_vm10 = vcmask 130048   ;;  %s215_s16 = sand.u32 1, %s6774_s19  }
  0x1a   : > { %6185 = vmatpush3.bf16.msra.mxu0 %v6182_v7  ;;  %6059 = vmatprep.subr.bf16.mxu1 %v6058_v8  ;;  %v6190_v17 = vpack.c.bf16 %v4666_v15, %v4665_v14  ;;  %v4668_v21 = vld [vmem:[%s8935_s1 + $0x238] sm:$0xff]  ;;  %v6066_v22 = vpack.c.bf16 %v4620_v19, %v4619_v18  ;;  %v4621_v23 = vld [vmem:[%s8935_s1 + $0xc0] sm:$0xff]  ;;  %v4622_v24 = vld [vmem:[%s8935_s1 + $0xc8] sm:$0xff]  ;;  %s6622_s17 = smul.u32 192, %s215_s16  ;;  %vm4489_vm11 = vcmask 523264   ;;  %s8893_s7 = scalar_lea.sflag [#allocation3], %s215_s16 }
  0x1b   : > { %6187 = vmatprep.subr.bf16.mxu0 %v6186_v12  ;;  %s6921_s9 = scalar_lea.vmem %s8934_s0, %s6623_s14  ;;  %v6194_v25 = vpack.c.bf16 %v4668_v21, %v4667_v20  ;;  %v4669_v26 = vld [vmem:[%s8935_s1 + $0x240] sm:$0xff]  ;;  %v4670_v27 = vld [vmem:[%s8935_s1 + $0x248] sm:$0xff]  ;;  %v6070_v36 = vpack.c.bf16 %v4622_v24, %v4621_v23  ;;  %v4623_v38 = vld [vmem:[%s8935_s1 + $0xd0] sm:$0xff]  ;;  %s6624_s25 = smul.u32 3072, %s6841_s22 }
  0x1c   : > { %v6936_v28 = vld [vmem:[%s6921_s9] sm:$0xff]  ;;  %v6939_v29 = vld [vmem:[%s6921_s9 + $0x8] sm:$0xff]  ;;  %v6943_v31 = vld [vmem:[%s6921_s9 + $0x18] sm:$0xff]  ;;  %v6198_v37 = vpack.c.bf16 %v4670_v27, %v4669_v26  ;;  %s8818_s23 = scalar_lea.vmem [#allocation2], %s6622_s17  ;;  %s6787_s10 = smov [#allocation2]  }
  0x1d   : > { %6061 = vmatpush3.bf16.msra.mxu1 %v6058_v8  ;;  %v359_v30 = vrot.slane %v6936_v28, 1  ;;  %v6946_v32 = vld [vmem:[%s6921_s9 + $0x20] sm:$0xff]  ;;  %v360_v33 = vrot.slane %v6939_v29, 1  ;;  %v364_v34 = vrot.slane %v6943_v31, 1  ;;  %v4624_v39 = vld [vmem:[%s8935_s1 + $0xd8] sm:$0xff]  ;;  %v4671_v42 = vld [vmem:[%s8935_s1 + $0x250] sm:$0xff]  ;;  %s8872_s6 = scalar_lea.hbm %s8939_s5, %s6624_s25 }
  0x1e   : > { %6189 = vmatpush3.bf16.msra.mxu0 %v6186_v12  ;;  %6063 = vmatprep.subr.bf16.mxu1 %v6062_v16  ;;  %v365_v35 = vrot.slane %v6946_v32, 1  ;;  %v4672_v43 = vld [vmem:[%s8935_s1 + $0x258] sm:$0xff]  ;;  %v6074_v44 = vpack.c.bf16 %v4624_v39, %v4623_v38  ;;  %v4625_v46 = vld [vmem:[%s8935_s1 + $0xe0] sm:$0xff]  ;;  %v4626_v47 = vld [vmem:[%s8935_s1 + $0xe8] sm:$0xff]  ;;  %s4546_s26 = sshll.u32 %s8818_s23, 4  ;;  %s8874_s26 = int_to_ptr.vmem [resolvable:$true] %s4546_s26 }
  0x1f   : > { %6191 = vmatprep.subr.bf16.mxu0 %v6190_v17  ;;  %v361_v40 = vsel %vm358_vm0, %v359_v30, %v360_v33  ;;  %v6202_v45 = vpack.c.bf16 %v4672_v43, %v4671_v42  ;;  %v4673_v48 = vld [vmem:[%s8935_s1 + $0x260] sm:$0xff]  ;;  %v4674_v49 = vld [vmem:[%s8935_s1 + $0x268] sm:$0xff]  ;;  %v6078_v50 = vpack.c.bf16 %v4626_v47, %v4625_v46  ;;  %v4627_v52 = vld [vmem:[%s8935_s1 + $0xf0] sm:$0xff]  ;;  %s6720_s8 = scalar_lea.vmem %s8874_s26, 3072 }
  0x20   : > { %v6963_v41 = vsel %vm358_vm0, %v364_v34, %v365_v35  ;;  %5297 = vmatprep.mubr.f32.mxu1 %v361_v40  ;;  %v6206_v51 = vpack.c.bf16 %v4674_v49, %v4673_v48  ;;  %v4628_v53 = vld [vmem:[%s8935_s1 + $0xf8] sm:$0xff]  ;;  %v4675_v54 = vld [vmem:[%s8935_s1 + $0x270] sm:$0xff]  ;;  %v4677_v58 = vld [vmem:[%s8935_s1 + $0x280] sm:$0xff]  ;;  %p6721_p11 = scmp.ne.s32.totalorder %s8874_s26, %s6720_s8 }
  0x21   : > { %6065 = vmatpush3.bf16.msra.mxu1 %v6062_v16  ;;  %5617 = vmatprep.mubr.f32.mxu0 %v6963_v41  ;;  %v4676_v55 = vld [vmem:[%s8935_s1 + $0x278] sm:$0xff]  ;;  %v6082_v56 = vpack.c.bf16 %v4628_v53, %v4627_v52  ;;  %v6997_v57 = vld [vmem:[%s6921_s9 + $0x10] sm:$0x3]  ;;  %v7003_v60 = vld [vmem:[%s6921_s9 + $0x28] sm:$0x3] }
  0x22   : > { %6193 = vmatpush3.bf16.msra.mxu0 %v6190_v17  ;;  %6067 = vmatprep.subr.bf16.mxu1 %v6066_v22  ;;  %8990 = vst [vmem:[#allocation5_spill] sm:$0xff] %v6997_v57  ;;  %v6210_v59 = vpack.c.bf16 %v4676_v55, %v4675_v54  ;;  %v277_v61 = vld [vmem:[%s8935_s1] sm:$0xff]  ;;  %v278_v62 = vld [vmem:[%s8935_s1 + $0x8] sm:$0xff]  ;;  %v7015_v0 = vld [vmem:[%s6921_s9 + $0x30] sm:$0xff]  ;;  %v362_v2 = vrot.slane %v6997_v57, 1  ;;  %v367_v3 = vrot.slane %v7003_v60, 1  ;;  %p6722_p12 = pnand %p6721_p11, %p6858_p5 }
  0x23   : > { %6195 = vmatprep.subr.bf16.mxu0 %v6194_v25  ;;  %v4678_v63 = vld [vmem:[%s8935_s1 + $0x288] sm:$0xff]  ;;  %v7018_v1 = vld [vmem:[%s6921_s9 + $0x38] sm:$0xff]  ;;  %v6086_v4 = vpack.c.bf16 %v278_v62, %v277_v61  ;;  %v369_v6 = vrot.slane %v7015_v0, 1  ;;  %v7025_v8 = vld [vmem:[%s6921_s9 + $0x40] sm:$0x3] }
  0x24   : > { %v6214_v5 = vpack.c.bf16 %v4678_v63, %v4677_v58  ;;  %v370_v7 = vrot.slane %v7018_v1, 1  ;;  %v7028_v9 = vld [vmem:[%s6921_s9 + $0x48] sm:$0xff]  ;;  %v7031_v10 = vld [vmem:[%s6921_s9 + $0x50] sm:$0xff]  ;;  %v4680_v12 = vld [vmem:[%s8935_s1 + $0x298] sm:$0xff]  ;;  %v363_v13 = vsel %vm358_vm0, %v360_v33, %v362_v2  ;;  %v368_v16 = vsel %vm358_vm0, %v365_v35, %v367_v3  ;;  %p6723_p13 = pneg %p6722_p12 }
  0x25   : > { %6069 = vmatpush3.bf16.msra.mxu1 %v6066_v22  ;;  %v4679_v11 = vld [vmem:[%s8935_s1 + $0x290] sm:$0xff]  ;;  %v280_v15 = vld [vmem:[%s8935_s1 + $0x18] sm:$0xff]  ;;  %v372_v17 = vrot.slane %v7025_v8, 1  ;;  %v374_v19 = vrot.slane %v7028_v9, 1  ;;  %v375_v20 = vrot.slane %v7031_v10, 1  ;;  %v7061_v23 = vld [vmem:[%s6921_s9 + $0x60] sm:$0xff] }
  0x26   : > { %6197 = vmatpush3.bf16.msra.mxu0 %v6194_v25  ;;  %6071 = vmatprep.subr.bf16.mxu1 %v6070_v36  ;;  %v279_v14 = vld [vmem:[%s8935_s1 + $0x10] sm:$0xff]  ;;  %v7053_v18 = vsel %vm358_vm0, %v369_v6, %v370_v7  ;;  %v7058_v21 = vld [vmem:[%s6921_s9 + $0x58] sm:$0x3]  ;;  %v6218_v22 = vpack.c.bf16 %v4680_v12, %v4679_v11  ;;  %v7064_v24 = vld [vmem:[%s6921_s9 + $0x68] sm:$0xff] }
  0x27   : > { %6199 = vmatprep.subr.bf16.mxu0 %v6198_v37  ;;  %8991 = vst [vmem:[#allocation6_spill] sm:$0xff] %v7053_v18  ;;  %v4681_v25 = vld [vmem:[%s8935_s1 + $0x2a0] sm:$0xff]  ;;  %v4682_v26 = vld [vmem:[%s8935_s1 + $0x2a8] sm:$0xff]  ;;  %v6090_v27 = vpack.c.bf16 %v280_v15, %v279_v14  ;;  %v7081_v34 = vsel %vm358_vm0, %v370_v7, %v372_v17  ;;  %v377_v35 = vrot.slane %v7058_v21, 1  ;;  %v380_v38 = vrot.slane %v7064_v24, 1  ;;  %v7093_v40 = vld [vmem:[%s6921_s9 + $0x78] sm:$0xff] }
  0x28   : > { %v281_v30 = vld [vmem:[%s8935_s1 + $0x20] sm:$0xff]  ;;  %v282_v33 = vld [vmem:[%s8935_s1 + $0x28] sm:$0xff]  ;;  %8992 = vst [vmem:[#allocation7_spill] sm:$0xff] %v7081_v34  ;;  %v7090_v39 = vld [vmem:[%s6921_s9 + $0x70] sm:$0x3] }
  0x29   : > { %6073 = vmatpush3.bf16.msra.mxu1 %v6070_v36  ;;  %v7085_v36 = vsel %vm358_vm0, %v374_v19, %v375_v20  ;;  %v7096_v42 = vld [vmem:[%s6921_s9 + $0x80] sm:$0xff]  ;;  %v4683_v43 = vld [vmem:[%s8935_s1 + $0x2b0] sm:$0xff]  ;;  %v284_v47 = vld [vmem:[%s8935_s1 + $0x38] sm:$0xff]  ;;  %v7114_v48 = vsel %vm358_vm0, %v375_v20, %v377_v35  ;;  %v382_v49 = vrot.slane %v7090_v39, 1 }
  0x2a   : > { %6201 = vmatpush3.bf16.msra.mxu0 %v6198_v37  ;;  %6075 = vmatprep.subr.bf16.mxu1 %v6074_v44  ;;  %8993 = vst [vmem:[#allocation8_spill] sm:$0xff] %v7085_v36  ;;  %v379_v37 = vrot.slane %v7061_v23, 1  ;;  %v283_v46 = vld [vmem:[%s8935_s1 + $0x30] sm:$0xff]  ;;  %8994 = vst [vmem:[#allocation9_spill] sm:$0xff] %v7114_v48  ;;  %v385_v52 = vrot.slane %v7096_v42, 1  ;;  %v4685_v58 = vld [vmem:[%s8935_s1 + $0x2c0] sm:$0xff] }
  0x2b   : > { %6203 = vmatprep.subr.bf16.mxu0 %v6202_v45  ;;  %v7123_v53 = vld [vmem:[%s6921_s9 + $0x88] sm:$0x3]  ;;  %v7126_v54 = vld [vmem:[%s6921_s9 + $0x90] sm:$0xff]  ;;  %v6098_v61 = vpack.c.bf16 %v284_v47, %v283_v46  ;;  %v285_v62 = vld [vmem:[%s8935_s1 + $0x40] sm:$0xff]  ;;  %v7148_v2 = vsel %vm358_vm0, %v380_v38, %v382_v49 }
  0x2c   : > { %v286_v63 = vld [vmem:[%s8935_s1 + $0x48] sm:$0xff]  ;;  %8996 = vst [vmem:[#allocation11_spill] sm:$0xff] %v7148_v2  ;;  %v387_v3 = vrot.slane %v7123_v53, 1  ;;  %v7157_v7 = vld [vmem:[%s6921_s9 + $0xa0] sm:$0x3]  ;;  %v4687_v14 = vld [vmem:[%s8935_s1 + $0x2d0] sm:$0xff] }
  0x2d   : > { %6077 = vmatpush3.bf16.msra.mxu1 %v6074_v44  ;;  %v4684_v44 = vld [vmem:[%s8935_s1 + $0x2b8] sm:$0xff]  ;;  %v7160_v11 = vld [vmem:[%s6921_s9 + $0xa8] sm:$0xff]  ;;  %v287_v17 = vld [vmem:[%s8935_s1 + $0x50] sm:$0xff] }
  0x2e   : > { %6205 = vmatpush3.bf16.msra.mxu0 %v6202_v45  ;;  %6079 = vmatprep.subr.bf16.mxu1 %v6078_v50  ;;  %v6094_v45 = vpack.c.bf16 %v282_v33, %v281_v30  ;;  %v6226_v55 = vpack.c.bf16 %v4684_v44, %v4683_v43  ;;  %v4688_v15 = vld [vmem:[%s8935_s1 + $0x2d8] sm:$0xff]  ;;  %v7182_v20 = vsel %vm358_vm0, %v385_v52, %v387_v3  ;;  %v7194_v33 = vld [vmem:[%s6921_s9 + $0xc0] sm:$0xff]  ;;  %v7431_v57 = vld [vmem:[%s6921_s9 + $0x190] sm:$0x3] }
  0x2f   : > { %6207 = vmatprep.subr.bf16.mxu0 %v6206_v51  ;;  %v288_v19 = vld [vmem:[%s8935_s1 + $0x58] sm:$0xff]  ;;  %8998 = vst [vmem:[#allocation13_spill] sm:$0xff] %v7182_v20  ;;  %v6234_v35 = vpack.c.bf16 %v4688_v15, %v4687_v14  ;;  %v289_v44 = vld [vmem:[%s8935_s1 + $0x60] sm:$0xff]  ;;  %9020 = vst [vmem:[#allocation35_spill] sm:$0xff] %v7431_v57 }
  0x30   : > { %v7191_v30 = vld [vmem:[%s6921_s9 + $0xb8] sm:$0x3]  ;;  %v6106_v43 = vpack.c.bf16 %v288_v19, %v287_v17  ;;  %v7259_v19 = vld [vmem:[%s6921_s9 + $0xe8] sm:$0x3] }
  0x31   : > { %6081 = vmatpush3.bf16.msra.mxu1 %v6078_v50  ;;  %v7118_v50 = vsel %vm358_vm0, %v379_v37, %v380_v38  ;;  %v7198_v37 = vld [vmem:[%s6921_s9 + $0xc8] sm:$0xff]  ;;  %v4689_v38 = vld [vmem:[%s8935_s1 + $0x2e0] sm:$0xff]  ;;  %v397_v47 = vrot.slane %v7191_v30, 1  ;;  %v4692_v3 = vld [vmem:[%s8935_s1 + $0x2f8] sm:$0xff] }
  0x32   : > { %6209 = vmatpush3.bf16.msra.mxu0 %v6206_v51  ;;  %6083 = vmatprep.subr.bf16.mxu1 %v6082_v56  ;;  %8995 = vst [vmem:[#allocation10_spill] sm:$0xff] %v7118_v50  ;;  %v384_v51 = vrot.slane %v7093_v40, 1 }
  0x33   : > { %6211 = vmatprep.subr.bf16.mxu0 %v6210_v59 }
  0x35   : > { %6085 = vmatpush3.bf16.msra.mxu1 %v6082_v56  ;;  %v7130_v56 = vld [vmem:[%s6921_s9 + $0x98] sm:$0xff] }
  0x36   : > { %6213 = vmatpush3.bf16.msra.mxu0 %v6210_v59  ;;  %6087 = vmatprep.subr.bf16.mxu1 %v6086_v4  ;;  %v4686_v59 = vld [vmem:[%s8935_s1 + $0x2c8] sm:$0xff]  ;;  %v390_v6 = vrot.slane %v7130_v56, 1 }
  0x37   : > { %6215 = vmatprep.subr.bf16.mxu0 %v6214_v5  ;;  %v6230_v12 = vpack.c.bf16 %v4686_v59, %v4685_v58  ;;  %v7228_v58 = vld [vmem:[%s6921_s9 + $0xd8] sm:$0xff] }
  0x38   : > { %5298 = vmatmul.mubr.f32.vlgmr.msra.gmra.mrb[0].mxu1 %v363_v13  ;;  %v7164_v13 = vld [vmem:[%s6921_s9 + $0xb0] sm:$0xff] }
  0x39   : > { %5618 = vmatmul.mubr.f32.vlgmr.msra.gmra.mrb[0].mxu0 %v368_v16  ;;  %5300 = vmatprep.mubr.f32.mxu1 %v6963_v41  ;;  %v6222_v41 = vpack.c.bf16 %v4682_v26, %v4681_v25  ;;  %v394_v26 = vrot.slane %v7160_v11, 1 }
  0x3a   : > { %6217 = vmatpush3.bf16.msra.mxu0 %v6214_v5  ;;  %5620 = vmatprep.mubr.f32.mxu0 %v7053_v18  ;;  %v389_v5 = vrot.slane %v7126_v54, 1 }
  0x3b   : > { %6219 = vmatprep.subr.bf16.mxu0 %v6218_v22  ;;  %6089 = vmatpush3.bf16.msra.mxu1 %v6086_v4  ;;  %v7152_v4 = vsel %vm358_vm0, %v384_v51, %v385_v52  ;;  %v399_v51 = vrot.slane %v7194_v33, 1  ;;  %v400_v52 = vrot.slane %v7198_v37, 1 }
  0x3c   : > { %5301 = vmatmul.mubr.f32.gmra.mrb[2].mxu1 %v368_v16  ;;  %6091 = vmatprep.subr.bf16.mxu1 %v6090_v27  ;;  %8997 = vst [vmem:[#allocation12_spill] sm:$0xff] %v7152_v4  ;;  %v6102_v16 = vpack.c.bf16 %v286_v63, %v285_v62  ;;  %v7186_v25 = vsel %vm358_vm0, %v389_v5, %v390_v6  ;;  %v4691_v63 = vld [vmem:[%s8935_s1 + $0x2f0] sm:$0xff] }
  0x3d   : > { %5621 = vmatmul.mubr.f32.gmra.mrb[2].mxu0 %v7081_v34  ;;  %5303 = vmatprep.mubr.f32.mxu1 %v7053_v18  ;;  %8999 = vst [vmem:[#allocation14_spill] sm:$0xff] %v7186_v25  ;;  %v291_v5 = vld [vmem:[%s8935_s1 + $0x70] sm:$0xff]  ;;  %v7254_v15 = vsel %vm358_vm0, %v399_v51, %v400_v52 }
  0x3e   : > { %5623 = vmatprep.mubr.f32.mxu0 %v7085_v36  ;;  %6221 = vmatpush3.bf16.msra.mxu0 %v6218_v22  ;;  %v392_v22 = vrot.slane %v7157_v7, 1  ;;  %9003 = vst [vmem:[#allocation18_spill] sm:$0xff] %v7254_v15 }
  0x3f   : > { %6223 = vmatprep.subr.bf16.mxu0 %v6222_v41  ;;  %6093 = vmatpush3.bf16.msra.mxu1 %v6090_v27  ;;  %v395_v27 = vrot.slane %v7164_v13, 1 }
  0x40   : > { %5304 = vmatmul.mubr.f32.gmra.mrb[4].mxu1 %v7081_v34  ;;  %6095 = vmatprep.subr.bf16.mxu1 %v6094_v45  ;;  %v7216_v46 = vsel %vm358_vm0, %v390_v6, %v392_v22  ;;  %v292_v6 = vld [vmem:[%s8935_s1 + $0x78] sm:$0xff]  ;;  %v7262_v22 = vld [vmem:[%s6921_s9 + $0xf0] sm:$0xff]  ;;  %v7416_v34 = vld [vmem:[%s6921_s9 + $0x188] sm:$0xff] }
  0x41   : > { %5624 = vmatmul.mubr.f32.gmra.mrb[4].mxu0 %v7114_v48  ;;  %5306 = vmatprep.mubr.f32.mxu1 %v7085_v36  ;;  %9000 = vst [vmem:[#allocation15_spill] sm:$0xff] %v7216_v46  ;;  %v7220_v49 = vsel %vm358_vm0, %v394_v26, %v395_v27  ;;  %v6242_v26 = vpack.c.bf16 %v4692_v3, %v4691_v63  ;;  %v409_v63 = vrot.slane %v7262_v22, 1  ;;  %v7409_v36 = vld [vmem:[%s6921_s9 + $0x178] sm:$0x3]  ;;  %9017 = vst [vmem:[#allocation32_spill] sm:$0xff] %v7416_v34 }
  0x42   : > { %5626 = vmatprep.mubr.f32.mxu0 %v7118_v50  ;;  %6225 = vmatpush3.bf16.msra.mxu0 %v6222_v41  ;;  %v4690_v41 = vld [vmem:[%s8935_s1 + $0x2e8] sm:$0xff]  ;;  %9001 = vst [vmem:[#allocation16_spill] sm:$0xff] %v7220_v49  ;;  %v1603_v18 = vrot.slane %v7416_v34, 1  ;;  %v945_v34 = vrot.slane %v6946_v32, 2 }
  0x43   : > { %6227 = vmatprep.subr.bf16.mxu0 %v6226_v55  ;;  %6097 = vmatpush3.bf16.msra.mxu1 %v6094_v45  ;;  %v290_v45 = vld [vmem:[%s8935_s1 + $0x68] sm:$0xff]  ;;  %v6238_v59 = vpack.c.bf16 %v4690_v41, %v4689_v38  ;;  %v4693_v38 = vld [vmem:[%s8935_s1 + $0x300] sm:$0xff] }
  0x44   : > { %5307 = vmatmul.mubr.f32.gmra.mrb[6].mxu1 %v7114_v48  ;;  %6099 = vmatprep.subr.bf16.mxu1 %v6098_v61  ;;  %v6110_v62 = vpack.c.bf16 %v290_v45, %v289_v44  ;;  %v4694_v41 = vld [vmem:[%s8935_s1 + $0x308] sm:$0xff] }
  0x45   : > { %5627 = vmatmul.mubr.f32.gmra.mrb[6].mxu0 %v7148_v2  ;;  %5309 = vmatprep.mubr.f32.mxu1 %v7118_v50  ;;  %v4630_v44 = vld [vmem:[%s8935_s1 + $0x108] sm:$0xff] }
  0x46   : > { %5629 = vmatprep.mubr.f32.mxu0 %v7152_v4  ;;  %6229 = vmatpush3.bf16.msra.mxu0 %v6226_v55  ;;  %v7225_v55 = vld [vmem:[%s6921_s9 + $0xd0] sm:$0x3] }
  0x47   : > { %6231 = vmatprep.subr.bf16.mxu0 %v6230_v12  ;;  %6101 = vmatpush3.bf16.msra.mxu1 %v6098_v61  ;;  %v7232_v61 = vld [vmem:[%s6921_s9 + $0xe0] sm:$0xff]  ;;  %v402_v14 = vrot.slane %v7225_v55, 1 }
  0x48   : > { %5310 = vmatmul.mubr.f32.gmra.mrb[8].mxu1 %v7148_v2  ;;  %6103 = vmatprep.subr.bf16.mxu1 %v6102_v16  ;;  %v405_v17 = vrot.slane %v7232_v61, 1  ;;  %v7387_v2 = vld [vmem:[%s6921_s9 + $0x160] sm:$0x3] }
  0x49   : > { %5630 = vmatmul.mubr.f32.gmra.mrb[8].mxu0 %v7182_v20  ;;  %5312 = vmatprep.mubr.f32.mxu1 %v7152_v4  ;;  %v7284_v45 = vsel %vm358_vm0, %v400_v52, %v402_v14  ;;  %v7299_v52 = vld [vmem:[%s6921_s9 + $0x108] sm:$0xff]  ;;  %v7302_v14 = vld [vmem:[%s6921_s9 + $0x110] sm:$0xff] }
  0x4a   : > { %5632 = vmatprep.mubr.f32.mxu0 %v7186_v25  ;;  %6233 = vmatpush3.bf16.msra.mxu0 %v6230_v12  ;;  %v7250_v12 = vsel %vm358_vm0, %v395_v27, %v397_v47  ;;  %v7266_v27 = vld [vmem:[%s6921_s9 + $0xf8] sm:$0xff]  ;;  %9004 = vst [vmem:[#allocation19_spill] sm:$0xff] %v7284_v45  ;;  %v407_v47 = vrot.slane %v7259_v19, 1 }
  0x4b   : > { %6235 = vmatprep.subr.bf16.mxu0 %v6234_v35  ;;  %6105 = vmatpush3.bf16.msra.mxu1 %v6102_v16  ;;  %9002 = vst [vmem:[#allocation17_spill] sm:$0xff] %v7250_v12  ;;  %v404_v16 = vrot.slane %v7228_v58, 1  ;;  %v410_v3 = vrot.slane %v7266_v27, 1 }
  0x4c   : > { %5313 = vmatmul.mubr.f32.gmra.mrb[10].mxu1 %v7182_v20  ;;  %6107 = vmatprep.subr.bf16.mxu1 %v6106_v43 }
  0x4d   : > { %5633 = vmatmul.mubr.f32.gmra.mrb[10].mxu0 %v7216_v46  ;;  %5315 = vmatprep.mubr.f32.mxu1 %v7186_v25  ;;  %v7288_v51 = vsel %vm358_vm0, %v404_v16, %v405_v17  ;;  %v7365_v25 = vld [vmem:[%s6921_s9 + $0x148] sm:$0x3] }
  0x4e   : > { %5635 = vmatprep.mubr.f32.mxu0 %v7220_v49  ;;  %6237 = vmatpush3.bf16.msra.mxu0 %v6234_v35  ;;  %v6114_v35 = vpack.c.bf16 %v292_v6, %v291_v5  ;;  %9005 = vst [vmem:[#allocation20_spill] sm:$0xff] %v7288_v51  ;;  %v7293_v5 = vld [vmem:[%s6921_s9 + $0x100] sm:$0x3]  ;;  %v7295_v6 = vpack.c.bf16 %v4694_v41, %v4693_v38  ;;  %v414_v41 = vrot.slane %v7299_v52, 1 }
  0x4f   : > { %6239 = vmatprep.subr.bf16.mxu0 %v6238_v59  ;;  %6109 = vmatpush3.bf16.msra.mxu1 %v6106_v43  ;;  %v4629_v43 = vld [vmem:[%s8935_s1 + $0x100] sm:$0xff]  ;;  %v412_v16 = vrot.slane %v7293_v5, 1  ;;  %v7314_v38 = vsel %vm358_vm0, %v409_v63, %v410_v3 }
  0x50   : > { %5316 = vmatmul.mubr.f32.gmra.mrb[12].mxu1 %v7216_v46  ;;  %6111 = vmatprep.subr.bf16.mxu1 %v6110_v62  ;;  %9007 = vst [vmem:[#allocation22_spill] sm:$0xff] %v7314_v38 }
  0x51   : > { %5636 = vmatmul.mubr.f32.gmra.mrb[12].mxu0 %v7250_v12  ;;  %5318 = vmatprep.mubr.f32.mxu1 %v7220_v49 }
  0x52   : > { %5638 = vmatprep.mubr.f32.mxu0 %v7254_v15  ;;  %6241 = vmatpush3.bf16.msra.mxu0 %v6238_v59  ;;  %v7304_v59 = vpack.c.bf16 %v4630_v44, %v4629_v43  ;;  %v415_v43 = vrot.slane %v7302_v14, 1  ;;  %v7319_v44 = vld [vmem:[%s6921_s9 + $0x118] sm:$0x3] }
  0x53   : > { %6243 = vmatprep.subr.bf16.mxu0 %v6242_v26  ;;  %6113 = vmatpush3.bf16.msra.mxu1 %v6110_v62  ;;  %v7310_v62 = vsel %vm358_vm0, %v405_v17, %v407_v47  ;;  %v7324_v17 = vld [vmem:[%s6921_s9 + $0x120] sm:$0xff]  ;;  %v417_v47 = vrot.slane %v7319_v44, 1 }
  0x54   : > { %5319 = vmatmul.mubr.f32.gmra.mrb[14].mxu1 %v7250_v12  ;;  %6115 = vmatprep.subr.bf16.mxu1 %v6114_v35  ;;  %9006 = vst [vmem:[#allocation21_spill] sm:$0xff] %v7310_v62  ;;  %v7338_v63 = vsel %vm358_vm0, %v414_v41, %v415_v43  ;;  %v7343_v12 = vld [vmem:[%s6921_s9 + $0x130] sm:$0x3] }
  0x55   : > { %5639 = vmatmul.mubr.f32.gmra.mrb[14].mxu0 %v7284_v45  ;;  %5321 = vmatprep.mubr.f32.mxu1 %v7254_v15  ;;  %9009 = vst [vmem:[#allocation24_spill] sm:$0xff] %v7338_v63  ;;  %v422_v41 = vrot.slane %v7343_v12, 1 }
  0x56   : > { %5641 = vmatprep.mubr.f32.mxu0 %v7288_v51  ;;  %6245 = vmatpush3.bf16.msra.mxu0 %v6242_v26  ;;  %v7327_v26 = vld [vmem:[%s6921_s9 + $0x128] sm:$0xff] }
  0x57   : > { %6117 = vmatpush3.bf16.msra.mxu1 %v6114_v35  ;;  %6247 = vmatprep.subr.bf16.mxu0 %v7295_v6  ;;  %v7334_v35 = vsel %vm358_vm0, %v410_v3, %v412_v16  ;;  %v420_v15 = vrot.slane %v7327_v26, 1  ;;  %v7350_v3 = vld [vmem:[%s6921_s9 + $0x140] sm:$0xff]  ;;  %v7356_v16 = vsel %vm358_vm0, %v415_v43, %v417_v47  ;;  %v7372_v43 = vld [vmem:[%s6921_s9 + $0x158] sm:$0xff]  ;;  %v427_v47 = vrot.slane %v7365_v25, 1 }
  0x58   : > { %5322 = vmatmul.mubr.f32.gmra.mrb[16].mxu1 %v7284_v45  ;;  %6119 = vmatprep.subr.bf16.mxu1 %v7304_v59  ;;  %9008 = vst [vmem:[#allocation23_spill] sm:$0xff] %v7334_v35  ;;  %v419_v45 = vrot.slane %v7324_v17, 1  ;;  %9010 = vst [vmem:[#allocation25_spill] sm:$0xff] %v7356_v16  ;;  %v425_v46 = vrot.slane %v7350_v3, 1  ;;  %v430_v4 = vrot.slane %v7372_v43, 1 }
  0x59   : > { %5642 = vmatmul.mubr.f32.gmra.mrb[16].mxu0 %v7310_v62  ;;  %5324 = vmatprep.mubr.f32.mxu1 %v7288_v51  ;;  %v7347_v51 = vld [vmem:[%s6921_s9 + $0x138] sm:$0xff] }
  0x5a   : > { %5644 = vmatprep.mubr.f32.mxu0 %v7314_v38  ;;  %v7360_v49 = vsel %vm358_vm0, %v419_v45, %v420_v15  ;;  %v7378_v45 = vsel %vm358_vm0, %v420_v15, %v422_v41  ;;  %v7394_v15 = vld [vmem:[%s6921_s9 + $0x170] sm:$0xff]  ;;  %v432_v41 = vrot.slane %v7387_v2, 1 }
  0x5b   : > { %9011 = vst [vmem:[#allocation26_spill] sm:$0xff] %v7360_v49  ;;  %9012 = vst [vmem:[#allocation27_spill] sm:$0xff] %v7378_v45  ;;  %v435_v48 = vrot.slane %v7394_v15, 1 }
  0x5c   : > { %5325 = vmatmul.mubr.f32.gmra.mrb[18].mxu1 %v7310_v62  ;;  %v424_v62 = vrot.slane %v7347_v51, 1 }
  0x5d   : > { %5645 = vmatmul.mubr.f32.gmra.mrb[18].mxu0 %v7334_v35  ;;  %5327 = vmatprep.mubr.f32.mxu1 %v7314_v38  ;;  %v7369_v38 = vld [vmem:[%s6921_s9 + $0x150] sm:$0xff] }
  0x5e   : > { %5647 = vmatprep.mubr.f32.mxu0 %v7338_v63  ;;  %v7382_v20 = vsel %vm358_vm0, %v424_v62, %v425_v46  ;;  %v7400_v62 = vsel %vm358_vm0, %v425_v46, %v427_v47  ;;  %v7422_v46 = vsel %vm358_vm0, %v430_v4, %v432_v41 }
  0x5f   : > { %9013 = vst [vmem:[#allocation28_spill] sm:$0xff] %v7382_v20  ;;  %9014 = vst [vmem:[#allocation29_spill] sm:$0xff] %v7400_v62 }
  0x60   : > { %5328 = vmatmul.mubr.f32.gmra.mrb[20].mxu1 %v7334_v35  ;;  %v429_v35 = vrot.slane %v7369_v38, 1  ;;  %9018 = vst [vmem:[#allocation33_spill] sm:$0xff] %v7422_v46 }
  0x61   : > { %5648 = vmatmul.mubr.f32.gmra.mrb[20].mxu0 %v7356_v16  ;;  %5330 = vmatprep.mubr.f32.mxu1 %v7338_v63  ;;  %v7391_v63 = vld [vmem:[%s6921_s9 + $0x168] sm:$0xff] }
  0x62   : > { %5650 = vmatprep.mubr.f32.mxu0 %v7360_v49  ;;  %v7404_v50 = vsel %vm358_vm0, %v429_v35, %v430_v4  ;;  %v437_v35 = vrot.slane %v7409_v36, 1 }
  0x63   : > { %9015 = vst [vmem:[#allocation30_spill] sm:$0xff] %v7404_v50 }
  0x64   : > { %5331 = vmatmul.mubr.f32.gmra.mrb[22].mxu1 %v7356_v16  ;;  %v434_v16 = vrot.slane %v7391_v63, 1  ;;  %v7438_v4 = vsel %vm358_vm0, %v435_v48, %v437_v35  ;;  %v949_v35 = vrot.slane %v7015_v0, 2 }
  0x65   : > { %5651 = vmatmul.mubr.f32.gmra.mrb[22].mxu0 %v7378_v45  ;;  %5333 = vmatprep.mubr.f32.mxu1 %v7360_v49  ;;  %v7413_v49 = vld [vmem:[%s6921_s9 + $0x180] sm:$0xff]  ;;  %9021 = vst [vmem:[#allocation36_spill] sm:$0xff] %v7438_v4 }
  0x66   : > { %5653 = vmatprep.mubr.f32.mxu0 %v7382_v20  ;;  %9016 = vst [vmem:[#allocation31_spill] sm:$0xff] %v7413_v49  ;;  %v7426_v47 = vsel %vm358_vm0, %v434_v16, %v435_v48  ;;  %v1605_v16 = vrot.slane %v7431_v57, 1  ;;  %v4697_v57 = vld [vmem:[%s8935_s1 + $0x320] sm:$0xff] }
  0x67   : > { %9019 = vst [vmem:[#allocation34_spill] sm:$0xff] %v7426_v47 }
  0x68   : > { %5334 = vmatmul.mubr.f32.gmra.mrb[24].mxu1 %v7378_v45  ;;  %v1602_v45 = vrot.slane %v7413_v49, 1  ;;  %v7452_v48 = vsel %vm358_vm0, %v1603_v18, %v1605_v16 }
  0x69   : > { %5654 = vmatmul.mubr.f32.gmra.mrb[24].mxu0 %v7400_v62  ;;  %5336 = vmatprep.mubr.f32.mxu1 %v7382_v20  ;;  %v944_v20 = vrot.slane %v6943_v31, 2  ;;  %9023 = vst [vmem:[#allocation38_spill] sm:$0xff] %v7452_v48 }
  0x6a   : > { %5656 = vmatprep.mubr.f32.mxu0 %v7404_v50  ;;  %v7442_v41 = vsel %vm358_vm0, %v1602_v45, %v1603_v18  ;;  %v4631_v18 = vld [vmem:[%s8935_s1 + $0x110] sm:$0xff] }
  0x6b   : > { %9022 = vst [vmem:[#allocation37_spill] sm:$0xff] %v7442_v41  ;;  %v7455_v45 = vsel %vm938_vm1, %v944_v20, %v945_v34  ;;  %v4632_v20 = vld [vmem:[%s8935_s1 + $0x118] sm:$0xff] }
  0x6c   : > { %5337 = vmatmul.mubr.f32.gmra.mrb[26].mxu1 %v7400_v62  ;;  %v950_v62 = vrot.slane %v7018_v1, 2 }
  0x6d   : > { %5657 = vmatmul.mubr.f32.gmra.mrb[26].mxu0 %v7422_v46  ;;  %5339 = vmatprep.mubr.f32.mxu1 %v7404_v50  ;;  %v947_v50 = vrot.slane %v7003_v60, 2  ;;  %v4696_v60 = vld [vmem:[%s8935_s1 + $0x318] sm:$0xff] }
  0x6e   : > { %5659 = vmatprep.mubr.f32.mxu0 %v7426_v47 }
  0x6f   : > { %v7476_v16 = vsel %vm938_vm1, %v945_v34, %v947_v50  ;;  %v4698_v34 = vld [vmem:[%s8935_s1 + $0x328] sm:$0xff]  ;;  %v6122_v50 = vpack.c.bf16 %v4632_v20, %v4631_v18  ;;  %v960_v18 = vrot.slane %v7064_v24, 2 }
  0x70   : > { %5340 = vmatmul.mubr.f32.gmra.mrb[28].mxu1 %v7422_v46  ;;  %v6254_v20 = vpack.c.bf16 %v4698_v34, %v4697_v57  ;;  %v4635_v57 = vld [vmem:[%s8935_s1 + $0x130] sm:$0xff]  ;;  %v964_v34 = vrot.slane %v7093_v40, 2 }
  0x71   : > { %5660 = vmatmul.mubr.f32.gmra.mrb[28].mxu0 %v7438_v4  ;;  %5342 = vmatprep.mubr.f32.mxu1 %v7426_v47  ;;  %v4695_v47 = vld [vmem:[%s8935_s1 + $0x310] sm:$0xff] }
  0x72   : > { %5662 = vmatprep.mubr.f32.mxu0 %v7442_v41  ;;  %v952_v41 = vrot.slane %v7025_v8, 2  ;;  %v6250_v46 = vpack.c.bf16 %v4696_v60, %v4695_v47  ;;  %v4633_v8 = vld [vmem:[%s8935_s1 + $0x120] sm:$0xff] }
  0x74   : > { %5343 = vmatmul.mubr.f32.gmra.mrb[30].mxu1 %v7438_v4  ;;  %v7480_v4 = vsel %vm938_vm1, %v949_v35, %v950_v62  ;;  %v7502_v47 = vsel %vm938_vm1, %v950_v62, %v952_v41  ;;  %v957_v35 = vrot.slane %v7058_v21, 2  ;;  %v4700_v21 = vld [vmem:[%s8935_s1 + $0x338] sm:$0xff]  ;;  %v962_v41 = vrot.slane %v7090_v39, 2  ;;  %v4702_v39 = vld [vmem:[%s8935_s1 + $0x348] sm:$0xff] }
  0x75   : > { %5663 = vmatmul.mubr.f32.gmra.mrb[30].mxu0 %v7452_v48  ;;  %5377 = vmatprep.mubr.f32.mxu1 %v6936_v28  ;;  %v954_v28 = vrot.slane %v7028_v9, 2  ;;  %v955_v48 = vrot.slane %v7031_v10, 2 }
  0x76   : > { %5697 = vmatprep.mubr.f32.mxu0 %v7455_v45 }
  0x77   : > { %v7506_v60 = vsel %vm938_vm1, %v954_v28, %v955_v48 }
  0x78   : > { %5378 = vmatmul.mubr.f32.vlgmr.msra.gmra.mrb[0].mxu1 %v6939_v29  ;;  %v4634_v29 = vld [vmem:[%s8935_s1 + $0x128] sm:$0xff] }
  0x79   : > { %5698 = vmatmul.mubr.f32.vlgmr.msra.gmra.mrb[0].mxu0 %v7476_v16  ;;  %5380 = vmatprep.mubr.f32.mxu1 %v6943_v31  ;;  %v959_v31 = vrot.slane %v7061_v23, 2  ;;  %v6126_v62 = vpack.c.bf16 %v4634_v29, %v4633_v8  ;;  %v965_v8 = vrot.slane %v7096_v42, 2 }
  0x7a   : > { %6249 = vmatpush3.bf16.msra.mxu0 %v7295_v6  ;;  %5700 = vmatprep.mubr.f32.mxu0 %v7480_v4  ;;  %v4699_v6 = vld [vmem:[%s8935_s1 + $0x330] sm:$0xff] }
  0x7b   : > { %6251 = vmatprep.subr.bf16.mxu0 %v6250_v46  ;;  %6121 = vmatpush3.bf16.msra.mxu1 %v7304_v59  ;;  %v7528_v59 = vsel %vm938_vm1, %v955_v48, %v957_v35  ;;  %v7532_v28 = vsel %vm938_vm1, %v959_v31, %v960_v18  ;;  %v6258_v29 = vpack.c.bf16 %v4700_v21, %v4699_v6  ;;  %v4701_v48 = vld [vmem:[%s8935_s1 + $0x340] sm:$0xff]  ;;  %v967_v31 = vrot.slane %v7123_v53, 2  ;;  %v4704_v53 = vld [vmem:[%s8935_s1 + $0x358] sm:$0xff] }
  0x7c   : > { %5381 = vmatmul.mubr.f32.gmra.mrb[2].mxu1 %v6946_v32  ;;  %6123 = vmatprep.subr.bf16.mxu1 %v6122_v50  ;;  %v4636_v32 = vld [vmem:[%s8935_s1 + $0x138] sm:$0xff]  ;;  %v7553_v35 = vsel %vm938_vm1, %v960_v18, %v962_v41  ;;  %v7557_v6 = vsel %vm938_vm1, %v964_v34, %v965_v8  ;;  %v969_v21 = vrot.slane %v7126_v54, 2  ;;  %v4703_v18 = vld [vmem:[%s8935_s1 + $0x350] sm:$0xff]  ;;  %v972_v34 = vrot.slane %v7157_v7, 2  ;;  %v4706_v7 = vld [vmem:[%s8935_s1 + $0x368] sm:$0xff] }
  0x7d   : > { %5701 = vmatmul.mubr.f32.gmra.mrb[2].mxu0 %v7502_v47  ;;  %5383 = vmatprep.mubr.f32.mxu1 %v7015_v0  ;;  %v7578_v41 = vsel %vm938_vm1, %v965_v8, %v967_v31  ;;  %v4705_v8 = vld [vmem:[%s8935_s1 + $0x360] sm:$0xff] }
  0x7e   : > { %5703 = vmatprep.mubr.f32.mxu0 %v7506_v60  ;;  %6253 = vmatpush3.bf16.msra.mxu0 %v6250_v46  ;;  %v6130_v46 = vpack.c.bf16 %v4636_v32, %v4635_v57  ;;  %v970_v57 = vrot.slane %v7130_v56, 2  ;;  %v6262_v32 = vpack.c.bf16 %v4702_v39, %v4701_v48  ;;  %v974_v39 = vrot.slane %v7160_v11, 2 }
  0x7f   : > { %6255 = vmatprep.subr.bf16.mxu0 %v6254_v20  ;;  %6125 = vmatpush3.bf16.msra.mxu1 %v6122_v50  ;;  %v4637_v50 = vld [vmem:[%s8935_s1 + $0x140] sm:$0xff] }
  0x80   : > { %5384 = vmatmul.mubr.f32.gmra.mrb[4].mxu1 %v7018_v1  ;;  %6127 = vmatprep.subr.bf16.mxu1 %v6126_v62  ;;  %v4638_v1 = vld [vmem:[%s8935_s1 + $0x148] sm:$0xff]  ;;  %v7582_v48 = vsel %vm938_vm1, %v969_v21, %v970_v57  ;;  %v7603_v31 = vsel %vm938_vm1, %v970_v57, %v972_v34  ;;  %v977_v21 = vrot.slane %v7191_v30, 2  ;;  %v4707_v57 = vld [vmem:[%s8935_s1 + $0x370] sm:$0xff]  ;;  %v4708_v30 = vld [vmem:[%s8935_s1 + $0x378] sm:$0xff] }
  0x81   : > { %5704 = vmatmul.mubr.f32.gmra.mrb[4].mxu0 %v7528_v59  ;;  %5386 = vmatprep.mubr.f32.mxu1 %v7028_v9  ;;  %9024 = vst [vmem:[#allocation39_spill] sm:$0xff] %v7582_v48 }
  0x82   : > { %5706 = vmatprep.mubr.f32.mxu0 %v7532_v28  ;;  %6257 = vmatpush3.bf16.msra.mxu0 %v6254_v20  ;;  %v6134_v20 = vpack.c.bf16 %v4638_v1, %v4637_v50  ;;  %v975_v50 = vrot.slane %v7164_v13, 2  ;;  %v6266_v1 = vpack.c.bf16 %v4704_v53, %v4703_v18  ;;  %v979_v53 = vrot.slane %v7194_v33, 2 }
  0x83   : > { %6259 = vmatprep.subr.bf16.mxu0 %v6258_v29  ;;  %6129 = vmatpush3.bf16.msra.mxu1 %v6126_v62  ;;  %v4639_v62 = vld [vmem:[%s8935_s1 + $0x150] sm:$0xff] }
  0x84   : > { %5387 = vmatmul.mubr.f32.gmra.mrb[6].mxu1 %v7031_v10  ;;  %6131 = vmatprep.subr.bf16.mxu1 %v6130_v46  ;;  %v4640_v10 = vld [vmem:[%s8935_s1 + $0x158] sm:$0xff]  ;;  %v7607_v18 = vsel %vm938_vm1, %v974_v39, %v975_v50  ;;  %v7628_v34 = vsel %vm938_vm1, %v975_v50, %v977_v21  ;;  %v982_v39 = vrot.slane %v7225_v55, 2  ;;  %v4709_v50 = vld [vmem:[%s8935_s1 + $0x380] sm:$0xff]  ;;  %v4710_v55 = vld [vmem:[%s8935_s1 + $0x388] sm:$0xff] }
  0x85   : > { %5707 = vmatmul.mubr.f32.gmra.mrb[6].mxu0 %v7553_v35  ;;  %5389 = vmatprep.mubr.f32.mxu1 %v7061_v23  ;;  %9025 = vst [vmem:[#allocation40_spill] sm:$0xff] %v7607_v18 }
  0x86   : > { %5709 = vmatprep.mubr.f32.mxu0 %v7557_v6  ;;  %6261 = vmatpush3.bf16.msra.mxu0 %v6258_v29  ;;  %v6138_v29 = vpack.c.bf16 %v4640_v10, %v4639_v62  ;;  %v980_v62 = vrot.slane %v7198_v37, 2  ;;  %v6270_v10 = vpack.c.bf16 %v4706_v7, %v4705_v8  ;;  %v984_v7 = vrot.slane %v7228_v58, 2 }
  0x87   : > { %6263 = vmatprep.subr.bf16.mxu0 %v6262_v32  ;;  %6133 = vmatpush3.bf16.msra.mxu1 %v6130_v46  ;;  %v4641_v46 = vld [vmem:[%s8935_s1 + $0x160] sm:$0xff] }
  0x88   : > { %5390 = vmatmul.mubr.f32.gmra.mrb[8].mxu1 %v7064_v24  ;;  %6135 = vmatprep.subr.bf16.mxu1 %v6134_v20  ;;  %v4642_v24 = vld [vmem:[%s8935_s1 + $0x168] sm:$0xff]  ;;  %v7632_v8 = vsel %vm938_vm1, %v979_v53, %v980_v62  ;;  %v7653_v21 = vsel %vm938_vm1, %v980_v62, %v982_v39  ;;  %v987_v53 = vrot.slane %v7259_v19, 2  ;;  %v992_v62 = vrot.slane %v7293_v5, 2 }
  0x89   : > { %5710 = vmatmul.mubr.f32.gmra.mrb[8].mxu0 %v7578_v41  ;;  %5392 = vmatprep.mubr.f32.mxu1 %v7093_v40  ;;  %9026 = vst [vmem:[#allocation41_spill] sm:$0xff] %v7632_v8  ;;  %v995_v39 = vrot.slane %v7302_v14, 2 }
  0x8a   : > { %5712 = vmatprep.mubr.f32.mxu0 %v7582_v48  ;;  %6265 = vmatpush3.bf16.msra.mxu0 %v6262_v32  ;;  %v6142_v48 = vpack.c.bf16 %v4642_v24, %v4641_v46  ;;  %v4643_v32 = vld [vmem:[%s8935_s1 + $0x170] sm:$0xff]  ;;  %v985_v46 = vrot.slane %v7232_v61, 2  ;;  %v6274_v24 = vpack.c.bf16 %v4708_v30, %v4707_v57  ;;  %v989_v30 = vrot.slane %v7262_v22, 2 }
  0x8b   : > { %6267 = vmatprep.subr.bf16.mxu0 %v6266_v1  ;;  %6137 = vmatpush3.bf16.msra.mxu1 %v6134_v20  ;;  %v4644_v20 = vld [vmem:[%s8935_s1 + $0x178] sm:$0xff] }
  0x8c   : > { %5393 = vmatmul.mubr.f32.gmra.mrb[10].mxu1 %v7096_v42  ;;  %6139 = vmatprep.subr.bf16.mxu1 %v6138_v29  ;;  %v7657_v57 = vsel %vm938_vm1, %v984_v7, %v985_v46  ;;  %v7670_v19 = vsel %vm938_vm1, %v985_v46, %v987_v53  ;;  %v997_v7 = vrot.slane %v7319_v44, 2  ;;  %v1002_v44 = vrot.slane %v7343_v12, 2 }
  0x8d   : > { %5713 = vmatmul.mubr.f32.gmra.mrb[10].mxu0 %v7603_v31  ;;  %5395 = vmatprep.mubr.f32.mxu1 %v7126_v54  ;;  %v1007_v12 = vrot.slane %v7365_v25, 2  ;;  %v1012_v25 = vrot.slane %v7387_v2, 2  ;;  %v1017_v2 = vrot.slane %v7409_v36, 2 }
  0x8e   : > { %5715 = vmatprep.mubr.f32.mxu0 %v7607_v18  ;;  %6269 = vmatpush3.bf16.msra.mxu0 %v6266_v1  ;;  %v6146_v18 = vpack.c.bf16 %v4644_v20, %v4643_v32  ;;  %v4645_v1 = vld [vmem:[%s8935_s1 + $0x180] sm:$0xff]  ;;  %v990_v32 = vrot.slane %v7266_v27, 2  ;;  %v7661_v20 = vpack.c.bf16 %v4710_v55, %v4709_v50  ;;  %v7698_v50 = vsel %vm938_vm1, %v995_v39, %v997_v7 }
  0x8f   : > { %6271 = vmatprep.subr.bf16.mxu0 %v6270_v10  ;;  %6141 = vmatpush3.bf16.msra.mxu1 %v6138_v29  ;;  %v4646_v29 = vld [vmem:[%s8935_s1 + $0x188] sm:$0xff]  ;;  %v1014_v7 = vrot.slane %v7391_v63, 2 }
  0x90   : > { %5396 = vmatmul.mubr.f32.gmra.mrb[12].mxu1 %v7130_v56  ;;  %6143 = vmatprep.subr.bf16.mxu1 %v6142_v48  ;;  %v7685_v5 = vsel %vm938_vm1, %v990_v32, %v992_v62  ;;  %v1010_v62 = vrot.slane %v7372_v43, 2 }
  0x91   : > { %5716 = vmatmul.mubr.f32.gmra.mrb[12].mxu0 %v7628_v34  ;;  %5398 = vmatprep.mubr.f32.mxu1 %v7160_v11 }
  0x92   : > { %5718 = vmatprep.mubr.f32.mxu0 %v7632_v8  ;;  %6273 = vmatpush3.bf16.msra.mxu0 %v6270_v10  ;;  %v7664_v8 = vpack.c.bf16 %v4646_v29, %v4645_v1  ;;  %v994_v10 = vrot.slane %v7299_v52, 2  ;;  %v1004_v1 = vrot.slane %v7347_v51, 2  ;;  %v1005_v29 = vrot.slane %v7350_v3, 2 }
  0x93   : > { %6275 = vmatprep.subr.bf16.mxu0 %v6274_v24  ;;  %6145 = vmatpush3.bf16.msra.mxu1 %v6142_v48  ;;  %v7674_v48 = vsel %vm938_vm1, %v989_v30, %v990_v32  ;;  %v1009_v32 = vrot.slane %v7369_v38, 2 }
  0x94   : > { %5399 = vmatmul.mubr.f32.gmra.mrb[14].mxu1 %v7164_v13  ;;  %6147 = vmatprep.subr.bf16.mxu1 %v6146_v18  ;;  %v7689_v46 = vsel %vm938_vm1, %v994_v10, %v995_v39  ;;  %v7715_v30 = vsel %vm938_vm1, %v1004_v1, %v1005_v29  ;;  %v7724_v10 = vsel %vm938_vm1, %v1005_v29, %v1007_v12  ;;  %v1883_v1 = vrot.slane %v7413_v49, 2  ;;  %v9030_v29 = vld [vmem:[#allocation32_spill] sm:$0xff] }
  0x95   : > { %5719 = vmatmul.mubr.f32.gmra.mrb[14].mxu0 %v7653_v21  ;;  %5401 = vmatprep.mubr.f32.mxu1 %v7194_v33  ;;  %9027 = vst [vmem:[#allocation42_spill] sm:$0xff] %v7724_v10  ;;  %v7728_v39 = vsel %vm938_vm1, %v1009_v32, %v1010_v62  ;;  %v1884_v12 = vrot.slane %v9030_v29, 2  ;;  %v9032_v29 = vld [vmem:[#allocation5_spill] sm:$0xff] }
  0x96   : > { %5721 = vmatprep.mubr.f32.mxu0 %v7657_v57  ;;  %6277 = vmatpush3.bf16.msra.mxu0 %v6274_v24  ;;  %v1000_v24 = vrot.slane %v7327_v26, 2  ;;  %9028 = vst [vmem:[#allocation43_spill] sm:$0xff] %v7728_v39 }
  0x97   : > { %6149 = vmatpush3.bf16.msra.mxu1 %v6146_v18  ;;  %6279 = vmatprep.subr.bf16.mxu0 %v7661_v20  ;;  %v999_v18 = vrot.slane %v7324_v17, 2  ;;  %v7756_v49 = vsel %vm938_vm1, %v1883_v1, %v1884_v12  ;;  %v4712_v1 = vld [vmem:[%s8935_s1 + $0x398] sm:$0xff] }
  0x98   : > { %5402 = vmatmul.mubr.f32.gmra.mrb[16].mxu1 %v7198_v37  ;;  %6151 = vmatprep.subr.bf16.mxu1 %v7664_v8  ;;  %v7711_v53 = vsel %vm938_vm1, %v1000_v24, %v1002_v44 }
  0x99   : > { %5722 = vmatmul.mubr.f32.gmra.mrb[16].mxu0 %v7670_v19  ;;  %5404 = vmatprep.mubr.f32.mxu1 %v7228_v58  ;;  %v7702_v55 = vsel %vm938_vm1, %v999_v18, %v1000_v24  ;;  %v1015_v18 = vrot.slane %v7394_v15, 2  ;;  %v7737_v24 = vsel %vm938_vm1, %v1010_v62, %v1012_v25  ;;  %v9031_v62 = vld [vmem:[#allocation35_spill] sm:$0xff]  ;;  %v6691_v25 = vld [vmem:[%s6921_s9] sm:$0xff] }
  0x9a   : > { %5724 = vmatprep.mubr.f32.mxu0 %v7674_v48  ;;  %9029 = vst [vmem:[#allocation44_spill] sm:$0xff] %v7737_v24  ;;  %v1886_v36 = vrot.slane %v9031_v62, 2  ;;  %v4648_v62 = vld [vmem:[%s8935_s1 + $0x198] sm:$0xff] }
  0x9b   : > { %v7741_v44 = vsel %vm938_vm1, %v1014_v7, %v1015_v18  ;;  %v7750_v32 = vsel %vm938_vm1, %v1015_v18, %v1017_v2  ;;  %v939_v7 = vrot.slane %v6691_v25, 2  ;;  %v4713_v25 = vld [vmem:[%s8935_s1 + $0x3a0] sm:$0xff] }
  0x9c   : > { %5405 = vmatmul.mubr.f32.gmra.mrb[18].mxu1 %v7232_v61  ;;  %v7764_v18 = vsel %vm938_vm1, %v1884_v12, %v1886_v36  ;;  %v4647_v12 = vld [vmem:[%s8935_s1 + $0x190] sm:$0xff] }
  0x9d   : > { %5725 = vmatmul.mubr.f32.gmra.mrb[18].mxu0 %v7685_v5  ;;  %5407 = vmatprep.mubr.f32.mxu1 %v7262_v22 }
  0x9e   : > { %5727 = vmatprep.mubr.f32.mxu0 %v7689_v46 }
  0xa0   : > { %5408 = vmatmul.mubr.f32.gmra.mrb[20].mxu1 %v7266_v27 }
  0xa1   : > { %5728 = vmatmul.mubr.f32.gmra.mrb[20].mxu0 %v7698_v50  ;;  %5410 = vmatprep.mubr.f32.mxu1 %v7299_v52 }
  0xa2   : > { %5730 = vmatprep.mubr.f32.mxu0 %v7702_v55 }
  0xa4   : > { %5411 = vmatmul.mubr.f32.gmra.mrb[22].mxu1 %v7302_v14 }
  0xa5   : > { %5731 = vmatmul.mubr.f32.gmra.mrb[22].mxu0 %v7711_v53  ;;  %5413 = vmatprep.mubr.f32.mxu1 %v7324_v17 }
  0xa6   : > { %5733 = vmatprep.mubr.f32.mxu0 %v7715_v30 }
  0xa8   : > { %5414 = vmatmul.mubr.f32.gmra.mrb[24].mxu1 %v7327_v26 }
  0xa9   : > { %5734 = vmatmul.mubr.f32.gmra.mrb[24].mxu0 %v7724_v10  ;;  %5416 = vmatprep.mubr.f32.mxu1 %v7347_v51 }
  0xaa   : > { %5736 = vmatprep.mubr.f32.mxu0 %v7728_v39  ;;  %v6692_v39 = vld [vmem:[%s6921_s9 + $0x8] sm:$0xff] }
  0xab   : > { %v940_v10 = vrot.slane %v6692_v39, 2  ;;  %v4711_v39 = vld [vmem:[%s8935_s1 + $0x390] sm:$0xff] }
  0xac   : > { %5417 = vmatmul.mubr.f32.gmra.mrb[26].mxu1 %v7350_v3  ;;  %v6282_v36 = vpack.c.bf16 %v4712_v1, %v4711_v39  ;;  %v4716_v1 = vld [vmem:[%s8935_s1 + $0x3b8] sm:$0xff] }
  0xad   : > { %5737 = vmatmul.mubr.f32.gmra.mrb[26].mxu0 %v7737_v24  ;;  %5419 = vmatprep.mubr.f32.mxu1 %v7369_v38  ;;  %v942_v24 = vrot.slane %v9032_v29, 2  ;;  %v941_v2 = vsel %vm938_vm1, %v939_v7, %v940_v10  ;;  %v7790_v7 = vld [vmem:[%s6921_s9 + $0x38] sm:$0xff] }
  0xae   : > { %5739 = vmatprep.mubr.f32.mxu0 %v7741_v44 }
  0xaf   : > { %v943_v29 = vsel %vm938_vm1, %v940_v10, %v942_v24  ;;  %v4714_v10 = vld [vmem:[%s8935_s1 + $0x3a8] sm:$0xff]  ;;  %v6154_v24 = vpack.c.bf16 %v4648_v62, %v4647_v12  ;;  %v4717_v12 = vld [vmem:[%s8935_s1 + $0x3c0] sm:$0xff] }
  0xb0   : > { %5420 = vmatmul.mubr.f32.gmra.mrb[28].mxu1 %v7372_v43  ;;  %v6286_v39 = vpack.c.bf16 %v4714_v10, %v4713_v25  ;;  %v4718_v62 = vld [vmem:[%s8935_s1 + $0x3c8] sm:$0xff] }
  0xb1   : > { %5740 = vmatmul.mubr.f32.gmra.mrb[28].mxu0 %v7750_v32  ;;  %5422 = vmatprep.mubr.f32.mxu1 %v7391_v63  ;;  %v7830_v10 = vld [vmem:[%s6921_s9 + $0x68] sm:$0xff] }
  0xb2   : > { %5742 = vmatprep.mubr.f32.mxu0 %v7756_v49 }
  0xb4   : > { %5423 = vmatmul.mubr.f32.gmra.mrb[30].mxu1 %v7394_v15 }
  0xb5   : > { %5743 = vmatmul.mubr.f32.gmra.mrb[30].mxu0 %v7764_v18  ;;  %5457 = vmatprep.mubr.f32.mxu1 %v941_v2  ;;  %v4650_v2 = vld [vmem:[%s8935_s1 + $0x1a8] sm:$0xff] }
  0xb6   : > { %5777 = vmatprep.mubr.f32.mxu0 %v7015_v0  ;;  %v4649_v0 = vld [vmem:[%s8935_s1 + $0x1a0] sm:$0xff] }
  0xb8   : > { %5458 = vmatmul.mubr.f32.vlgmr.msra.gmra.mrb[0].mxu1 %v943_v29  ;;  %v6158_v29 = vpack.c.bf16 %v4650_v2, %v4649_v0  ;;  %v4719_v0 = vld [vmem:[%s8935_s1 + $0x3d0] sm:$0xff]  ;;  %v4720_v2 = vld [vmem:[%s8935_s1 + $0x3d8] sm:$0xff] }
  0xb9   : > { %5778 = vmatmul.mubr.f32.vlgmr.msra.gmra.mrb[0].mxu0 %v7790_v7  ;;  %5460 = vmatprep.mubr.f32.mxu1 %v7455_v45  ;;  %v4715_v45 = vld [vmem:[%s8935_s1 + $0x3b0] sm:$0xff] }
  0xba   : > { %6281 = vmatpush3.bf16.msra.mxu0 %v7661_v20  ;;  %5780 = vmatprep.mubr.f32.mxu0 %v7028_v9  ;;  %v7811_v20 = vld [vmem:[%s6921_s9 + $0x50] sm:$0xff] }
  0xbb   : > { %6283 = vmatprep.subr.bf16.mxu0 %v6282_v36  ;;  %6153 = vmatpush3.bf16.msra.mxu1 %v7664_v8  ;;  %v4651_v9 = vld [vmem:[%s8935_s1 + $0x1b0] sm:$0xff]  ;;  %v6290_v8 = vpack.c.bf16 %v4716_v1, %v4715_v45  ;;  %v6298_v1 = vpack.c.bf16 %v4720_v2, %v4719_v0  ;;  %v4726_v0 = vld [vmem:[%s8935_s1 + $0x408] sm:$0xff]  ;;  %v9034_v2 = vld [vmem:[#allocation40_spill] sm:$0xff] }
  0xbc   : > { %5461 = vmatmul.mubr.f32.gmra.mrb[2].mxu1 %v7476_v16  ;;  %6155 = vmatprep.subr.bf16.mxu1 %v6154_v24  ;;  %v4652_v16 = vld [vmem:[%s8935_s1 + $0x1b8] sm:$0xff] }
  0xbd   : > { %5781 = vmatmul.mubr.f32.gmra.mrb[2].mxu0 %v7811_v20  ;;  %5463 = vmatprep.mubr.f32.mxu1 %v7480_v4  ;;  %v6162_v25 = vpack.c.bf16 %v4652_v16, %v4651_v9  ;;  %v4658_v16 = vld [vmem:[%s8935_s1 + $0x1e8] sm:$0xff] }
  0xbe   : > { %5783 = vmatprep.mubr.f32.mxu0 %v7061_v23  ;;  %6285 = vmatpush3.bf16.msra.mxu0 %v6282_v36  ;;  %v4653_v23 = vld [vmem:[%s8935_s1 + $0x1c0] sm:$0xff]  ;;  %v4654_v36 = vld [vmem:[%s8935_s1 + $0x1c8] sm:$0xff] }
  0xbf   : > { %6287 = vmatprep.subr.bf16.mxu0 %v6286_v39  ;;  %6157 = vmatpush3.bf16.msra.mxu1 %v6154_v24  ;;  %v6294_v24 = vpack.c.bf16 %v4718_v62, %v4717_v12  ;;  %v6166_v45 = vpack.c.bf16 %v4654_v36, %v4653_v23  ;;  %v4723_v12 = vld [vmem:[%s8935_s1 + $0x3f0] sm:$0xff]  ;;  %v4724_v62 = vld [vmem:[%s8935_s1 + $0x3f8] sm:$0xff] }
  0xc0   : > { %5464 = vmatmul.mubr.f32.gmra.mrb[4].mxu1 %v7502_v47  ;;  %6159 = vmatprep.subr.bf16.mxu1 %v6158_v29  ;;  %v4660_v23 = vld [vmem:[%s8935_s1 + $0x1f8] sm:$0xff]  ;;  %v6306_v36 = vpack.c.bf16 %v4724_v62, %v4723_v12  ;;  %v6699_v12 = vld [vmem:[%s6921_s9 + $0x48] sm:$0xff] }
  0xc1   : > { %5784 = vmatmul.mubr.f32.gmra.mrb[4].mxu0 %v7830_v10  ;;  %5466 = vmatprep.mubr.f32.mxu1 %v7506_v60  ;;  %v9045_v62 = vld [vmem:[#allocation10_spill] sm:$0xff] }
  0xc2   : > { %5786 = vmatprep.mubr.f32.mxu0 %v7093_v40  ;;  %6289 = vmatpush3.bf16.msra.mxu0 %v6286_v39  ;;  %v4655_v40 = vld [vmem:[%s8935_s1 + $0x1d0] sm:$0xff]  ;;  %v4656_v39 = vld [vmem:[%s8935_s1 + $0x1d8] sm:$0xff] }
  0xc3   : > { %6291 = vmatprep.subr.bf16.mxu0 %v6290_v8  ;;  %6161 = vmatpush3.bf16.msra.mxu1 %v6158_v29  ;;  %v4722_v29 = vld [vmem:[%s8935_s1 + $0x3e8] sm:$0xff]  ;;  %v6170_v9 = vpack.c.bf16 %v4656_v39, %v4655_v40  ;;  %v6697_v40 = vld [vmem:[%s6921_s9 + $0x20] sm:$0xff] }
  0xc4   : > { %5467 = vmatmul.mubr.f32.gmra.mrb[6].mxu1 %v7528_v59  ;;  %6163 = vmatprep.subr.bf16.mxu1 %v6162_v25  ;;  %v4729_v39 = vld [vmem:[%s8935_s1 + $0x420] sm:$0xff] }
  0xc5   : > { %5787 = vmatmul.mubr.f32.gmra.mrb[6].mxu0 %v7096_v42  ;;  %5469 = vmatprep.mubr.f32.mxu1 %v7532_v28  ;;  %v4721_v42 = vld [vmem:[%s8935_s1 + $0x3e0] sm:$0xff] }
  0xc6   : > { %5789 = vmatprep.mubr.f32.mxu0 %v7126_v54  ;;  %6293 = vmatpush3.bf16.msra.mxu0 %v6290_v8  ;;  %v4657_v54 = vld [vmem:[%s8935_s1 + $0x1e0] sm:$0xff]  ;;  %v6302_v8 = vpack.c.bf16 %v4722_v29, %v4721_v42  ;;  %v9042_v42 = vld [vmem:[#allocation7_spill] sm:$0xff] }
  0xc7   : > { %6295 = vmatprep.subr.bf16.mxu0 %v6294_v24  ;;  %6165 = vmatpush3.bf16.msra.mxu1 %v6162_v25  ;;  %v9033_v25 = vld [vmem:[#allocation39_spill] sm:$0xff] }
  0xc8   : > { %5470 = vmatmul.mubr.f32.gmra.mrb[8].mxu1 %v7553_v35  ;;  %6167 = vmatprep.subr.bf16.mxu1 %v6166_v45  ;;  %v6698_v29 = vld [vmem:[%s6921_s9 + $0x30] sm:$0xff] }
  0xc9   : > { %5790 = vmatmul.mubr.f32.gmra.mrb[8].mxu0 %v7130_v56  ;;  %5472 = vmatprep.mubr.f32.mxu1 %v7557_v6  ;;  %v6174_v56 = vpack.c.bf16 %v4658_v16, %v4657_v54  ;;  %v4731_v16 = vld [vmem:[%s8935_s1 + $0x430] sm:$0xff] }
  0xca   : > { %5792 = vmatprep.mubr.f32.mxu0 %v7160_v11  ;;  %6297 = vmatpush3.bf16.msra.mxu0 %v6294_v24  ;;  %v4659_v11 = vld [vmem:[%s8935_s1 + $0x1f0] sm:$0xff]  ;;  %v4725_v24 = vld [vmem:[%s8935_s1 + $0x400] sm:$0xff] }
  0xcb   : > { %6299 = vmatprep.subr.bf16.mxu0 %v6298_v1  ;;  %6169 = vmatpush3.bf16.msra.mxu1 %v6166_v45  ;;  %v9035_v45 = vld [vmem:[#allocation41_spill] sm:$0xff] }
  0xcc   : > { %5473 = vmatmul.mubr.f32.gmra.mrb[10].mxu1 %v7578_v41  ;;  %6171 = vmatprep.subr.bf16.mxu1 %v6170_v9 }
  0xcd   : > { %5793 = vmatmul.mubr.f32.gmra.mrb[10].mxu0 %v7164_v13  ;;  %5475 = vmatprep.mubr.f32.mxu1 %v9033_v25  ;;  %v6178_v13 = vpack.c.bf16 %v4660_v23, %v4659_v11  ;;  %v4734_v23 = vld [vmem:[%s8935_s1 + $0x448] sm:$0xff] }
  0xce   : > { %5795 = vmatprep.mubr.f32.mxu0 %v7194_v33  ;;  %6301 = vmatpush3.bf16.msra.mxu0 %v6298_v1  ;;  %v6310_v33 = vpack.c.bf16 %v4726_v0, %v4725_v24  ;;  %v4730_v1 = vld [vmem:[%s8935_s1 + $0x428] sm:$0xff]  ;;  %v9047_v24 = vld [vmem:[#allocation12_spill] sm:$0xff] }
  0xcf   : > { %6303 = vmatprep.subr.bf16.mxu0 %v6302_v8  ;;  %6173 = vmatpush3.bf16.msra.mxu1 %v6170_v9  ;;  %v9043_v9 = vld [vmem:[#allocation8_spill] sm:$0xff]  ;;  %v6318_v54 = vpack.c.bf16 %v4730_v1, %v4729_v39  ;;  %v9050_v39 = vld [vmem:[#allocation15_spill] sm:$0xff] }
  0xd0   : > { %5476 = vmatmul.mubr.f32.gmra.mrb[12].mxu1 %v7603_v31  ;;  %6175 = vmatprep.subr.bf16.mxu1 %v6174_v56  ;;  %v6703_v1 = vld [vmem:[%s6921_s9 + $0x90] sm:$0xff] }
  0xd1   : > { %5796 = vmatmul.mubr.f32.gmra.mrb[12].mxu0 %v7198_v37  ;;  %5478 = vmatprep.mubr.f32.mxu1 %v9034_v2  ;;  %v9036_v37 = vld [vmem:[#allocation42_spill] sm:$0xff] }
  0xd2   : > { %5798 = vmatprep.mubr.f32.mxu0 %v7228_v58  ;;  %6305 = vmatpush3.bf16.msra.mxu0 %v6302_v8  ;;  %v9037_v58 = vld [vmem:[#allocation43_spill] sm:$0xff]  ;;  %v4732_v8 = vld [vmem:[%s8935_s1 + $0x438] sm:$0xff] }
  0xd3   : > { %6307 = vmatprep.subr.bf16.mxu0 %v6306_v36  ;;  %6177 = vmatpush3.bf16.msra.mxu1 %v6174_v56  ;;  %v9044_v56 = vld [vmem:[#allocation9_spill] sm:$0xff]  ;;  %v6322_v11 = vpack.c.bf16 %v4732_v8, %v4731_v16  ;;  %v4740_v16 = vld [vmem:[%s8935_s1 + $0x478] sm:$0xff] }
  0xd4   : > { %5479 = vmatmul.mubr.f32.gmra.mrb[14].mxu1 %v7628_v34  ;;  %6179 = vmatprep.subr.bf16.mxu1 %v6178_v13  ;;  %v9052_v8 = vld [vmem:[#allocation17_spill] sm:$0xff] }
  0xd5   : > { %5799 = vmatmul.mubr.f32.gmra.mrb[14].mxu0 %v7232_v61  ;;  %5481 = vmatprep.mubr.f32.mxu1 %v9035_v45  ;;  %v9038_v61 = vld [vmem:[#allocation31_spill] sm:$0xff] }
  0xd6   : > { %5801 = vmatprep.mubr.f32.mxu0 %v7262_v22  ;;  %6309 = vmatpush3.bf16.msra.mxu0 %v6306_v36  ;;  %v7928_v22 = vld [vmem:[%s6921_s9 + $0x198] sm:$0xff]  ;;  %v9046_v36 = vld [vmem:[#allocation11_spill] sm:$0xff] }
  0xd7   : > { %6181 = vmatpush3.bf16.msra.mxu1 %v6178_v13  ;;  %6311 = vmatprep.subr.bf16.mxu0 %v6310_v33  ;;  %v6700_v13 = vld [vmem:[%s6921_s9 + $0x60] sm:$0xff] }
  0xd8   : > { %5482 = vmatmul.mubr.f32.gmra.mrb[16].mxu1 %v7653_v21 }
  0xd9   : > { %5802 = vmatmul.mubr.f32.gmra.mrb[16].mxu0 %v7266_v27  ;;  %5484 = vmatprep.mubr.f32.mxu1 %v7657_v57  ;;  %v9039_v27 = vld [vmem:[#allocation44_spill] sm:$0xff] }
  0xda   : > { %5804 = vmatprep.mubr.f32.mxu0 %v7299_v52  ;;  %v7935_v52 = vld [vmem:[%s6921_s9 + $0x1a0] sm:$0xff] }
  0xdc   : > { %5485 = vmatmul.mubr.f32.gmra.mrb[18].mxu1 %v7670_v19 }
  0xdd   : > { %5805 = vmatmul.mubr.f32.gmra.mrb[18].mxu0 %v7302_v14  ;;  %5487 = vmatprep.mubr.f32.mxu1 %v7674_v48  ;;  %v4727_v14 = vld [vmem:[%s8935_s1 + $0x410] sm:$0xff] }
  0xde   : > { %5807 = vmatprep.mubr.f32.mxu0 %v7324_v17  ;;  %v4728_v17 = vld [vmem:[%s8935_s1 + $0x418] sm:$0xff] }
  0xe0   : > { %5488 = vmatmul.mubr.f32.gmra.mrb[20].mxu1 %v7685_v5 }
  0xe1   : > { %5808 = vmatmul.mubr.f32.gmra.mrb[20].mxu0 %v7327_v26  ;;  %5490 = vmatprep.mubr.f32.mxu1 %v7689_v46  ;;  %v6696_v26 = vld [vmem:[%s6921_s9 + $0x18] sm:$0xff] }
  0xe2   : > { %5810 = vmatprep.mubr.f32.mxu0 %v7347_v51  ;;  %v9040_v51 = vld [vmem:[#allocation32_spill] sm:$0xff] }
  0xe4   : > { %5491 = vmatmul.mubr.f32.gmra.mrb[22].mxu1 %v7698_v50 }
  0xe5   : > { %5811 = vmatmul.mubr.f32.gmra.mrb[22].mxu0 %v7350_v3  ;;  %5493 = vmatprep.mubr.f32.mxu1 %v7702_v55  ;;  %v9041_v3 = vld [vmem:[#allocation6_spill] sm:$0xff] }
  0xe6   : > { %5813 = vmatprep.mubr.f32.mxu0 %v7369_v38 }
  0xe8   : > { %5494 = vmatmul.mubr.f32.gmra.mrb[24].mxu1 %v7711_v53 }
  0xe9   : > { %5814 = vmatmul.mubr.f32.gmra.mrb[24].mxu0 %v7372_v43  ;;  %5496 = vmatprep.mubr.f32.mxu1 %v7715_v30  ;;  %v6314_v43 = vpack.c.bf16 %v4728_v17, %v4727_v14  ;;  %v9048_v14 = vld [vmem:[#allocation13_spill] sm:$0xff]  ;;  %v6701_v17 = vld [vmem:[%s6921_s9 + $0x78] sm:$0xff] }
  0xea   : > { %5816 = vmatprep.mubr.f32.mxu0 %v7391_v63 }
  0xec   : > { %5497 = vmatmul.mubr.f32.gmra.mrb[26].mxu1 %v9036_v37 }
  0xed   : > { %5817 = vmatmul.mubr.f32.gmra.mrb[26].mxu0 %v7394_v15  ;;  %5499 = vmatprep.mubr.f32.mxu1 %v9037_v58 }
  0xee   : > { %5819 = vmatprep.mubr.f32.mxu0 %v9038_v61 }
  0xf0   : > { %5500 = vmatmul.mubr.f32.gmra.mrb[28].mxu1 %v9039_v27 }
  0xf1   : > { %5820 = vmatmul.mubr.f32.gmra.mrb[28].mxu0 %v9040_v51  ;;  %5502 = vmatprep.mubr.f32.mxu1 %v7741_v44 }
  0xf2   : > { %5822 = vmatprep.mubr.f32.mxu0 %v7928_v22 }
  0xf4   : > { %5503 = vmatmul.mubr.f32.gmra.mrb[30].mxu1 %v7750_v32 }
  0xf5   : > { %5823 = vmatmul.mubr.f32.gmra.mrb[30].mxu0 %v7935_v52  ;;  %5537 = vmatprep.mubr.f32.mxu1 %v6696_v26  ;;  %v9049_v26 = vld [vmem:[#allocation14_spill] sm:$0xff] }
  0xf6   : > { %5857 = vmatprep.mubr.f32.mxu0 %v9041_v3 }
  0xf8   : > { %5538 = vmatmul.mubr.f32.vlgmr.msra.gmra.mrb[0].mxu1 %v6697_v40  ;;  %v4738_v40 = vld [vmem:[%s8935_s1 + $0x468] sm:$0xff] }
  0xf9   : > { %5858 = vmatmul.mubr.f32.vlgmr.msra.gmra.mrb[0].mxu0 %v9042_v42  ;;  %5540 = vmatprep.mubr.f32.mxu1 %v6698_v29  ;;  %v9051_v42 = vld [vmem:[#allocation16_spill] sm:$0xff] }
  0xfa   : > { %6313 = vmatpush3.bf16.msra.mxu0 %v6310_v33  ;;  %5860 = vmatprep.mubr.f32.mxu0 %v9043_v9  ;;  %v4736_v33 = vld [vmem:[%s8935_s1 + $0x458] sm:$0xff] }
  0xfb   : > { %6315 = vmatprep.subr.bf16.mxu0 %v6314_v43  ;;  %v6704_v9 = vld [vmem:[%s6921_s9 + $0x98] sm:$0xff] }
  0xfc   : > { %5541 = vmatmul.mubr.f32.gmra.mrb[2].mxu1 %v7790_v7  ;;  %v4733_v7 = vld [vmem:[%s8935_s1 + $0x440] sm:$0xff] }
  0xfd   : > { %5861 = vmatmul.mubr.f32.gmra.mrb[2].mxu0 %v9044_v56  ;;  %5543 = vmatprep.mubr.f32.mxu1 %v6699_v12  ;;  %v6326_v0 = vpack.c.bf16 %v4734_v23, %v4733_v7  ;;  %v6705_v56 = vld [vmem:[%s6921_s9 + $0xa8] sm:$0xff]  ;;  %v9054_v7 = vld [vmem:[#allocation19_spill] sm:$0xff]  ;;  %v6707_v23 = vld [vmem:[%s6921_s9 + $0xc0] sm:$0xff] }
  0xfe   : > { %5863 = vmatprep.mubr.f32.mxu0 %v9045_v62  ;;  %6317 = vmatpush3.bf16.msra.mxu0 %v6314_v43  ;;  %v6702_v43 = vld [vmem:[%s6921_s9 + $0x80] sm:$0xff]  ;;  %v9053_v12 = vld [vmem:[#allocation18_spill] sm:$0xff] }
  0xff   : > { %6319 = vmatprep.subr.bf16.mxu0 %v6318_v54 }
 0x100   : > { %5544 = vmatmul.mubr.f32.gmra.mrb[4].mxu1 %v7811_v20  ;;  %v4735_v20 = vld [vmem:[%s8935_s1 + $0x450] sm:$0xff] }
 0x101   : > { %5864 = vmatmul.mubr.f32.gmra.mrb[4].mxu0 %v9046_v36  ;;  %5546 = vmatprep.mubr.f32.mxu1 %v6700_v13  ;;  %v6330_v3 = vpack.c.bf16 %v4736_v33, %v4735_v20  ;;  %v9055_v36 = vld [vmem:[#allocation20_spill] sm:$0xff]  ;;  %v6708_v13 = vld [vmem:[%s6921_s9 + $0xc8] sm:$0xff]  ;;  %v6710_v33 = vld [vmem:[%s6921_s9 + $0xe0] sm:$0xff] }
 0x102   : > { %5866 = vmatprep.mubr.f32.mxu0 %v9047_v24  ;;  %6321 = vmatpush3.bf16.msra.mxu0 %v6318_v54  ;;  %v4739_v54 = vld [vmem:[%s8935_s1 + $0x470] sm:$0xff]  ;;  %v9056_v24 = vld [vmem:[#allocation21_spill] sm:$0xff]  ;;  %v9057_v20 = vld [vmem:[#allocation22_spill] sm:$0xff] }
 0x103   : > { %6323 = vmatprep.subr.bf16.mxu0 %v6322_v11  ;;  %v6338_v62 = vpack.c.bf16 %v4740_v16, %v4739_v54  ;;  %v9064_v54 = vld [vmem:[#allocation29_spill] sm:$0xff]  ;;  %v6717_v16 = vld [vmem:[%s6921_s9 + $0x138] sm:$0xff] }
 0x104   : > { %5547 = vmatmul.mubr.f32.gmra.mrb[6].mxu1 %v7830_v10  ;;  %v4737_v10 = vld [vmem:[%s8935_s1 + $0x460] sm:$0xff] }
 0x105   : > { %5867 = vmatmul.mubr.f32.gmra.mrb[6].mxu0 %v9048_v14  ;;  %5549 = vmatprep.mubr.f32.mxu1 %v6701_v17  ;;  %v6334_v29 = vpack.c.bf16 %v4738_v40, %v4737_v10  ;;  %v9058_v14 = vld [vmem:[#allocation23_spill] sm:$0xff]  ;;  %v6713_v10 = vld [vmem:[%s6921_s9 + $0x108] sm:$0xff] }
 0x106   : > { %5869 = vmatprep.mubr.f32.mxu0 %v9049_v26  ;;  %6325 = vmatpush3.bf16.msra.mxu0 %v6322_v11  ;;  %v6706_v11 = vld [vmem:[%s6921_s9 + $0xb0] sm:$0xff]  ;;  %v9059_v26 = vld [vmem:[#allocation24_spill] sm:$0xff]  ;;  %v9061_v40 = vld [vmem:[#allocation26_spill] sm:$0xff] }
 0x107   : > { %6327 = vmatprep.subr.bf16.mxu0 %v6326_v0  ;;  %v6711_v17 = vld [vmem:[%s6921_s9 + $0xf0] sm:$0xff] }
 0x108   : > { %5550 = vmatmul.mubr.f32.gmra.mrb[8].mxu1 %v6702_v43  ;;  %v9060_v43 = vld [vmem:[#allocation25_spill] sm:$0xff] }
 0x109   : > { %5870 = vmatmul.mubr.f32.gmra.mrb[8].mxu0 %v9050_v39  ;;  %5552 = vmatprep.mubr.f32.mxu1 %v6703_v1  ;;  %v6714_v39 = vld [vmem:[%s6921_s9 + $0x110] sm:$0xff] }
 0x10a   : > { %5872 = vmatprep.mubr.f32.mxu0 %v9051_v42  ;;  %6329 = vmatpush3.bf16.msra.mxu0 %v6326_v0  ;;  %v6709_v0 = vld [vmem:[%s6921_s9 + $0xd8] sm:$0xff]  ;;  %v9062_v1 = vld [vmem:[#allocation27_spill] sm:$0xff]  ;;  %v6715_v42 = vld [vmem:[%s6921_s9 + $0x120] sm:$0xff] }
 0x10b   : > { %6331 = vmatprep.subr.bf16.mxu0 %v6330_v3 }
 0x10c   : > { %5553 = vmatmul.mubr.f32.gmra.mrb[10].mxu1 %v6704_v9  ;;  %v6716_v9 = vld [vmem:[%s6921_s9 + $0x128] sm:$0xff] }
 0x10d   : > { %5873 = vmatmul.mubr.f32.gmra.mrb[10].mxu0 %v9052_v8  ;;  %5555 = vmatprep.mubr.f32.mxu1 %v6705_v56  ;;  %v9065_v8 = vld [vmem:[#allocation30_spill] sm:$0xff]  ;;  %v6718_v56 = vld [vmem:[%s6921_s9 + $0x140] sm:$0xff] }
 0x10e   : > { %5875 = vmatprep.mubr.f32.mxu0 %v9053_v12  ;;  %6333 = vmatpush3.bf16.msra.mxu0 %v6330_v3  ;;  %v6712_v3 = vld [vmem:[%s6921_s9 + $0xf8] sm:$0xff]  ;;  %v9066_v12 = vld [vmem:[#allocation33_spill] sm:$0xff] }
 0x10f   : > { %6335 = vmatprep.subr.bf16.mxu0 %v6334_v29 }
 0x110   : > { %5556 = vmatmul.mubr.f32.gmra.mrb[12].mxu1 %v6706_v11  ;;  %v2441_v11 = vrot.slane %v7928_v22, 1 }
 0x111   : > { %5876 = vmatmul.mubr.f32.gmra.mrb[12].mxu0 %v9054_v7  ;;  %5558 = vmatprep.mubr.f32.mxu1 %v6707_v23  ;;  %v2442_v7 = vrot.slane %v7935_v52, 1  ;;  %v276_v23 = vld [vmem:[%s6921_s9 + $0x1a8] sm:$0x3] }
 0x112   : > { %5878 = vmatprep.mubr.f32.mxu0 %v9055_v36  ;;  %6337 = vmatpush3.bf16.msra.mxu0 %v6334_v29  ;;  %v9063_v29 = vld [vmem:[#allocation28_spill] sm:$0xff] }
 0x113   : > { %6339 = vmatprep.subr.bf16.mxu0 %v6338_v62  ;;  %v6719_v36 = vld [vmem:[%s6921_s9 + $0x158] sm:$0xff]  ;;  %s6724_s9 = sshll.u32 %s6787_s10, 4  ;;  %s6725_s9 = int_to_ptr.vmem [resolvable:$false] %s6724_s9 }
 0x114   : > { %5559 = vmatmul.mubr.f32.gmra.mrb[14].mxu1 %v6708_v13  ;;  %v9068_v13 = vld [vmem:[#allocation36_spill] sm:$0xff]  ;;  %s6726_s11 = scalar_lea.vmem %s6725_s9, 6144  ;;  %p6727_p0 = scmp.lt.s32.totalorder %s8874_s26, %s6725_s9 }
 0x115   : > { %5879 = vmatmul.mubr.f32.gmra.mrb[14].mxu0 %v9056_v24  ;;  %5561 = vmatprep.mubr.f32.mxu1 %v6709_v0  ;;  %v9069_v24 = vld [vmem:[#allocation37_spill] sm:$0xff]  ;;  %v2444_v0 = vrot.slane %v276_v23, 1  ;;  %p6728_p1 = scmp.lt.s32.totalorder %s6726_s11, %s6720_s8 }
 0x116   : > { %5881 = vmatprep.mubr.f32.mxu0 %v9057_v20  ;;  %6341 = vmatpush3.bf16.msra.mxu0 %v6338_v62  ;;  %v9067_v62 = vld [vmem:[#allocation34_spill] sm:$0xff]  ;;  %v2443_v20 = vsel %vm358_vm0, %v2441_v11, %v2442_v7 }
 0x117   : > { %p6729_p2 = por %p6728_p1, %p6727_p0 }
 0x118   : > { %5562 = vmatmul.mubr.f32.gmra.mrb[16].mxu1 %v6710_v33  ;;  %v2445_v33 = vsel %vm358_vm0, %v2442_v7, %v2444_v0  ;;  %v3033_v7 = vld [vmem:[%s8938_s4] sm:$0xff] }
 0x119   : > { %5882 = vmatmul.mubr.f32.gmra.mrb[16].mxu0 %v9058_v14  ;;  %5564 = vmatprep.mubr.f32.mxu1 %v6711_v17  ;;  %p6730_p3 = pnand %p6729_p2, %p6723_p13 }
 0x11a   : > { %5884 = vmatprep.mubr.f32.mxu0 %v9059_v26 }
 0x11c   : > { %5565 = vmatmul.mubr.f32.gmra.mrb[18].mxu1 %v6712_v3  ;;  %v8129_v3 = vld [vmem:[%s8936_s2] ss:$0 sm:$0xff] }
 0x11d   : > { %5885 = vmatmul.mubr.f32.gmra.mrb[18].mxu0 %v9060_v43  ;;  %5567 = vmatprep.mubr.f32.mxu1 %v6713_v10 }
 0x11e   : > { %5887 = vmatprep.mubr.f32.mxu0 %v9061_v40 }
 0x120   : > { %5568 = vmatmul.mubr.f32.gmra.mrb[20].mxu1 %v6714_v39 }
 0x121   : > { %5888 = vmatmul.mubr.f32.gmra.mrb[20].mxu0 %v9062_v1  ;;  %5570 = vmatprep.mubr.f32.mxu1 %v6715_v42 }
 0x122   : > { %5890 = vmatprep.mubr.f32.mxu0 %v9063_v29 }
 0x124   : > { %5571 = vmatmul.mubr.f32.gmra.mrb[22].mxu1 %v6716_v9 }
 0x125   : > { %5891 = vmatmul.mubr.f32.gmra.mrb[22].mxu0 %v9064_v54  ;;  %5573 = vmatprep.mubr.f32.mxu1 %v6717_v16 }
 0x126   : > { %5893 = vmatprep.mubr.f32.mxu0 %v9065_v8 }
 0x128   : > { %5574 = vmatmul.mubr.f32.gmra.mrb[24].mxu1 %v6718_v56 }
 0x129   : > { %5894 = vmatmul.mubr.f32.gmra.mrb[24].mxu0 %v9066_v12  ;;  %5576 = vmatprep.mubr.f32.mxu1 %v7369_v38  ;;  %v9070_v38 = vld [vmem:[#allocation38_spill] sm:$0xff] }
 0x12a   : > { %5896 = vmatprep.mubr.f32.mxu0 %v9067_v62 }
 0x12c   : > { %5577 = vmatmul.mubr.f32.gmra.mrb[26].mxu1 %v6719_v36 }
 0x12d   : > { %5897 = vmatmul.mubr.f32.gmra.mrb[26].mxu0 %v9068_v13  ;;  %5579 = vmatprep.mubr.f32.mxu1 %v7391_v63  ;;  %v2722_v63 = vrot.slane %v7928_v22, 2 }
 0x12e   : > { %5899 = vmatprep.mubr.f32.mxu0 %v9069_v24 }
 0x130   : > { %5580 = vmatmul.mubr.f32.gmra.mrb[28].mxu1 %v7394_v15  ;;  %v2723_v15 = vrot.slane %v7935_v52, 2 }
 0x131   : > { %5900 = vmatmul.mubr.f32.gmra.mrb[28].mxu0 %v9070_v38  ;;  %5582 = vmatprep.mubr.f32.mxu1 %v9038_v61 }
 0x132   : > { %5902 = vmatprep.mubr.f32.mxu0 %v2443_v20 }
 0x134   : > { %5583 = vmatmul.mubr.f32.gmra.mrb[30].mxu1 %v9040_v51 }
 0x135   : > { %5903 = vmatmul.mubr.f32.gmra.mrb[30].mxu0 %v2445_v33 }
 0x136   : > { %5937 = vmatprep.mubr.f32.mxu0 %v7480_v4  ;;  %v2725_v4 = vrot.slane %v276_v23, 2  ;;  %v3034_v23 = vld [vmem:[%s8938_s4 + $0x8] sm:$0xff] }
 0x137   : > { %v8155_v24 = vpack.c.bf16 %v3034_v23, %v3033_v7 }
 0x139   : > { %5938 = vmatmul.mubr.f32.vlgmr.msra.gmra.mrb[0].mxu0 %v7502_v47  ;;  %v2724_v47 = vsel %vm938_vm1, %v2722_v63, %v2723_v15  ;;  %6343 = vmatprep.subr.bf16.mxu1 %v8155_v24 }
 0x13a   : > { %5940 = vmatprep.mubr.f32.mxu0 %v7506_v60  ;;  %v2726_v60 = vsel %vm938_vm1, %v2723_v15, %v2725_v4  ;;  %6345 = vmatpush3.bf16.msra.mxu1 %v8155_v24 }
 0x13d   : > { %5941 = vmatmul.mubr.f32.gmra.mrb[2].mxu0 %v7528_v59  ;;  %v6784_v59 = vmov 0  }
 0x13e   : > { %5943 = vmatprep.mubr.f32.mxu0 %v7532_v28  ;;  %6669 = vset.pattern.permute.xlu0 %v6784_v59 }
 0x13f   : > { %6670 = vset.pattern.permute.xlu1 %v6784_v59 }
 0x141   : > { %5944 = vmatmul.mubr.f32.gmra.mrb[4].mxu0 %v7553_v35 }
 0x142   : > { %5946 = vmatprep.mubr.f32.mxu0 %v7557_v6 }
 0x145   : > { %5947 = vmatmul.mubr.f32.gmra.mrb[6].mxu0 %v7578_v41 }
 0x146   : > { %5949 = vmatprep.mubr.f32.mxu0 %v9033_v25 }
 0x149   : > { %5950 = vmatmul.mubr.f32.gmra.mrb[8].mxu0 %v7603_v31 }
 0x14a   : > { %5952 = vmatprep.mubr.f32.mxu0 %v9034_v2 }
 0x14d   : > { %5953 = vmatmul.mubr.f32.gmra.mrb[10].mxu0 %v7628_v34 }
 0x14e   : > { %5955 = vmatprep.mubr.f32.mxu0 %v9035_v45 }
 0x151   : > { %5956 = vmatmul.mubr.f32.gmra.mrb[12].mxu0 %v7653_v21 }
 0x152   : > { %5958 = vmatprep.mubr.f32.mxu0 %v7657_v57 }
 0x155   : > { %5959 = vmatmul.mubr.f32.gmra.mrb[14].mxu0 %v7670_v19 }
 0x156   : > { %5961 = vmatprep.mubr.f32.mxu0 %v7674_v48 }
 0x159   : > { %5962 = vmatmul.mubr.f32.gmra.mrb[16].mxu0 %v7685_v5 }
 0x15a   : > { %5964 = vmatprep.mubr.f32.mxu0 %v7689_v46 }
 0x15d   : > { %5965 = vmatmul.mubr.f32.gmra.mrb[18].mxu0 %v7698_v50 }
 0x15e   : > { %5967 = vmatprep.mubr.f32.mxu0 %v7702_v55 }
 0x161   : > { %5968 = vmatmul.mubr.f32.gmra.mrb[20].mxu0 %v7711_v53 }
 0x162   : > { %5970 = vmatprep.mubr.f32.mxu0 %v7715_v30 }
 0x165   : > { %5971 = vmatmul.mubr.f32.gmra.mrb[22].mxu0 %v9036_v37 }
 0x166   : > { %5973 = vmatprep.mubr.f32.mxu0 %v9037_v58 }
 0x169   : > { %5974 = vmatmul.mubr.f32.gmra.mrb[24].mxu0 %v9039_v27 }
 0x16a   : > { %5976 = vmatprep.mubr.f32.mxu0 %v7741_v44 }
 0x16d   : > { %5977 = vmatmul.mubr.f32.gmra.mrb[26].mxu0 %v7750_v32 }
 0x16e   : > { %5979 = vmatprep.mubr.f32.mxu0 %v7756_v49 }
 0x171   : > { %5980 = vmatmul.mubr.f32.gmra.mrb[28].mxu0 %v7764_v18 }
 0x172   : > { %5982 = vmatprep.mubr.f32.mxu0 %v2724_v47 }
 0x175   : > { %5983 = vmatmul.mubr.f32.gmra.mrb[30].mxu0 %v2726_v60 }
 0x1cb   : > { %v5539_v28 = vpop.f32.mrb[0].mxu1 }
 0x1cc   : > { %v1391_v35 = vpop.f32.mrb[1].mxu1 }
 0x1cf   : > { %v5542_v6 = vpop.f32.mrb[2].mxu1 }
 0x1d0   : > { %v1401_v41 = vpop.f32.mrb[3].mxu1 }
 0x1d3   : > { %v5545_v31 = vpop.f32.mrb[4].mxu1 }
 0x1d4   : > { %v1411_v34 = vpop.f32.mrb[5].mxu1 }
 0x1d7   : > { %v5548_v21 = vpop.f32.mrb[6].mxu1 }
 0x1d8   : > { %v1421_v49 = vpop.f32.mrb[7].mxu1 }
 0x1db   : > { %v5551_v57 = vpop.f32.mrb[8].mxu1 }
 0x1dc   : > { %v1431_v19 = vpop.f32.mrb[9].mxu1 }
 0x1df   : > { %v8082_v48 = vpop.f32.mrb[10].mxu1 }
 0x1e0   : > { %v8084_v5 = vpop.f32.mrb[11].mxu1 }
 0x1e3   : > { %v8086_v46 = vpop.f32.mrb[12].mxu1 }
 0x1e4   : > { %v8088_v50 = vpop.f32.mrb[13].mxu1 }
 0x1e7   : > { %v8090_v55 = vpop.f32.mrb[14].mxu1 }
 0x1e8   : > { %v8092_v53 = vpop.f32.mrb[15].mxu1 }
 0x1eb   : > { %v8094_v30 = vpop.f32.mrb[16].mxu1 }
 0x1ec   : > { %v8096_v44 = vpop.f32.mrb[17].mxu1 }
 0x1ef   : > { %v8098_v32 = vpop.f32.mrb[18].mxu1 }
 0x1f0   : > { %v8100_v18 = vpop.f32.mrb[19].mxu1 }
 0x1f3   : > { %v8102_v25 = vpop.f32.mrb[20].mxu1 }
 0x1f4   : > { %v8104_v2 = vpop.f32.mrb[21].mxu1 }
 0x1f7   : > { %v8106_v45 = vpop.f32.mrb[22].mxu1 }
 0x1f8   : > { %v8108_v37 = vpop.f32.mrb[23].mxu1 }
 0x1fb   : > { %v8110_v58 = vpop.f32.mrb[24].mxu1 }
 0x1fc   : > { %v8112_v61 = vpop.f32.mrb[25].mxu1 }
 0x1ff   : > { %v8114_v22 = vpop.f32.mrb[26].mxu1 }
 0x200   : > { %v8116_v27 = vpop.f32.mrb[27].mxu1 }
 0x203   : > { %v8118_v51 = vpop.f32.mrb[28].mxu1 }
 0x204   : > { %v8120_v52 = vpop.f32.mrb[29].mxu1 }
 0x207   : > { %v8122_v14 = vpop.f32.mrb[30].mxu1 }
 0x208   : > { %v8124_v17 = vpop.f32.mrb[31].mxu1 }
 0x20c   : > { %v5939_v26 = vpop.f32.mrb[0].mxu0 }
 0x20d   : > { %v6366_v43 = vadd.f32 %v5939_v26, %v5539_v28  ;;  %v2795_v10 = vpop.f32.mrb[1].mxu0 }
 0x20e   : > { %v6367_v40 = vadd.f32 %v2795_v10, %v1391_v35 }
 0x20f   : > { %v8132_v39 = vadd.f32 %v6366_v43, %v8129_v3 }
 0x210   : > { %v5942_v1 = vpop.f32.mrb[2].mxu0  ;;  %v8136_v54 = vadd.f32 %v6367_v40, %v8129_v3 }
 0x211   : > { %v6368_v42 = vadd.f32 %v5942_v1, %v5542_v6  ;;  %v2805_v29 = vpop.f32.mrb[3].mxu0  ;;  %3071 = vperm.xlu0 %6669, %v8132_v39  }
 0x212   : > { %v6369_v9 = vadd.f32 %v2805_v29, %v1401_v41 }
 0x213   : > { %v8139_v16 = vadd.f32 %v6368_v42, %v8129_v3 }
 0x214   : > { %v5945_v8 = vpop.f32.mrb[4].mxu0  ;;  %v8144_v11 = vadd.f32 %v6369_v9, %v8129_v3 }
 0x215   : > { %v6370_v56 = vadd.f32 %v5945_v8, %v5545_v31  ;;  %v2815_v12 = vpop.f32.mrb[5].mxu0  ;;  %3068 = vperm.xlu0 %6669, %v8136_v54   ;;  %3077 = vperm.xlu1 %6670, %v8139_v16  }
 0x216   : > { %v6371_v62 = vadd.f32 %v2815_v12, %v1411_v34 }
 0x217   : > { %v8161_v33 = vadd.f32 %v6370_v56, %v8129_v3 }
 0x218   : > { %v8153_v36 = vadd.f32 %v6371_v62, %v8129_v3  ;;  %v5948_v13 = vpop.f32.mrb[6].mxu0 }
 0x219   : > { %v6372_v0 = vadd.f32 %v5948_v13, %v5548_v21  ;;  %v2825_v20 = vpop.f32.mrb[7].mxu0  ;;  %3074 = vperm.xlu1 %6670, %v8144_v11  }
 0x21a   : > { %v6373_v38 = vadd.f32 %v2825_v20, %v1421_v49  ;;  %3080 = vperm.xlu0 %6669, %v8153_v36  }
 0x21b   : > { %v8170_v59 = vadd.f32 %v6372_v0, %v8129_v3 }
 0x21c   : > { %v8165_v63 = vadd.f32 %v6373_v38, %v8129_v3  ;;  %v5951_v15 = vpop.f32.mrb[8].mxu0 }
 0x21d   : > { %v6374_v4 = vadd.f32 %v5951_v15, %v5551_v57  ;;  %v2835_v47 = vpop.f32.mrb[9].mxu0  ;;  %3083 = vperm.xlu1 %6670, %v8161_v33  }
 0x21e   : > { %v6375_v60 = vadd.f32 %v2835_v47, %v1431_v19  ;;  %3086 = vperm.xlu0 %6669, %v8165_v63  }
 0x21f   : > { %v8180_v34 = vadd.f32 %v6374_v4, %v8129_v3 }
 0x220   : > { %v8173_v28 = vadd.f32 %v6375_v60, %v8129_v3  ;;  %v5954_v35 = vpop.f32.mrb[10].mxu0 }
 0x221   : > { %v6376_v6 = vadd.f32 %v5954_v35, %v8082_v48  ;;  %v2845_v41 = vpop.f32.mrb[11].mxu0  ;;  %3089 = vperm.xlu1 %6670, %v8170_v59  }
 0x222   : > { %v6377_v31 = vadd.f32 %v2845_v41, %v8084_v5  ;;  %3092 = vperm.xlu0 %6669, %v8173_v28  }
 0x223   : > { %v8190_v5 = vadd.f32 %v6376_v6, %v8129_v3 }
 0x224   : > { %v8183_v21 = vadd.f32 %v6377_v31, %v8129_v3  ;;  %v5957_v49 = vpop.f32.mrb[12].mxu0 }
 0x225   : > { %v6378_v57 = vadd.f32 %v5957_v49, %v8086_v46  ;;  %v2855_v19 = vpop.f32.mrb[13].mxu0  ;;  %3095 = vperm.xlu1 %6670, %v8180_v34  }
 0x226   : > { %v6379_v48 = vadd.f32 %v2855_v19, %v8088_v50  ;;  %3098 = vperm.xlu0 %6669, %v8183_v21  }
 0x227   : > { %v8200_v50 = vadd.f32 %v6378_v57, %v8129_v3 }
 0x228   : > { %v8193_v26 = vadd.f32 %v6379_v48, %v8129_v3  ;;  %v5960_v43 = vpop.f32.mrb[14].mxu0 }
 0x229   : > { %v6380_v10 = vadd.f32 %v5960_v43, %v8090_v55  ;;  %v2865_v40 = vpop.f32.mrb[15].mxu0  ;;  %3101 = vperm.xlu1 %6670, %v8190_v5  }
 0x22a   : > { %v6381_v46 = vadd.f32 %v2865_v40, %v8092_v53  ;;  %3104 = vperm.xlu0 %6669, %v8193_v26  }
 0x22b   : > { %v8210_v53 = vadd.f32 %v6380_v10, %v8129_v3 }
 0x22c   : > { %v8203_v1 = vadd.f32 %v6381_v46, %v8129_v3  ;;  %v5963_v42 = vpop.f32.mrb[16].mxu0 }
 0x22d   : > { %v6382_v29 = vadd.f32 %v5963_v42, %v8094_v30  ;;  %v2875_v9 = vpop.f32.mrb[17].mxu0  ;;  %3107 = vperm.xlu1 %6670, %v8200_v50  }
 0x22e   : > { %v6383_v55 = vadd.f32 %v2875_v9, %v8096_v44  ;;  %3110 = vperm.xlu0 %6669, %v8203_v1  }
 0x22f   : > { %v8220_v44 = vadd.f32 %v6382_v29, %v8129_v3 }
 0x230   : > { %v8213_v8 = vadd.f32 %v6383_v55, %v8129_v3  ;;  %v5966_v56 = vpop.f32.mrb[18].mxu0 }
 0x231   : > { %v6384_v12 = vadd.f32 %v5966_v56, %v8098_v32  ;;  %v2885_v62 = vpop.f32.mrb[19].mxu0  ;;  %3113 = vperm.xlu1 %6670, %v8210_v53  }
 0x232   : > { %v6385_v30 = vadd.f32 %v2885_v62, %v8100_v18  ;;  %3116 = vperm.xlu0 %6669, %v8213_v8  }
 0x233   : > { %v8230_v18 = vadd.f32 %v6384_v12, %v8129_v3 }
 0x234   : > { %v8223_v7 = vadd.f32 %v6385_v30, %v8129_v3  ;;  %v5969_v23 = vpop.f32.mrb[20].mxu0 }
 0x235   : > { %v6386_v13 = vadd.f32 %v5969_v23, %v8102_v25  ;;  %v2895_v0 = vpop.f32.mrb[21].mxu0  ;;  %3119 = vperm.xlu1 %6670, %v8220_v44   ;;  %v3163_v23 = vlaneseq }
 0x236   : > { %v6387_v32 = vadd.f32 %v2895_v0, %v8104_v2  ;;  %3122 = vperm.xlu0 %6669, %v8223_v7  }
 0x237   : > { %v8240_v2 = vadd.f32 %v6386_v13, %v8129_v3 }
 0x238   : > { %v8233_v20 = vadd.f32 %v6387_v32, %v8129_v3  ;;  %v5972_v38 = vpop.f32.mrb[22].mxu0  ;;  %v3164_v32 = vand.u32 127, %v3163_v23 }
 0x239   : > { %v6388_v15 = vadd.f32 %v5972_v38, %v8106_v45  ;;  %v2905_v4 = vpop.f32.mrb[23].mxu0  ;;  %3125 = vperm.xlu1 %6670, %v8230_v18  }
 0x23a   : > { %v6389_v25 = vadd.f32 %v2905_v4, %v8108_v37  ;;  %3128 = vperm.xlu0 %6669, %v8233_v20  }
 0x23b   : > { %v8250_v37 = vadd.f32 %v6388_v15, %v8129_v3  ;;  %v3166_v15 = vshrl.u32 %v3163_v23, 7 }
 0x23c   : > { %v8243_v47 = vadd.f32 %v6389_v25, %v8129_v3  ;;  %v5975_v60 = vpop.f32.mrb[24].mxu0 }
 0x23d   : > { %v6390_v35 = vadd.f32 %v5975_v60, %v8110_v58  ;;  %v2915_v6 = vpop.f32.mrb[25].mxu0  ;;  %3131 = vperm.xlu1 %6670, %v8240_v2   ;;  %v8332_v4 = vsub.s32 %v3164_v32, %v3166_v15 }
 0x23e   : > { %v6391_v45 = vadd.f32 %v2915_v6, %v8112_v61  ;;  %3134 = vperm.xlu0 %6669, %v8243_v47  }
 0x23f   : > { %v8260_v61 = vadd.f32 %v6390_v35, %v8129_v3 }
 0x240   : > { %v8253_v41 = vadd.f32 %v6391_v45, %v8129_v3  ;;  %v5978_v31 = vpop.f32.mrb[26].mxu0 }
 0x241   : > { %v6392_v49 = vadd.f32 %v5978_v31, %v8114_v22  ;;  %v2925_v57 = vpop.f32.mrb[27].mxu0  ;;  %3137 = vperm.xlu1 %6670, %v8250_v37  }
 0x242   : > { %v6393_v58 = vadd.f32 %v2925_v57, %v8116_v27  ;;  %3140 = vperm.xlu0 %6669, %v8253_v41  }
 0x243   : > { %v8270_v27 = vadd.f32 %v6392_v49, %v8129_v3 }
 0x244   : > { %v8263_v19 = vadd.f32 %v6393_v58, %v8129_v3  ;;  %v5981_v48 = vpop.f32.mrb[28].mxu0 }
 0x245   : > { %v6394_v43 = vadd.f32 %v5981_v48, %v8118_v51  ;;  %v2935_v10 = vpop.f32.mrb[29].mxu0  ;;  %3143 = vperm.xlu1 %6670, %v8260_v61  }
 0x246   : > { %v6395_v22 = vadd.f32 %v2935_v10, %v8120_v52  ;;  %3146 = vperm.xlu0 %6669, %v8263_v19  }
 0x247   : > { %v8280_v52 = vadd.f32 %v6394_v43, %v8129_v3 }
 0x248   : > { %v8273_v40 = vadd.f32 %v6395_v22, %v8129_v3  ;;  %v5984_v46 = vpop.f32.mrb[30].mxu0 }
 0x249   : > { %v6396_v42 = vadd.f32 %v5984_v46, %v8122_v14  ;;  %v2945_v29 = vpop.f32.mrb[31].mxu0  ;;  %3149 = vperm.xlu1 %6670, %v8270_v27   ;;  %v6785_v14 = vmov 1  }
 0x24a   : > { %v6397_v51 = vadd.f32 %v2945_v29, %v8124_v17  ;;  %3152 = vperm.xlu0 %6669, %v8273_v40  }
 0x24b   : > { %v8283_v9 = vadd.f32 %v6396_v42, %v8129_v3 }
 0x24c   : > { %v8286_v55 = vadd.f32 %v6397_v51, %v8129_v3  ;;  %v6786_v3 = vmov 2  }
 0x24d   : > { %3155 = vperm.xlu1 %6670, %v8280_v52  }
 0x24e   : > { %3158 = vperm.xlu0 %6669, %v8286_v55  }
 0x251   : > { %3161 = vperm.xlu1 %6670, %v8283_v9  }
 0x252   : > { %6671 = vset.pattern.permute.xlu0 %v6785_v14 }
 0x253   : > { %3542 = vperm.xlu0 %6671, %v8136_v54  }
 0x255   : > { %6672 = vset.pattern.permute.xlu1 %v6785_v14 }
 0x256   : > { %3545 = vperm.xlu1 %6672, %v8132_v39  }
 0x257   : > { %3551 = vperm.xlu0 %6671, %v8139_v16  }
 0x25a   : > { %3548 = vperm.xlu1 %6672, %v8144_v11  }
 0x25b   : > { %3557 = vperm.xlu0 %6671, %v8161_v33  }
 0x25e   : > { %3554 = vperm.xlu1 %6672, %v8153_v36  }
 0x25f   : > { %3593 = vperm.xlu0 %6671, %v8220_v44  }
 0x262   : > { %3590 = vperm.xlu1 %6672, %v8213_v8  }
 0x263   : > { %3599 = vperm.xlu0 %6671, %v8230_v18  }
 0x266   : > { %3596 = vperm.xlu1 %6672, %v8223_v7  }
 0x267   : > { %3563 = vperm.xlu0 %6671, %v8170_v59  }
 0x26a   : > { %3560 = vperm.xlu1 %6672, %v8165_v63  }
 0x26b   : > { %3605 = vperm.xlu0 %6671, %v8240_v2  }
 0x26e   : > { %3602 = vperm.xlu1 %6672, %v8233_v20  }
 0x26f   : > { %3569 = vperm.xlu0 %6671, %v8180_v34  }
 0x272   : > { %3566 = vperm.xlu1 %6672, %v8173_v28  }
 0x273   : > { %3611 = vperm.xlu0 %6671, %v8250_v37  }
 0x276   : > { %3608 = vperm.xlu1 %6672, %v8243_v47  }
 0x277   : > { %3575 = vperm.xlu0 %6671, %v8190_v5  }
 0x27a   : > { %3572 = vperm.xlu1 %6672, %v8183_v21  }
 0x27b   : > { %3617 = vperm.xlu0 %6671, %v8260_v61  }
 0x27e   : > { %3614 = vperm.xlu1 %6672, %v8253_v41  }
 0x27f   : > { %3581 = vperm.xlu0 %6671, %v8200_v50  }
 0x282   : > { %3578 = vperm.xlu1 %6672, %v8193_v26  }
 0x283   : > { %3623 = vperm.xlu0 %6671, %v8270_v27  }
 0x286   : > { %3620 = vperm.xlu1 %6672, %v8263_v19  }
 0x287   : > { %3587 = vperm.xlu0 %6671, %v8210_v53  }
 0x28a   : > { %3584 = vperm.xlu1 %6672, %v8203_v1  }
 0x28b   : > { %3629 = vperm.xlu0 %6671, %v8280_v52  }
 0x28e   : > { %3626 = vperm.xlu1 %6672, %v8273_v40  }
 0x28f   : > { %3635 = vperm.xlu0 %6671, %v8283_v9  }
 0x290   : > { %v3072_v17 = vpop.permute.xlu0 %3071 }
 0x292   : > { %3632 = vperm.xlu1 %6672, %v8286_v55  }
 0x293   : > { %6674 = vset.pattern.permute.xlu0 %v6786_v3 }
 0x294   : > { %v3069_v56 = vpop.permute.xlu0 %3068  ;;  %v3078_v12 = vpop.permute.xlu1 %3077  ;;  %3983 = vperm.xlu0 %6674, %v8132_v39  }
 0x295   : > { %v3168_v60 = vrot.slane %v3069_v56, %v8332_v4 }
 0x296   : > { %6673 = vset.pattern.permute.xlu1 %v6786_v3 }
 0x297   : > { %3980 = vperm.xlu1 %6673, %v8136_v54   ;;  %v3169_v54 = vadd.s32 4294967288, %v3164_v32 }
 0x298   : > { %v3075_v62 = vpop.permute.xlu1 %3074  ;;  %3992 = vperm.xlu0 %6674, %v8153_v36  }
 0x299   : > { %v3081_v30 = vpop.permute.xlu0 %3080  ;;  %v8334_v25 = vsub.s32 %v3169_v54, %v3166_v15 }
 0x29a   : > { %v3188_v6 = vrot.slane %v3081_v30, %v8332_v4 }
 0x29b   : > { %3986 = vperm.xlu1 %6673, %v8144_v11  }
 0x29c   : > { %v3084_v13 = vpop.permute.xlu1 %3083  ;;  %4028 = vperm.xlu0 %6674, %v8213_v8   ;;  %v3179_v8 = vrot.slane %v3075_v62, %v8332_v4 }
 0x29d   : > { %v3087_v0 = vpop.permute.xlu0 %3086 }
 0x29e   : > { %v3197_v49 = vrot.slane %v3087_v0, %v8332_v4 }
 0x29f   : > { %3989 = vperm.xlu1 %6673, %v8139_v16   ;;  %v3192_v16 = vrot.slane %v3084_v13, %v8334_v25 }
 0x2a0   : > { %v3090_v38 = vpop.permute.xlu1 %3089  ;;  %4034 = vperm.xlu0 %6674, %v8223_v7  }
 0x2a1   : > { %v3093_v39 = vpop.permute.xlu0 %3092  ;;  %v3193_v57 = vsel %vm3174_vm2, %v3192_v16, %v3188_v6 }
 0x2a2   : > { %v3206_v58 = vrot.slane %v3093_v39, %v8332_v4 }
 0x2a3   : > { %3995 = vperm.xlu1 %6673, %v8161_v33   ;;  %v3183_v33 = vrot.slane %v3078_v12, %v8334_v25 }
 0x2a4   : > { %v3096_v36 = vpop.permute.xlu1 %3095  ;;  %3998 = vperm.xlu0 %6674, %v8165_v63   ;;  %v3201_v63 = vrot.slane %v3090_v38, %v8334_v25 }
 0x2a5   : > { %v3099_v11 = vpop.permute.xlu0 %3098  ;;  %v3210_v45 = vrot.slane %v3096_v36, %v8334_v25  ;;  %v3184_v31 = vsel %vm3174_vm2, %v3183_v33, %v3179_v8 }
 0x2a6   : > { %v3202_v10 = vsel %vm3174_vm2, %v3201_v63, %v3197_v49  ;;  %v3215_v22 = vrot.slane %v3099_v11, %v8332_v4 }
 0x2a7   : > { %4031 = vperm.xlu1 %6673, %v8220_v44   ;;  %v3173_v44 = vrot.slane %v3072_v17, %v8334_v25  ;;  %v3211_v29 = vsel %vm3174_vm2, %v3210_v45, %v3206_v58 }
 0x2a8   : > { %v3102_v7 = vpop.permute.xlu1 %3101  ;;  %4040 = vperm.xlu0 %6674, %v8233_v20  }
 0x2a9   : > { %v3105_v35 = vpop.permute.xlu0 %3104  ;;  %v3219_v20 = vrot.slane %v3102_v7, %v8334_v25  ;;  %v3175_v43 = vsel %vm3174_vm2, %v3173_v44, %v3168_v60 }
 0x2aa   : > { %v3224_v51 = vrot.slane %v3105_v35, %v8332_v4 }
 0x2ab   : > { %4037 = vperm.xlu1 %6673, %v8230_v18   ;;  %v3312_v18 = vsel %vm3311_vm3, %v3184_v31, %v3175_v43 }
 0x2ac   : > { %v3108_v48 = vpop.permute.xlu1 %3107  ;;  %4004 = vperm.xlu0 %6674, %v8173_v28   ;;  %v3314_v14 = vsel %vm3313_vm4, %v3193_v57, %v3312_v18  ;;  %v3220_v28 = vsel %vm3174_vm2, %v3219_v20, %v3215_v22 }
 0x2ad   : > { %v3228_v46 = vrot.slane %v3108_v48, %v8334_v25  ;;  %v3111_v42 = vpop.permute.xlu0 %3110  ;;  %v3316_v17 = vsel %vm3315_vm5, %v3202_v10, %v3314_v14  ;;  %v8426_v14 = vld [vmem:[%s8937_s3] sm:$0xff] }
 0x2ae   : > { %v3318_v12 = vsel %vm3317_vm6, %v3211_v29, %v3316_v17  ;;  %v3233_v62 = vrot.slane %v3111_v42, %v8332_v4 }
 0x2af   : > { %4001 = vperm.xlu1 %6673, %v8170_v59   ;;  %v3229_v3 = vsel %vm3174_vm2, %v3228_v46, %v3224_v51  ;;  %v3320_v13 = vsel %vm3319_vm7, %v3220_v28, %v3318_v12 }
 0x2b0   : > { %v3114_v56 = vpop.permute.xlu1 %3113  ;;  %4046 = vperm.xlu0 %6674, %v8243_v47   ;;  %v3322_v0 = vsel %vm3321_vm8, %v3229_v3, %v3320_v13 }
 0x2b1   : > { %v3237_v30 = vrot.slane %v3114_v56, %v8334_v25  ;;  %v3117_v23 = vpop.permute.xlu0 %3116 }
 0x2b2   : > { %v3242_v7 = vrot.slane %v3117_v23, %v8332_v4 }
 0x2b3   : > { %v3238_v59 = vsel %vm3174_vm2, %v3237_v30, %v3233_v62  ;;  %4043 = vperm.xlu1 %6673, %v8240_v2  }
 0x2b4   : > { %v3120_v32 = vpop.permute.xlu1 %3119  ;;  %4010 = vperm.xlu0 %6674, %v8183_v21   ;;  %v3324_v47 = vsel %vm3323_vm9, %v3238_v59, %v3322_v0 }
 0x2b5   : > { %5989 = vmatprep.mubr.msk.f32.mxu1 %vm3332_vm10, %v3324_v47  ;;  %v3123_v38 = vpop.permute.xlu0 %3122 }
 0x2b7   : > { %4007 = vperm.xlu1 %6673, %v8180_v34  }
 0x2b8   : > { %v3126_v39 = vpop.permute.xlu1 %3125  ;;  %4052 = vperm.xlu0 %6674, %v8253_v41  }
 0x2b9   : > { %v3129_v15 = vpop.permute.xlu0 %3128  ;;  %v3255_v41 = vrot.slane %v3126_v39, %v8334_v25 }
 0x2ba   : > { %v3260_v16 = vrot.slane %v3129_v15, %v8332_v4 }
 0x2bb   : > { %4049 = vperm.xlu1 %6673, %v8250_v37  }
 0x2bc   : > { %v3132_v54 = vpop.permute.xlu1 %3131  ;;  %4016 = vperm.xlu0 %6674, %v8193_v26  }
 0x2bd   : > { %v3135_v2 = vpop.permute.xlu0 %3134  ;;  %v3264_v37 = vrot.slane %v3132_v54, %v8334_v25 }
 0x2be   : > { %v3269_v60 = vrot.slane %v3135_v2, %v8332_v4 }
 0x2bf   : > { %4013 = vperm.xlu1 %6673, %v8190_v5   ;;  %v3246_v5 = vrot.slane %v3120_v32, %v8334_v25 }
 0x2c0   : > { %v3138_v21 = vpop.permute.xlu1 %3137  ;;  %4058 = vperm.xlu0 %6674, %v8263_v19   ;;  %v3251_v19 = vrot.slane %v3123_v38, %v8332_v4 }
 0x2c1   : > { %v3141_v36 = vpop.permute.xlu0 %3140  ;;  %v3273_v8 = vrot.slane %v3138_v21, %v8334_v25  ;;  %v3247_v6 = vsel %vm3174_vm2, %v3246_v5, %v3242_v7 }
 0x2c2   : > { %v3278_v63 = vrot.slane %v3141_v36, %v8332_v4 }
 0x2c3   : > { %4055 = vperm.xlu1 %6673, %v8260_v61   ;;  %v3274_v45 = vsel %vm3174_vm2, %v3273_v8, %v3269_v60 }
 0x2c4   : > { %v3144_v11 = vpop.permute.xlu1 %3143  ;;  %4022 = vperm.xlu0 %6674, %v8203_v1  }
 0x2c5   : > { %v3147_v34 = vpop.permute.xlu0 %3146  ;;  %v3282_v1 = vrot.slane %v3144_v11, %v8334_v25 }
 0x2c6   : > { %v3287_v44 = vrot.slane %v3147_v34, %v8332_v4 }
 0x2c7   : > { %4019 = vperm.xlu1 %6673, %v8200_v50   ;;  %v3256_v50 = vsel %vm3174_vm2, %v3255_v41, %v3251_v19  ;;  %v3283_v20 = vsel %vm3174_vm2, %v3282_v1, %v3278_v63 }
 0x2c8   : > { %v3150_v26 = vpop.permute.xlu1 %3149  ;;  %4064 = vperm.xlu0 %6674, %v8273_v40   ;;  %v3265_v40 = vsel %vm3174_vm2, %v3264_v37, %v3260_v16  ;;  %v3325_v49 = vsel %vm3311_vm3, %v3256_v50, %v3247_v6 }
 0x2c9   : > { %v3153_v61 = vpop.permute.xlu0 %3152  ;;  %v3291_v33 = vrot.slane %v3150_v26, %v8334_v25  ;;  %v3326_v58 = vsel %vm3313_vm4, %v3265_v40, %v3325_v49  ;;  %v8469_v40 = vld [vmem:[%s8937_s3 + $0x8] sm:$0xff] }
 0x2cb   : > { %4061 = vperm.xlu1 %6673, %v8270_v27   ;;  %v3296_v27 = vrot.slane %v3153_v61, %v8332_v4  ;;  %v3292_v48 = vsel %vm3174_vm2, %v3291_v33, %v3287_v44 }
 0x2cc   : > { %v3156_v35 = vpop.permute.xlu1 %3155  ;;  %4070 = vperm.xlu0 %6674, %v8286_v55   ;;  %v3327_v55 = vsel %vm3315_vm5, %v3274_v45, %v3326_v58  ;;  %v8478_v45 = vld [vmem:[%s8937_s3 + $0x10] sm:$0xff] }
 0x2cd   : > { %v3300_v31 = vrot.slane %v3156_v35, %v8334_v25  ;;  %v3159_v57 = vpop.permute.xlu0 %3158  ;;  %v3328_v22 = vsel %vm3317_vm6, %v3283_v20, %v3327_v55 }
 0x2ce   : > { %v3305_v46 = vrot.slane %v3159_v57, %v8332_v4  ;;  %v3329_v18 = vsel %vm3319_vm7, %v3292_v48, %v3328_v22  ;;  %v8498_v22 = vld [vmem:[%s8937_s3 + $0x18] sm:$0xff] }
 0x2cf   : > { %4025 = vperm.xlu1 %6673, %v8210_v53   ;;  %v3301_v43 = vsel %vm3174_vm2, %v3300_v31, %v3296_v27 }
 0x2d0   : > { %v3162_v10 = vpop.permute.xlu1 %3161  ;;  %v3330_v29 = vsel %vm3321_vm8, %v3301_v43, %v3329_v18 }
 0x2d1   : > { %v3309_v42 = vrot.slane %v3162_v10, %v8334_v25 }
 0x2d2   : > { %v3543_v17 = vpop.permute.xlu0 %3542 }
 0x2d3   : > { %v3310_v51 = vsel %vm3174_vm2, %v3309_v42, %v3305_v46  ;;  %4067 = vperm.xlu1 %6673, %v8280_v52   ;;  %v3640_v44 = vrot.slane %v3543_v17, %v8332_v4 }
 0x2d4   : > { %v3331_v53 = vsel %vm3323_vm9, %v3310_v51, %v3330_v29  ;;  %v8507_v29 = vld [vmem:[%s8937_s3 + $0x20] sm:$0xff] }
 0x2d5   : > { %5990 = vmatmul.mubr.msk.f32.vlgmr.msra.gmra.mrb[32].mxu1 %vm3332_vm10, %v3331_v53  ;;  %v3546_v28 = vpop.permute.xlu1 %3545 }
 0x2d6   : > { %5996 = vmatprep.mubr.msk.f32.mxu1 %vm3332_vm10, %v8426_v14  ;;  %v3552_v56 = vpop.permute.xlu0 %3551  ;;  %v3644_v50 = vrot.slane %v3546_v28, %v8334_v25 }
 0x2d7   : > { %4073 = vperm.xlu1 %6673, %v8283_v9   ;;  %v3653_v60 = vrot.slane %v3552_v56, %v8334_v25 }
 0x2d8   : > { %v3645_v48 = vsel %vm3174_vm2, %v3644_v50, %v3640_v44 }
 0x2d9   : > { %v3549_v3 = vpop.permute.xlu1 %3548 }
 0x2da   : > { %v3558_v52 = vpop.permute.xlu0 %3557  ;;  %v3649_v61 = vrot.slane %v3549_v3, %v8332_v4 }
 0x2db   : > { %v3662_v63 = vrot.slane %v3558_v52, %v8334_v25 }
 0x2dc   : > { %v3654_v31 = vsel %vm3174_vm2, %v3653_v60, %v3649_v61 }
 0x2dd   : > { %v3555_v12 = vpop.permute.xlu1 %3554  ;;  %v3781_v46 = vsel %vm3311_vm3, %v3654_v31, %v3645_v48 }
 0x2de   : > { %v3594_v30 = vpop.permute.xlu0 %3593  ;;  %v3658_v1 = vrot.slane %v3555_v12, %v8332_v4 }
 0x2df   : > { %v3716_v57 = vrot.slane %v3594_v30, %v8334_v25 }
 0x2e0   : > { %v3663_v27 = vsel %vm3174_vm2, %v3662_v63, %v3658_v1 }
 0x2e1   : > { %v3591_v62 = vpop.permute.xlu1 %3590  ;;  %v3782_v51 = vsel %vm3313_vm4, %v3663_v27, %v3781_v46 }
 0x2e2   : > { %v3600_v13 = vpop.permute.xlu0 %3599  ;;  %v3712_v35 = vrot.slane %v3591_v62, %v8332_v4 }
 0x2e3   : > { %v3725_v6 = vrot.slane %v3600_v13, %v8334_v25 }
 0x2e4   : > { %v3717_v42 = vsel %vm3174_vm2, %v3716_v57, %v3712_v35 }
 0x2e5   : > { %v3597_v23 = vpop.permute.xlu1 %3596 }
 0x2e6   : > { %v3564_v9 = vpop.permute.xlu0 %3563  ;;  %v3721_v7 = vrot.slane %v3597_v23, %v8332_v4 }
 0x2e7   : > { %v3671_v49 = vrot.slane %v3564_v9, %v8334_v25  ;;  %v8535_v9 = vld [vmem:[%s8937_s3 + $0x28] sm:$0xff] }
 0x2e8   : > { %v3726_v58 = vsel %vm3174_vm2, %v3725_v6, %v3721_v7 }
 0x2e9   : > { %v3561_v59 = vpop.permute.xlu1 %3560  ;;  %v3788_v53 = vsel %vm3311_vm3, %v3726_v58, %v3717_v42 }
 0x2ea   : > { %v3606_v32 = vpop.permute.xlu0 %3605  ;;  %v3667_v33 = vrot.slane %v3561_v59, %v8332_v4 }
 0x2eb   : > { %v3734_v28 = vrot.slane %v3606_v32, %v8334_v25 }
 0x2ec   : > { %v3672_v55 = vsel %vm3174_vm2, %v3671_v49, %v3667_v33 }
 0x2ed   : > { %v8430_v0 = vpop.permute.xlu1 %3602  ;;  %v3783_v3 = vsel %vm3315_vm5, %v3672_v55, %v3782_v51 }
 0x2ee   : > { %v8434_v38 = vpop.permute.xlu0 %3569  ;;  %v3730_v43 = vrot.slane %v8430_v0, %v8332_v4 }
 0x2ef   : > { %v3680_v56 = vrot.slane %v8434_v38, %v8334_v25 }
 0x2f0   : > { %v3735_v62 = vsel %vm3174_vm2, %v3734_v28, %v3730_v43 }
 0x2f1   : > { %v8432_v47 = vpop.permute.xlu1 %3566 }
 0x2f2   : > { %v8438_v15 = vpop.permute.xlu0 %3611  ;;  %v3676_v18 = vrot.slane %v8432_v47, %v8332_v4 }
 0x2f3   : > { %v3743_v32 = vrot.slane %v8438_v15, %v8334_v25 }
 0x2f4   : > { %v3681_v0 = vsel %vm3174_vm2, %v3680_v56, %v3676_v18 }
 0x2f5   : > { %v8436_v39 = vpop.permute.xlu1 %3608 }
 0x2f6   : > { %v8442_v2 = vpop.permute.xlu0 %3575  ;;  %v3739_v12 = vrot.slane %v8436_v39, %v8332_v4  ;;  %v8547_v39 = vld [vmem:[%s8937_s3 + $0x30] sm:$0xff] }
 0x2f7   : > { %v3689_v30 = vrot.slane %v8442_v2, %v8334_v25 }
 0x2f9   : > { %v8440_v54 = vpop.permute.xlu1 %3572 }
 0x2fa   : > { %v8446_v36 = vpop.permute.xlu0 %3617  ;;  %v3685_v17 = vrot.slane %v8440_v54, %v8332_v4 }
 0x2fb   : > { %v3752_v2 = vrot.slane %v8446_v36, %v8334_v25  ;;  %v3784_v36 = vsel %vm3317_vm6, %v3681_v0, %v3783_v3 }
 0x2fc   : > { %v3690_v54 = vsel %vm3174_vm2, %v3689_v30, %v3685_v17 }
 0x2fd   : > { %v8444_v21 = vpop.permute.xlu1 %3614  ;;  %v3785_v1 = vsel %vm3319_vm7, %v3690_v54, %v3784_v36 }
 0x2fe   : > { %v8450_v34 = vpop.permute.xlu0 %3581  ;;  %v3748_v23 = vrot.slane %v8444_v21, %v8332_v4 }
 0x2ff   : > { %v3698_v47 = vrot.slane %v8450_v34, %v8334_v25  ;;  %v3744_v34 = vsel %vm3174_vm2, %v3743_v32, %v3739_v12 }
 0x301   : > { %v8448_v11 = vpop.permute.xlu1 %3578 }
 0x302   : > { %v8454_v37 = vpop.permute.xlu0 %3623  ;;  %v3694_v52 = vrot.slane %v8448_v11, %v8332_v4 }
 0x305   : > { %v8452_v41 = vpop.permute.xlu1 %3620 }
 0x306   : > { %v8459_v16 = vpop.permute.xlu0 %3587  ;;  %v3757_v38 = vrot.slane %v8452_v41, %v8332_v4  ;;  %v3699_v41 = vsel %vm3174_vm2, %v3698_v47, %v3694_v52 }
 0x307   : > { %v3707_v21 = vrot.slane %v8459_v16, %v8334_v25  ;;  %v3789_v16 = vsel %vm3313_vm4, %v3735_v62, %v3788_v53  ;;  %v3786_v63 = vsel %vm3321_vm8, %v3699_v41, %v3785_v1 }
 0x308   : > { %v3790_v60 = vsel %vm3315_vm5, %v3744_v34, %v3789_v16 }
 0x309   : > { %v8456_v5 = vpop.permute.xlu1 %3584 }
 0x30a   : > { %v3630_v10 = vpop.permute.xlu0 %3629  ;;  %v3703_v13 = vrot.slane %v8456_v5, %v8332_v4 }
 0x30b   : > { %v3770_v61 = vrot.slane %v3630_v10, %v8334_v25 }
 0x30d   : > { %v3627_v20 = vpop.permute.xlu1 %3626 }
 0x30e   : > { %v3766_v15 = vrot.slane %v3627_v20, %v8332_v4  ;;  %v3636_v11 = vpop.permute.xlu0 %3635 }
 0x30f   : > { %v3779_v50 = vrot.slane %v3636_v11, %v8334_v25 }
 0x310   : > { %v3771_v33 = vsel %vm3174_vm2, %v3770_v61, %v3766_v15 }
 0x311   : > { %v3633_v59 = vpop.permute.xlu1 %3632 }
 0x312   : > { %v3775_v5 = vrot.slane %v3633_v59, %v8332_v4 }
 0x313   : > { %v3984_v48 = vpop.permute.xlu0 %3983 }
 0x314   : > { %v3780_v6 = vsel %vm3174_vm2, %v3779_v50, %v3775_v5 }
 0x316   : > { %v3981_v27 = vpop.permute.xlu1 %3980 }
 0x317   : > { %v3993_v43 = vpop.permute.xlu0 %3992  ;;  %v4078_v1 = vrot.slane %v3981_v27, %v8332_v4 }
 0x318   : > { %v4096_v50 = vrot.slane %v3993_v43, %v8332_v4 }
 0x31a   : > { %v3987_v57 = vpop.permute.xlu1 %3986 }
 0x31b   : > { %v8594_v46 = vpop.permute.xlu0 %4028 }
 0x31e   : > { %v3990_v58 = vpop.permute.xlu1 %3989 }
 0x31f   : > { %v4035_v18 = vpop.permute.xlu0 %4034 }
 0x322   : > { %v3996_v55 = vpop.permute.xlu1 %3995 }
 0x323   : > { %v3999_v53 = vpop.permute.xlu0 %3998  ;;  %v4100_v61 = vrot.slane %v3996_v55, %v8334_v25 }
 0x324   : > { %v4105_v27 = vrot.slane %v3999_v53, %v8332_v4 }
 0x326   : > { %v8592_v10 = vpop.permute.xlu1 %4031 }
 0x327   : > { %v8598_v17 = vpop.permute.xlu0 %4040 }
 0x32a   : > { %v4038_v42 = vpop.permute.xlu1 %4037 }
 0x32b   : > { %v8602_v56 = vpop.permute.xlu0 %4004 }
 0x32e   : > { %v4002_v51 = vpop.permute.xlu1 %4001 }
 0x32f   : > { %v8606_v52 = vpop.permute.xlu0 %4046 }
 0x332   : > { %v8596_v28 = vpop.permute.xlu1 %4043 }
 0x333   : > { %v8610_v30 = vpop.permute.xlu0 %4010 }
 0x336   : > { %v8600_v3 = vpop.permute.xlu1 %4007 }
 0x337   : > { %v8616_v59 = vpop.permute.xlu0 %4052 }
 0x33a   : > { %v8604_v12 = vpop.permute.xlu1 %4049 }
 0x33b   : > { %v8626_v54 = vpop.permute.xlu0 %4016 }
 0x33e   : > { %v8608_v62 = vpop.permute.xlu1 %4013 }
 0x33f   : > { %v8636_v34 = vpop.permute.xlu0 %4058  ;;  %v4127_v53 = vrot.slane %v8608_v62, %v8334_v25 }
 0x343   : > { %v4023_v16 = vpop.permute.xlu0 %4022 }
 0x347   : > { %v4065_v55 = vpop.permute.xlu0 %4064 }
 0x3a8   : > { %v5991_v26 = vpop.f32.mrb[32].mxu1 }
 0x3a9   : > { %v3403_v19 = vpop.f32.mrb[33].mxu1 }
 0x3aa   : > { %v6346_v8 = vpack.c.bf16 %v5991_v26, %v3403_v19  ;;  %v3761_v26 = vrot.slane %v8454_v37, %v8334_v25  ;;  %v3753_v19 = vsel %vm3174_vm2, %v3752_v2, %v3748_v23  ;;  %v8571_v37 = vld [vmem:[%s8937_s3 + $0x38] sm:$0xff]  ;;  %v8612_v23 = vpop.permute.xlu1 %4055 }
 0x3ab   : > { %v3791_v35 = vsel %vm3317_vm6, %v3753_v19, %v3790_v60  ;;  %v4091_v19 = vrot.slane %v3990_v58, %v8334_v25  ;;  %v4163_v60 = vrot.slane %v4038_v42, %v8334_v25  ;;  %v4172_v42 = vrot.slane %v8596_v28, %v8334_v25 }
 0x3ac   : > { %6347 = vmatprep.subr.bf16.mxu1 %v6346_v8  ;;  %v3762_v7 = vsel %vm3174_vm2, %v3761_v26, %v3757_v38  ;;  %v4181_v28 = vrot.slane %v8604_v12, %v8334_v25  ;;  %v4190_v62 = vrot.slane %v8612_v23, %v8334_v25  ;;  %v4186_v23 = vrot.slane %v8616_v59, %v8332_v4 }
 0x3ad   : > { %6349 = vmatpush3.bf16.msra.mxu1 %v6346_v8  ;;  %v3708_v8 = vsel %vm3174_vm2, %v3707_v21, %v3703_v13  ;;  %v3792_v31 = vsel %vm3319_vm7, %v3762_v7, %v3791_v35  ;;  %v4087_v7 = vrot.slane %v3987_v57, %v8332_v4  ;;  %v4109_v35 = vrot.slane %v4002_v51, %v8334_v25 }
 0x3ae   : > { %6351 = vmatprep.subr.bf16.mxu1 %v8155_v24  ;;  %v3787_v44 = vsel %vm3323_vm9, %v3708_v8, %v3786_v63  ;;  %v3793_v49 = vsel %vm3321_vm8, %v3771_v33, %v3792_v31  ;;  %v8622_v47 = vpop.permute.xlu1 %4019  ;;  %v4082_v33 = vrot.slane %v3984_v48, %v8334_v25  ;;  %v4154_v31 = vrot.slane %v8592_v10, %v8334_v25 }
 0x3af   : > { %v3794_v20 = vsel %vm3323_vm9, %v3780_v6, %v3793_v49  ;;  %v4092_v63 = vsel %vm3174_vm2, %v4091_v19, %v4087_v7  ;;  %v4159_v6 = vrot.slane %v4035_v18, %v8332_v4  ;;  %v4150_v57 = vrot.slane %v8594_v46, %v8332_v4 }
 0x3b0   : > { %5997 = vmatmul.mubr.msk.f32.vlgmr.msra.gmra.mrb[34].mxu1 %vm3332_vm10, %v8469_v40  ;;  %v4110_v10 = vsel %vm3174_vm2, %v4109_v35, %v4105_v27  ;;  %v4118_v46 = vrot.slane %v8600_v3, %v8334_v25  ;;  %v4168_v51 = vrot.slane %v8598_v17, %v8332_v4  ;;  %v4136_v3 = vrot.slane %v8622_v47, %v8334_v25 }
 0x3b1   : > { %6353 = vmatpush3.bf16.msra.mxu1 %v8155_v24  ;;  %5999 = vmatprep.mubr.msk.f32.mxu1 %vm3332_vm10, %v8478_v45  ;;  %v4164_v48 = vsel %vm3174_vm2, %v4163_v60, %v4159_v6  ;;  %v4155_v18 = vsel %vm3174_vm2, %v4154_v31, %v4150_v57  ;;  %v4195_v60 = vrot.slane %v8636_v34, %v8332_v4 }
 0x3b2   : > { %v8632_v15 = vpop.permute.xlu1 %4061  ;;  %v4173_v12 = vsel %vm3174_vm2, %v4172_v42, %v4168_v51 }
 0x3b4   : > { %6000 = vmatmul.mubr.msk.f32.gmra.mrb[36].mxu1 %vm3332_vm10, %v8498_v22 }
 0x3b5   : > { %6002 = vmatprep.mubr.msk.f32.mxu1 %vm3332_vm10, %v8507_v29 }
 0x3b6   : > { %v8640_v5 = vpop.permute.xlu1 %4025 }
 0x3b8   : > { %6003 = vmatmul.mubr.msk.f32.gmra.mrb[38].mxu1 %vm3332_vm10, %v8535_v9 }
 0x3b9   : > { %6005 = vmatprep.mubr.msk.f32.mxu1 %vm3332_vm10, %v8547_v39 }
 0x3ba   : > { %v4068_v49 = vpop.permute.xlu1 %4067 }
 0x3bb   : > { %v4208_v7 = vrot.slane %v4068_v49, %v8334_v25 }
 0x3bc   : > { %6006 = vmatmul.mubr.msk.f32.gmra.mrb[40].mxu1 %vm3332_vm10, %v8571_v37 }
 0x3bd   : > { %6012 = vmatprep.mubr.msk.f32.mxu1 %vm3332_vm10, %v3787_v44  ;;  %v4101_v44 = vsel %vm3174_vm2, %v4100_v61, %v4096_v50 }
 0x3be   : > { %v4074_v19 = vpop.permute.xlu1 %4073 }
 0x3c0   : > { %6013 = vmatmul.mubr.msk.f32.vlgmr.msra.gmra.mrb[42].mxu1 %vm3332_vm10, %v3794_v20  ;;  %v4083_v20 = vsel %vm3174_vm2, %v4082_v33, %v4078_v1  ;;  %v4071_v1 = vpop.permute.xlu0 %4070  ;;  %v4217_v33 = vrot.slane %v4074_v19, %v8334_v25 }
 0x3c1   : > { %6019 = vmatprep.mubr.msk.f32.mxu1 %vm3332_vm10, %v8426_v14  ;;  %v4219_v58 = vsel %vm3311_vm3, %v4092_v63, %v4083_v20  ;;  %v4213_v6 = vrot.slane %v4071_v1, %v8332_v4 }
 0x3c2   : > { %v4220_v43 = vsel %vm3313_vm4, %v4101_v44, %v4219_v58 }
 0x3c3   : > { %v4221_v17 = vsel %vm3315_vm5, %v4110_v10, %v4220_v43  ;;  %v4218_v27 = vsel %vm3174_vm2, %v4217_v33, %v4213_v6 }
 0x483   : > { %v8614_v13 = vpop.f32.mrb[34].mxu1 }
 0x484   : > { %v8618_v0 = vpop.f32.mrb[35].mxu1  ;;  %v4418_v43 = vmul.f32 %v8614_v13, %v8614_v13 }
 0x487   : > { %v8620_v32 = vpop.f32.mrb[36].mxu1 }
 0x488   : > { %v8624_v38 = vpop.f32.mrb[37].mxu1 }
 0x48b   : > { %v8628_v2 = vpop.f32.mrb[38].mxu1 }
 0x48c   : > { %v8630_v21 = vpop.f32.mrb[39].mxu1 }
 0x48f   : > { %v8634_v11 = vpop.f32.mrb[40].mxu1 }
 0x490   : > { %v8638_v41 = vpop.f32.mrb[41].mxu1 }
 0x493   : > { %v6014_v26 = vpop.f32.mrb[42].mxu1 }
 0x494   : > { %v3865_v36 = vpop.f32.mrb[43].mxu1 }
 0x495   : > { %v6354_v8 = vpack.c.bf16 %v6014_v26, %v3865_v36  ;;  %v4226_v26 = vsel %vm3311_vm3, %v4164_v48, %v4155_v18  ;;  %v4177_v36 = vrot.slane %v8606_v52, %v8332_v4  ;;  %v4145_v52 = vrot.slane %v8640_v5, %v8334_v25 }
 0x496   : > { %v4141_v5 = vrot.slane %v4023_v16, %v8332_v4  ;;  %v4204_v16 = vrot.slane %v4065_v55, %v8332_v4  ;;  %v4227_v34 = vsel %vm3313_vm4, %v4173_v12, %v4226_v26 }
 0x497   : > { %6355 = vmatprep.subr.bf16.mxu1 %v6354_v8  ;;  %v4182_v50 = vsel %vm3174_vm2, %v4181_v28, %v4177_v36  ;;  %v4419_v28 = vmul.f32 %v8624_v38, %v8624_v38 }
 0x498   : > { %6357 = vmatpush3.bf16.msra.mxu1 %v6354_v8  ;;  %v4132_v8 = vrot.slane %v8626_v54, %v8332_v4  ;;  %v4146_v63 = vsel %vm3174_vm2, %v4145_v52, %v4141_v5  ;;  %v4228_v44 = vsel %vm3315_vm5, %v4182_v50, %v4227_v34  ;;  %v4209_v31 = vsel %vm3174_vm2, %v4208_v7, %v4204_v16 }
 0x499   : > { %6359 = vmatprep.subr.bf16.mxu1 %v8155_v24  ;;  %v4422_v52 = vmul.f32 %v8628_v2, %v8628_v2  ;;  %v4424_v5 = vmul.f32 %v8634_v11, %v8634_v11  ;;  %v4423_v50 = vmul.f32 %v8638_v41, %v8638_v41 }
 0x49a   : > { %v4137_v54 = vsel %vm3174_vm2, %v4136_v3, %v4132_v8 }
 0x49b   : > { %6020 = vmatmul.mubr.msk.f32.vlgmr.msra.gmra.mrb[44].mxu1 %vm3332_vm10, %v8469_v40 }
 0x49c   : > { %6361 = vmatpush3.bf16.msra.mxu1 %v8155_v24  ;;  %6022 = vmatprep.mubr.msk.f32.mxu1 %vm3332_vm10, %v8478_v45  ;;  %v4114_v24 = vrot.slane %v8602_v56, %v8332_v4  ;;  %v4123_v56 = vrot.slane %v8610_v30, %v8332_v4  ;;  %v4199_v30 = vrot.slane %v8632_v15, %v8334_v25 }
 0x49d   : > { %v4191_v15 = vsel %vm3174_vm2, %v4190_v62, %v4186_v23 }
 0x49e   : > { %v4119_v47 = vsel %vm3174_vm2, %v4118_v46, %v4114_v24  ;;  %v4128_v61 = vsel %vm3174_vm2, %v4127_v53, %v4123_v56  ;;  %v4200_v25 = vsel %vm3174_vm2, %v4199_v30, %v4195_v60  ;;  %v4229_v20 = vsel %vm3317_vm6, %v4191_v15, %v4228_v44 }
 0x49f   : > { %6023 = vmatmul.mubr.msk.f32.gmra.mrb[46].mxu1 %vm3332_vm10, %v8498_v22  ;;  %v4222_v59 = vsel %vm3317_vm6, %v4119_v47, %v4221_v17  ;;  %v4230_v58 = vsel %vm3319_vm7, %v4200_v25, %v4229_v20  ;;  %v4417_v46 = vmul.f32 %v8618_v0, %v8618_v0  ;;  %v4421_v47 = vmul.f32 %v8630_v21, %v8630_v21 }
 0x4a0   : > { %6025 = vmatprep.mubr.msk.f32.mxu1 %vm3332_vm10, %v8507_v29  ;;  %v4223_v35 = vsel %vm3319_vm7, %v4128_v61, %v4222_v59  ;;  %v4231_v4 = vsel %vm3321_vm8, %v4209_v31, %v4230_v58 }
 0x4a1   : > { %v4224_v49 = vsel %vm3321_vm8, %v4137_v54, %v4223_v35  ;;  %v4232_v48 = vsel %vm3323_vm9, %v4218_v27, %v4231_v4 }
 0x4a2   : > { %v4225_v57 = vsel %vm3323_vm9, %v4146_v63, %v4224_v49 }
 0x4a3   : > { %6026 = vmatmul.mubr.msk.f32.gmra.mrb[48].mxu1 %vm3332_vm10, %v8535_v9 }
 0x4a4   : > { %6028 = vmatprep.mubr.msk.f32.mxu1 %vm3332_vm10, %v8547_v39 }
 0x4a7   : > { %6029 = vmatmul.mubr.msk.f32.gmra.mrb[50].mxu1 %vm3332_vm10, %v8571_v37 }
 0x4a8   : > { %6035 = vmatprep.mubr.msk.f32.mxu1 %vm3332_vm10, %v4225_v57 }
 0x4ab   : > { %6036 = vmatmul.mubr.msk.f32.vlgmr.msra.gmra.mrb[52].mxu1 %vm3332_vm10, %v4232_v48 }
 0x4ac   : > { %6042 = vmatprep.mubr.msk.f32.mxu1 %vm3332_vm10, %v8426_v14  ;;  %v4420_v14 = vmul.f32 %v8620_v32, %v8620_v32 }
 0x56e   : > { %v8741_v55 = vpop.f32.mrb[44].mxu1 }
 0x56f   : > { %v4434_v10 = vmul.f32 %v8741_v55, %v8741_v55  ;;  %v8747_v42 = vpop.f32.mrb[45].mxu1 }
 0x570   : > { %v4433_v18 = vmul.f32 %v8747_v42, %v8747_v42 }
 0x571   : > { %v4442_v51 = vadd.f32 %v4434_v10, %v4418_v43 }
 0x572   : > { %v4441_v24 = vadd.f32 %v4433_v18, %v4417_v46  ;;  %v8753_v53 = vpop.f32.mrb[46].mxu1 }
 0x573   : > { %v4436_v26 = vmul.f32 %v8753_v53, %v8753_v53  ;;  %v8759_v36 = vpop.f32.mrb[47].mxu1 }
 0x574   : > { %v4435_v3 = vmul.f32 %v8759_v36, %v8759_v36 }
 0x575   : > { %v4444_v17 = vadd.f32 %v4436_v26, %v4420_v14 }
 0x576   : > { %v4443_v56 = vadd.f32 %v4435_v3, %v4419_v28  ;;  %v8765_v62 = vpop.f32.mrb[48].mxu1 }
 0x577   : > { %v4438_v19 = vmul.f32 %v8765_v62, %v8765_v62  ;;  %v8771_v12 = vpop.f32.mrb[49].mxu1 }
 0x578   : > { %v4437_v8 = vmul.f32 %v8771_v12, %v8771_v12 }
 0x579   : > { %v4446_v30 = vadd.f32 %v4438_v19, %v4422_v52 }
 0x57a   : > { %v4445_v23 = vadd.f32 %v4437_v8, %v4421_v47  ;;  %v8777_v61 = vpop.f32.mrb[50].mxu1 }
 0x57b   : > { %v4440_v1 = vmul.f32 %v8777_v61, %v8777_v61  ;;  %v8783_v7 = vpop.f32.mrb[51].mxu1 }
 0x57c   : > { %v4439_v60 = vmul.f32 %v8783_v7, %v8783_v7 }
 0x57d   : > { %v4448_v54 = vadd.f32 %v4440_v1, %v4424_v5 }
 0x57e   : > { %v4447_v33 = vadd.f32 %v4439_v60, %v4423_v50  ;;  %v6037_v59 = vpop.f32.mrb[52].mxu1 }
 0x57f   : > { %v4303_v15 = vpop.f32.mrb[53].mxu1 }
 0x580   : > { %v6362_v16 = vpack.c.bf16 %v6037_v59, %v4303_v15 }
 0x582   : > { %6363 = vmatprep.subr.bf16.mxu1 %v6362_v16 }
 0x583   : > { %6365 = vmatpush3.bf16.msra.mxu1 %v6362_v16 }
 0x586   : > { %6043 = vmatmul.mubr.msk.f32.vlgmr.msra.gmra.mrb[54].mxu1 %vm3332_vm10, %v8469_v40 }
 0x587   : > { %6045 = vmatprep.mubr.msk.f32.mxu1 %vm3332_vm10, %v8478_v45 }
 0x58a   : > { %6046 = vmatmul.mubr.msk.f32.gmra.mrb[56].mxu1 %vm3332_vm10, %v8498_v22 }
 0x58b   : > { %6048 = vmatprep.mubr.msk.f32.mxu1 %vm3332_vm10, %v8507_v29 }
 0x58e   : > { %6049 = vmatmul.mubr.msk.f32.gmra.mrb[58].mxu1 %vm3332_vm10, %v8535_v9 }
 0x58f   : > { %6051 = vmatprep.mubr.msk.f32.mxu1 %vm3332_vm10, %v8547_v39 }
 0x592   : > { %6052 = vmatmul.mubr.msk.f32.gmra.mrb[60].mxu1 %vm3332_vm10, %v8571_v37 }
 0x659   : > { %v6044_v63 = vpop.f32.mrb[54].mxu1 }
 0x65a   : > { %v4450_v40 = vmul.f32 %v6044_v63, %v6044_v63  ;;  %v4378_v34 = vpop.f32.mrb[55].mxu1 }
 0x65b   : > { %v4449_v35 = vmul.f32 %v4378_v34, %v4378_v34 }
 0x65c   : > { %v4458_v45 = vadd.f32 %v4450_v40, %v4442_v51 }
 0x65d   : > { %v4457_v25 = vadd.f32 %v4449_v35, %v4441_v24  ;;  %v6047_v22 = vpop.f32.mrb[56].mxu1 }
 0x65e   : > { %v4466_v6 = vmax.f32 %v4458_v45, 1e-24  ;;  %v4452_v44 = vmul.f32 %v6047_v22, %v6047_v22  ;;  %v4388_v29 = vpop.f32.mrb[57].mxu1 }
 0x65f   : > { %v4465_v31 = vmax.f32 %v4457_v25, 1e-24  ;;  %v4451_v49 = vmul.f32 %v4388_v29, %v4388_v29 }
 0x660   : > { %6675 = vrsqrt.f32 %v4466_v6  ;;  %v4460_v9 = vadd.f32 %v4452_v44, %v4444_v17 }
 0x661   : > { %6677 = vrsqrt.f32 %v4465_v31  ;;  %v4459_v39 = vadd.f32 %v4451_v49, %v4443_v56  ;;  %v6050_v20 = vpop.f32.mrb[58].mxu1 }
 0x662   : > { %v4468_v37 = vmax.f32 %v4460_v9, 1e-24  ;;  %v4454_v27 = vmul.f32 %v6050_v20, %v6050_v20  ;;  %v4398_v57 = vpop.f32.mrb[59].mxu1 }
 0x663   : > { %v4467_v58 = vmax.f32 %v4459_v39, 1e-24  ;;  %v4453_v4 = vmul.f32 %v4398_v57, %v4398_v57 }
 0x664   : > { %6679 = vrsqrt.f32 %v4468_v37  ;;  %v4462_v48 = vadd.f32 %v4454_v27, %v4446_v30 }
 0x665   : > { %6681 = vrsqrt.f32 %v4467_v58  ;;  %v4461_v43 = vadd.f32 %v4453_v4, %v4445_v23  ;;  %v8804_v10 = vpop.f32.mrb[60].mxu1 }
 0x666   : > { %v4470_v46 = vmax.f32 %v4462_v48, 1e-24  ;;  %v4456_v18 = vmul.f32 %v8804_v10, %v8804_v10  ;;  %v8810_v51 = vpop.f32.mrb[61].mxu1 }
 0x667   : > { %v4469_v24 = vmax.f32 %v4461_v43, 1e-24  ;;  %v4455_v14 = vmul.f32 %v8810_v51, %v8810_v51 }
 0x668   : > { %6683 = vrsqrt.f32 %v4470_v46  ;;  %v4464_v26 = vadd.f32 %v4456_v18, %v4448_v54 }
 0x669   : > { %6685 = vrsqrt.f32 %v4469_v24  ;;  %v4463_v28 = vadd.f32 %v4455_v14, %v4447_v33 }
 0x66a   : > { %v6676_v3 = vpop.eup %6675  ;;  %v4472_v17 = vmax.f32 %v4464_v26, 1e-24 }
 0x66b   : > { %v6678_v56 = vpop.eup %6677  ;;  %v4482_v52 = vmul.f32 %v6676_v3, %v8614_v13  ;;  %v4499_v19 = vmul.f32 %v6676_v3, %v8741_v55  ;;  %v4516_v47 = vmul.f32 %v6676_v3, %v6044_v63  ;;  %v4471_v8 = vmax.f32 %v4463_v28, 1e-24 }
 0x66c   : > { %v4481_v30 = vmul.f32 %v6678_v56, %v8618_v0  ;;  %v4498_v23 = vmul.f32 %v6678_v56, %v8747_v42  ;;  %v4515_v5 = vmul.f32 %v6678_v56, %v4378_v34  ;;  %6687 = vrsqrt.f32 %v4472_v17 }
 0x66d   : > { %4491 = vst.msk [vmem:[%s8818_s23 + $0x8] sm:$0xff] %vm4489_vm11, %v4482_v52  ;;  %4773 = vst.msk [vmem:[%s8818_s23 + $0x48] sm:$0xff] %vm4489_vm11, %v4499_v19  ;;  %6689 = vrsqrt.f32 %v4471_v8 }
 0x66e   : > { %4781 = vst.msk [vmem:[%s8818_s23 + $0x88] sm:$0xff] %vm4489_vm11, %v4516_v47  ;;  %v6680_v13 = vpop.eup %6679  ;;  %4490 = vst.msk [vmem:[%s8818_s23] sm:$0xff] %vm4489_vm11, %v4481_v30 }
 0x66f   : > { %4772 = vst.msk [vmem:[%s8818_s23 + $0x40] sm:$0xff] %vm4489_vm11, %v4498_v23  ;;  %4780 = vst.msk [vmem:[%s8818_s23 + $0x80] sm:$0xff] %vm4489_vm11, %v4515_v5  ;;  %v6682_v0 = vpop.eup %6681  ;;  %v4484_v55 = vmul.f32 %v6680_v13, %v8620_v32  ;;  %v4501_v42 = vmul.f32 %v6680_v13, %v8753_v53  ;;  %v4518_v1 = vmul.f32 %v6680_v13, %v6047_v22 }
 0x670   : > { %v4483_v50 = vmul.f32 %v6682_v0, %v8624_v38  ;;  %v4500_v60 = vmul.f32 %v6682_v0, %v8759_v36  ;;  %v4517_v54 = vmul.f32 %v6682_v0, %v4388_v29 }
 0x671   : > { %4493 = vst.msk [vmem:[%s8818_s23 + $0x18] sm:$0xff] %vm4489_vm11, %v4484_v55  ;;  %4775 = vst.msk [vmem:[%s8818_s23 + $0x58] sm:$0xff] %vm4489_vm11, %v4501_v42 }
 0x672   : > { %4783 = vst.msk [vmem:[%s8818_s23 + $0x98] sm:$0xff] %vm4489_vm11, %v4518_v1  ;;  %v6684_v32 = vpop.eup %6683  ;;  %4492 = vst.msk [vmem:[%s8818_s23 + $0x10] sm:$0xff] %vm4489_vm11, %v4483_v50 }
 0x673   : > { %4774 = vst.msk [vmem:[%s8818_s23 + $0x50] sm:$0xff] %vm4489_vm11, %v4500_v60  ;;  %4782 = vst.msk [vmem:[%s8818_s23 + $0x90] sm:$0xff] %vm4489_vm11, %v4517_v54  ;;  %v6686_v38 = vpop.eup %6685  ;;  %v4486_v53 = vmul.f32 %v6684_v32, %v8628_v2  ;;  %v4503_v36 = vmul.f32 %v6684_v32, %v8765_v62  ;;  %v4520_v33 = vmul.f32 %v6684_v32, %v6050_v20 }
 0x674   : > { %v4485_v59 = vmul.f32 %v6686_v38, %v8630_v21  ;;  %v4502_v15 = vmul.f32 %v6686_v38, %v8771_v12  ;;  %v4519_v16 = vmul.f32 %v6686_v38, %v4398_v57 }
 0x675   : > { %4495 = vst.msk [vmem:[%s8818_s23 + $0x28] sm:$0xff] %vm4489_vm11, %v4486_v53  ;;  %4777 = vst.msk [vmem:[%s8818_s23 + $0x68] sm:$0xff] %vm4489_vm11, %v4503_v36 }
 0x676   : > { %4785 = vst.msk [vmem:[%s8818_s23 + $0xa8] sm:$0xff] %vm4489_vm11, %v4520_v33  ;;  %v6688_v2 = vpop.eup %6687  ;;  %4494 = vst.msk [vmem:[%s8818_s23 + $0x20] sm:$0xff] %vm4489_vm11, %v4485_v59 }
 0x677   : > { %4776 = vst.msk [vmem:[%s8818_s23 + $0x60] sm:$0xff] %vm4489_vm11, %v4502_v15  ;;  %4784 = vst.msk [vmem:[%s8818_s23 + $0xa0] sm:$0xff] %vm4489_vm11, %v4519_v16  ;;  %v6690_v21 = vpop.eup %6689  ;;  %v4488_v62 = vmul.f32 %v6688_v2, %v8634_v11  ;;  %v4505_v12 = vmul.f32 %v6688_v2, %v8777_v61  ;;  %v4522_v63 = vmul.f32 %v6688_v2, %v8804_v10 }
 0x678   : > { %v4487_v40 = vmul.f32 %v6690_v21, %v8638_v41  ;;  %v4504_v34 = vmul.f32 %v6690_v21, %v8783_v7  ;;  %v4521_v11 = vmul.f32 %v6690_v21, %v8810_v51 }
 0x679   : > { %4497 = vst.msk [vmem:[%s8818_s23 + $0x38] sm:$0xff] %vm4489_vm11, %v4488_v62  ;;  %4779 = vst.msk [vmem:[%s8818_s23 + $0x78] sm:$0xff] %vm4489_vm11, %v4505_v12 }
 0x67a   : > { %4787 = vst.msk [vmem:[%s8818_s23 + $0xb8] sm:$0xff] %vm4489_vm11, %v4522_v63  ;;  %4496 = vst.msk [vmem:[%s8818_s23 + $0x30] sm:$0xff] %vm4489_vm11, %v4487_v40 }
 0x67b   : > { %4778 = vst.msk [vmem:[%s8818_s23 + $0x70] sm:$0xff] %vm4489_vm11, %v4504_v34  ;;  %4786 = vst.msk [vmem:[%s8818_s23 + $0xb0] sm:$0xff] %vm4489_vm11, %v4521_v11 }
 0x67c   : > { %6733 = shalt.err (!%p6730_p3)
}
 0x67d   : > { %s6734_s12 = scalar_lea.hbm %s8872_s6, 3072  ;;  %s6738_s15 = scalar_lea.hbm %s8939_s5, 6144 }
 0x67e   : > { %p6735_p4 = scmp.ne.s32.totalorder %s8872_s6, %s6734_s12  ;;  %p6739_p9 = scmp.lt.u32.totalorder %s8872_s6, %s8939_s5 }
 0x67f   : > { %p6740_p10 = scmp.lt.u32.totalorder %s6738_s15, %s6734_s12  ;;  %p6742_p12 = scmp.lt.u32.totalorder %s6734_s12, %s8872_s6 }
 0x680   : > { %p6736_p7 = pnand %p6735_p4, %p6858_p5 }
 0x681   : > { %p6741_p11 = por %p6740_p10, %p6739_p9 }
 0x682   : > { %p6737_p8 = pneg %p6736_p7 }
 0x683   : > { %p6743_p13 = por %p6742_p12, %p6741_p11 }
 0x685   : > { %p6744_p0 = pnand %p6743_p13, %p6737_p8 }
 0x687   : > { %6747 = shalt.err (!%p6744_p0)
}
 0x688   : > { %s6788_s23 = smov 128   ;;  %s6789_s25 = smov 8  }
 0x689   : > { %6625 = dma.vmem_to_hbm [thread:$0]  (%p6858_p5), %s8874_s26, 3072, %s8872_s6, %s8893_s7, %s6788_s23, %s6788_s23, %s6789_s25  }
 0x68a PF: > { %p6631_p1 = scmp.ge.s32.totalorder %s6782_s21, 2  ;;  %s4561_s22 = sand.u32 1, %s6770_s18  }
 0x68b   : > { %s4562_s30 = scalar_lea.sflag [#allocation3], %s4561_s22 }
 0x68c   : > { %p6628_p2 = pnand %p6631_p1, %p6862_p6 }
 0x68e   : > { %6765 = dma.done.wait (!%p6628_p2), %s4562_s30, 3072  }
 0x68f   : > { %6767 = vsyncadd (!%p6628_p2), %s4562_s30, 4294964224  ;;  %p15_p3 = scmp.ge.s32.totalorder %s6845_s24, 4   ;;  %s9071_s18 = smov %s6774_s19 }
 0x690   : > { %s9072_s19 = smov %s6778_s20  ;;  %s9073_s20 = smov %s6856_s27 }
 0x691   : > { %s9074_s21 = smov %s6845_s24  ;;  %17 = sbr.rel (!%p15_p3) target bundleno = 3 (0x3), region = 85 }
 0x698   :  { %4567 = vsyncpa [#allocation3], 1 }
 0x699   :  { %4569 = vsyncpa [#allocation3 + $0x1], 1 }

</bundles_post_ra>
